<compile_context>
chip_gen: v5e
topology: v5e:2x2
jax: 0.10.0
libtpu: 0.0.40
codegen_flags: <defaults>
</compile_context>

<pallas_src>
import functools
import math

import jax
import jax.numpy as jnp
import numpy as np
from jax.experimental import pallas as pl
from jax.experimental.pallas import tpu as pltpu


def _attention_kernel(x_ref, gather_ref, wsr_ref, bconv_ref, gamma_ref, beta_ref,
                      wq_ref, wkv_ref, mask_k_ref, mask_v_ref, wproj_ref, bproj_ref,
                      o_ref, *, num_heads, sr_ratio, H, W, ln_eps):
    f32 = jnp.float32
    N, C = x_ref.shape
    nh, sr = num_heads, sr_ratio
    Hk, Wk = H // sr, W // sr
    Nkv = Hk * Wk

    x = x_ref[...]                                                  # (N, C) f32

    # ---- q projection (qk scale already folded into wq host-side) ----------
    q = jnp.dot(x, wq_ref[...], preferred_element_type=f32)        # (N, C)

    # ---- spatial-reduction conv (kernel = stride = sr, non-overlapping) ----
    # Row t*Nkv + p of `patches` holds x[(hk*sr+i)*W + wk*sr + j, :] with
    # (i, j) = (t // sr, t % sr) and (hk, wk) = (p // Wk, p % Wk).  The 0/1
    # gather matrix is a precomputed host-side constant (VMEM-resident).
    patches = jnp.dot(gather_ref[...], x, preferred_element_type=f32)   # (sr*sr*Nkv, C)
    # Lane-concat the tap slabs -> (Nkv, sr*sr*C), then ONE matmul with
    # contraction depth sr*sr*C against the host-stacked conv weight.
    pcat = jnp.concatenate(
        [patches[t * Nkv:(t + 1) * Nkv, :] for t in range(sr * sr)], axis=1)
    x_sr = jnp.dot(pcat, wsr_ref[...], preferred_element_type=f32) + bconv_ref[...]

    # ---- LayerNorm over channels (two-pass, f32) ----------------------------
    mu = jnp.mean(x_sr, axis=-1, keepdims=True)
    xc = x_sr - mu
    var = jnp.mean(xc * xc, axis=-1, keepdims=True)
    x_ln = xc * jax.lax.rsqrt(var + ln_eps) * gamma_ref[...] + beta_ref[...]

    # ---- fused k/v projection (qkv_bias=False) ------------------------------
    kv = jnp.dot(x_ln, wkv_ref[...], preferred_element_type=f32)   # (Nkv, 2C)
    k, v = kv[:, :C], kv[:, C:]

    # ---- all-head attention via block-diagonal packing ----------------------
    # Kb[c, h*Nkv+m] = k[m, c] if head(c) == h else 0  -> scores for every head
    #   in ONE (N, C) @ (C, nh*Nkv) matmul; lane-dense (N, nh*Nkv) result.
    # Vb[h*Nkv+m, c] = v[m, c] if head(c) == h else 0  -> probs @ Vb returns the
    #   per-head weighted values already in (N, C) channel order (no concat).
    mask_k = mask_k_ref[...]                                        # (C, nh*Nkv) 0/1
    mask_v = mask_v_ref[...]                                        # (nh*Nkv, C) 0/1
    Kb = jnp.concatenate([k.T] * nh, axis=1) * mask_k               # (C, nh*Nkv)
    Vb = jnp.concatenate([v] * nh, axis=0) * mask_v                 # (nh*Nkv, C)

    s = jnp.dot(q, Kb, preferred_element_type=f32)                  # (N, nh*Nkv)

    # Per-head (segmented) softmax max -> exact and robust even if one head's
    # logits sit far below another head's.
    p_segs = []
    for h in range(nh):
        seg = s[:, h * Nkv:(h + 1) * Nkv]
        p_segs.append(jnp.exp(seg - jnp.max(seg, axis=-1, keepdims=True)))
    p = jnp.concatenate(p_segs, axis=1)                             # (N, nh*Nkv)

    # Fused weighted-values + per-head row-sum denominators: probs against
    # [Vb | mask_v] in one (N, nh*Nkv) @ (nh*Nkv, 2C) matmul, then slice.
    VbD = jnp.concatenate([Vb, mask_v], axis=1)                     # (nh*Nkv, 2C)
    ovd = jnp.dot(p, VbD, preferred_element_type=f32)               # (N, 2C)
    o = ovd[:, :C] / ovd[:, C:]                                     # softmax normalize

    # ---- output projection (attn_drop / proj_drop are identity at rate 0.0) -
    out = jnp.dot(o, wproj_ref[...], preferred_element_type=f32) + bproj_ref[...]
    o_ref[...] = out.astype(o_ref.dtype)


def attention_pallas(x, params, H, W, *, num_heads, sr_ratio):
    B, N, C = x.shape
    assert N == H * W and C % num_heads == 0
    # TODO(synk): sr_ratio == 1 path (no conv / LayerNorm) not implemented;
    # this kernel covers the sr_ratio > 1 branch exercised by the test.
    assert sr_ratio > 1 and H % sr_ratio == 0 and W % sr_ratio == 0
    sr = sr_ratio
    Hk, Wk = H // sr, W // sr
    Nkv = Hk * Wk
    hd = C // num_heads
    scale = hd ** -0.5

    # One-time host-side weight massaging (in a real model fold at init):
    # fold the qk scale into wq, keep the fused kv weight, and stack the conv
    # weight tap-major so the sr-conv is one K = sr*sr*C matmul in-kernel.
    wq = (params["wq"] * scale).astype(jnp.float32)
    wsr = (params["wconv"].reshape(C, sr, sr, C)
           .transpose(1, 2, 0, 3).reshape(sr * sr * C, C)).astype(jnp.float32)
    wkv = params["wkv"].astype(jnp.float32)
    wproj = params["wproj"].astype(jnp.float32)

    # Static 0/1 constants, hoisted out of the kernel (NumPy, built once):
    #  * gather: row t*Nkv + p selects x row (hk*sr+i)*W + wk*sr + j.
    #  * mask_k / mask_v: block-diagonal head masks.
    rows = np.arange(sr * sr * Nkv)
    t_idx, p_idx = rows // Nkv, rows % Nkv
    src = ((p_idx // Wk) * sr + t_idx // sr) * W + (p_idx % Wk) * sr + (t_idx % sr)
    gather = np.zeros((sr * sr * Nkv, N), np.float32)
    gather[rows, src] = 1.0

    head_of_c = np.arange(C) // hd                              # (C,)
    head_of_r = np.arange(num_heads * Nkv) // Nkv               # (nh*Nkv,)
    mask_k = (head_of_c[:, None] == head_of_r[None, :]).astype(np.float32)
    mask_v = np.ascontiguousarray(mask_k.T)

    kernel = functools.partial(
        _attention_kernel, num_heads=num_heads, sr_ratio=sr, H=H, W=W, ln_eps=1e-5)

    grid_spec = pltpu.PrefetchScalarGridSpec(
        num_scalar_prefetch=0,
        grid=(B,),  # one batch element per step; "parallel" -> both TCs on v7x
        in_specs=[
            pl.BlockSpec((None, N, C), lambda b: (b, 0, 0)),               # x
            pl.BlockSpec((sr * sr * Nkv, N), lambda b: (0, 0)),            # gather (const)
            pl.BlockSpec((sr * sr * C, C), lambda b: (0, 0)),              # conv taps (stacked)
            pl.BlockSpec((1, C), lambda b: (0, 0)),                        # bconv
            pl.BlockSpec((1, C), lambda b: (0, 0)),                        # gamma
            pl.BlockSpec((1, C), lambda b: (0, 0)),                        # beta
            pl.BlockSpec((C, C), lambda b: (0, 0)),                        # wq (scaled)
            pl.BlockSpec((C, 2 * C), lambda b: (0, 0)),                    # wkv (fused)
            pl.BlockSpec((C, num_heads * Nkv), lambda b: (0, 0)),          # mask_k (const)
            pl.BlockSpec((num_heads * Nkv, C), lambda b: (0, 0)),          # mask_v (const)
            pl.BlockSpec((C, C), lambda b: (0, 0)),                        # wproj
            pl.BlockSpec((1, C), lambda b: (0, 0)),                        # bproj
        ],
        out_specs=pl.BlockSpec((None, N, C), lambda b: (b, 0, 0)),
    )
    return pl.pallas_call(
        kernel,
        out_shape=jax.ShapeDtypeStruct((B, N, C), x.dtype),
        grid_spec=grid_spec,
        compiler_params=pltpu.CompilerParams(dimension_semantics=("parallel",)),
    )(x, jnp.asarray(gather), wsr, params["bconv"], params["gamma"], params["beta"],
      wq, wkv, jnp.asarray(mask_k), jnp.asarray(mask_v), wproj, params["bproj"])


def attention_ref(x, params, H, W, *, num_heads, sr_ratio):
    """Pure-JAX (f32) reference mirroring the PyTorch forward exactly."""
    B, N, C = x.shape
    hd = C // num_heads
    scale = hd ** -0.5
    sr = sr_ratio

    q = (x @ params["wq"]).reshape(B, N, num_heads, hd).transpose(0, 2, 1, 3)

    x_img = x.transpose(0, 2, 1).reshape(B, C, H, W)
    # (Cin*kH*kW, Cout) -> (Cout, Cin, kH, kW)
    w_conv4 = params["wconv"].reshape(C, sr, sr, C).transpose(3, 0, 1, 2)
    x_sr = jax.lax.conv_general_dilated(
        x_img, w_conv4, window_strides=(sr, sr), padding="VALID",
        dimension_numbers=("NCHW", "OIHW", "NCHW"))
    x_sr = x_sr + params["bconv"].reshape(1, C, 1, 1)
    x_sr = x_sr.reshape(B, C, -1).transpose(0, 2, 1)                      # (B, Nkv, C)

    mu = x_sr.mean(-1, keepdims=True)
    var = ((x_sr - mu) ** 2).mean(-1, keepdims=True)
    x_ln = (x_sr - mu) / jnp.sqrt(var + 1e-5)
    x_ln = x_ln * params["gamma"].reshape(1, 1, C) + params["beta"].reshape(1, 1, C)

    kv = (x_ln @ params["wkv"]).reshape(B, -1, 2, num_heads, hd).transpose(2, 0, 3, 1, 4)
    k, v = kv[0], kv[1]
    attn = (q @ jnp.swapaxes(k, -2, -1)) * scale
    attn = jax.nn.softmax(attn, axis=-1)
    out = (attn @ v).transpose(0, 2, 1, 3).reshape(B, N, C)
    out = out @ params["wproj"] + params["bproj"].reshape(1, 1, C)
    return out


def init_params(key, C, sr_ratio):
    ks = jax.random.split(key, 4)
    fan_out = sr_ratio * sr_ratio * C
    return {
        # trunc_normal(std=0.02) approximated with normal*0.02 (synthetic init).
        "wq": jax.random.normal(ks[0], (C, C), jnp.float32) * 0.02,
        "wkv": jax.random.normal(ks[1], (C, 2 * C), jnp.float32) * 0.02,
        "wproj": jax.random.normal(ks[2], (C, C), jnp.float32) * 0.02,
        "bproj": jnp.zeros((1, C), jnp.float32),
        "wconv": jax.random.normal(ks[3], (C * sr_ratio * sr_ratio, C), jnp.float32)
                 * math.sqrt(2.0 / fan_out),
        "bconv": jnp.zeros((1, C), jnp.float32),
        "gamma": jnp.ones((1, C), jnp.float32),
        "beta": jnp.zeros((1, C), jnp.float32),
    }


if __name__ == "__main__":
    B, C = 2, 32
    num_heads = 4
    H = W = 16
    N = H * W
    sr_ratio = 2

    key = jax.random.PRNGKey(0)
    kx, kp = jax.random.split(key)
    x = jax.random.normal(kx, (B, N, C), jnp.float32)
    params = init_params(kp, C, sr_ratio)

    out = attention_pallas(x, params, H, W, num_heads=num_heads, sr_ratio=sr_ratio)
    out = jax.block_until_ready(out)

    ref = attention_ref(x, params, H, W, num_heads=num_heads, sr_ratio=sr_ratio)
    # All kernel matmuls are f32 with f32 accumulation; remaining differences
    # are accumulation-order only.
    np.testing.assert_allclose(np.asarray(out), np.asarray(ref), rtol=1e-3, atol=1e-5)

    print("KERNEL_OK")
</pallas_src>

<mosaic_0001>
module attributes {stable_mosaic.version = 11 : i64} {
  func.func @_attention_kernel(%arg0: i32, %arg1: memref<1x256x32xf32, #tpu.memory_space<vmem>>, %arg2: memref<256x256xf32, #tpu.memory_space<vmem>>, %arg3: memref<128x32xf32, #tpu.memory_space<vmem>>, %arg4: memref<1x32xf32, #tpu.memory_space<vmem>>, %arg5: memref<1x32xf32, #tpu.memory_space<vmem>>, %arg6: memref<1x32xf32, #tpu.memory_space<vmem>>, %arg7: memref<32x32xf32, #tpu.memory_space<vmem>>, %arg8: memref<32x64xf32, #tpu.memory_space<vmem>>, %arg9: memref<32x256xf32, #tpu.memory_space<vmem>>, %arg10: memref<256x32xf32, #tpu.memory_space<vmem>>, %arg11: memref<32x32xf32, #tpu.memory_space<vmem>>, %arg12: memref<1x32xf32, #tpu.memory_space<vmem>>, %arg13: memref<1x256x32xf32, #tpu.memory_space<vmem>>) attributes {dimension_semantics = [#tpu.dimension_semantics<parallel>], iteration_bounds = array<i64: 2>, scalar_prefetch = 0 : i64, scratch_operands = 0 : i64, tpu.core_type = #tpu.core_type<tc>, window_params = [{transform_indices = @transform_0, window_bounds = array<i64: 1, 256, 32>}, {pipeline_mode = #tpu.pipeline_mode<synchronous>, transform_indices = @transform_1, window_bounds = array<i64: 256, 256>}, {pipeline_mode = #tpu.pipeline_mode<synchronous>, transform_indices = @transform_2, window_bounds = array<i64: 128, 32>}, {pipeline_mode = #tpu.pipeline_mode<synchronous>, transform_indices = @transform_3, window_bounds = array<i64: 1, 32>}, {pipeline_mode = #tpu.pipeline_mode<synchronous>, transform_indices = @transform_4, window_bounds = array<i64: 1, 32>}, {pipeline_mode = #tpu.pipeline_mode<synchronous>, transform_indices = @transform_5, window_bounds = array<i64: 1, 32>}, {pipeline_mode = #tpu.pipeline_mode<synchronous>, transform_indices = @transform_6, window_bounds = array<i64: 32, 32>}, {pipeline_mode = #tpu.pipeline_mode<synchronous>, transform_indices = @transform_7, window_bounds = array<i64: 32, 64>}, {pipeline_mode = #tpu.pipeline_mode<synchronous>, transform_indices = @transform_8, window_bounds = array<i64: 32, 256>}, {pipeline_mode = #tpu.pipeline_mode<synchronous>, transform_indices = @transform_9, window_bounds = array<i64: 256, 32>}, {pipeline_mode = #tpu.pipeline_mode<synchronous>, transform_indices = @transform_10, window_bounds = array<i64: 32, 32>}, {pipeline_mode = #tpu.pipeline_mode<synchronous>, transform_indices = @transform_11, window_bounds = array<i64: 1, 32>}, {transform_indices = @transform_12, window_bounds = array<i64: 1, 256, 32>}]} {
    %c0 = arith.constant 0 : index
    %c0_0 = arith.constant 0 : index
    %c0_1 = arith.constant 0 : index
    %0 = vector.load %arg1[%c0, %c0_0, %c0_1] : memref<1x256x32xf32, #tpu.memory_space<vmem>>, vector<1x256x32xf32>
    %1 = vector.shape_cast %0 : vector<1x256x32xf32> to vector<256x32xf32>
    %c0_2 = arith.constant 0 : index
    %c0_3 = arith.constant 0 : index
    %2 = vector.load %arg7[%c0_2, %c0_3] : memref<32x32xf32, #tpu.memory_space<vmem>>, vector<32x32xf32>
    %cst = arith.constant dense<0.000000e+00> : vector<256x32xf32>
    %3 = tpu.matmul %1, %2, %cst {dimension_numbers = #tpu.dot_dimension_numbers<[1], [0], [0], [1], [0, 0, 1, 1], [], []>} : vector<256x32xf32>, vector<32x32xf32>, vector<256x32xf32> -> vector<256x32xf32>
    %c0_4 = arith.constant 0 : index
    %c0_5 = arith.constant 0 : index
    %4 = vector.load %arg2[%c0_4, %c0_5] : memref<256x256xf32, #tpu.memory_space<vmem>>, vector<256x256xf32>
    %cst_6 = arith.constant dense<0.000000e+00> : vector<256x32xf32>
    %5 = tpu.matmul %4, %1, %cst_6 {dimension_numbers = #tpu.dot_dimension_numbers<[1], [0], [0], [1], [0, 0, 1, 1], [], []>} : vector<256x256xf32>, vector<256x32xf32>, vector<256x32xf32> -> vector<256x32xf32>
    %6 = vector.extract_strided_slice %5 {offsets = [0, 0], sizes = [64, 32], strides = [1, 1]} : vector<256x32xf32> to vector<64x32xf32>
    %7 = vector.extract_strided_slice %5 {offsets = [64, 0], sizes = [64, 32], strides = [1, 1]} : vector<256x32xf32> to vector<64x32xf32>
    %8 = vector.extract_strided_slice %5 {offsets = [128, 0], sizes = [64, 32], strides = [1, 1]} : vector<256x32xf32> to vector<64x32xf32>
    %9 = vector.extract_strided_slice %5 {offsets = [192, 0], sizes = [64, 32], strides = [1, 1]} : vector<256x32xf32> to vector<64x32xf32>
    %10 = tpu.concatenate %6, %7, %8, %9 in 1 : vector<64x32xf32>, vector<64x32xf32>, vector<64x32xf32>, vector<64x32xf32> -> vector<64x128xf32>
    %c0_7 = arith.constant 0 : index
    %c0_8 = arith.constant 0 : index
    %11 = vector.load %arg3[%c0_7, %c0_8] : memref<128x32xf32, #tpu.memory_space<vmem>>, vector<128x32xf32>
    %cst_9 = arith.constant dense<0.000000e+00> : vector<64x32xf32>
    %12 = tpu.matmul %10, %11, %cst_9 {dimension_numbers = #tpu.dot_dimension_numbers<[1], [0], [0], [1], [0, 0, 1, 1], [], []>} : vector<64x128xf32>, vector<128x32xf32>, vector<64x32xf32> -> vector<64x32xf32>
    %c0_10 = arith.constant 0 : index
    %c0_11 = arith.constant 0 : index
    %13 = vector.load %arg4[%c0_10, %c0_11] : memref<1x32xf32, #tpu.memory_space<vmem>>, vector<1x32xf32>
    %14 = vector.broadcast %13 : vector<1x32xf32> to vector<64x32xf32>
    %15 = arith.addf %12, %14 : vector<64x32xf32>
    %cst_12 = arith.constant dense<0.000000e+00> : vector<64xf32>
    %16 = vector.multi_reduction <add>, %15, %cst_12 [1] : vector<64x32xf32> to vector<64xf32>
    %17 = vector.shape_cast %16 : vector<64xf32> to vector<64x1xf32>
    %cst_13 = arith.constant 3.200000e+01 : f32
    %18 = vector.broadcast %cst_13 : f32 to vector<64x1xf32>
    %19 = arith.divf %17, %18 : vector<64x1xf32>
    %20 = vector.broadcast %19 : vector<64x1xf32> to vector<64x32xf32>
    %21 = arith.subf %15, %20 : vector<64x32xf32>
    %22 = arith.mulf %21, %21 : vector<64x32xf32>
    %cst_14 = arith.constant dense<0.000000e+00> : vector<64xf32>
    %23 = vector.multi_reduction <add>, %22, %cst_14 [1] : vector<64x32xf32> to vector<64xf32>
    %24 = vector.shape_cast %23 : vector<64xf32> to vector<64x1xf32>
    %cst_15 = arith.constant 3.200000e+01 : f32
    %25 = vector.broadcast %cst_15 : f32 to vector<64x1xf32>
    %26 = arith.divf %24, %25 : vector<64x1xf32>
    %cst_16 = arith.constant 9.99999974E-6 : f32
    %27 = vector.broadcast %cst_16 : f32 to vector<64x1xf32>
    %28 = arith.addf %26, %27 : vector<64x1xf32>
    %29 = math.rsqrt %28 : vector<64x1xf32>
    %30 = vector.broadcast %29 : vector<64x1xf32> to vector<64x32xf32>
    %31 = arith.mulf %21, %30 : vector<64x32xf32>
    %c0_17 = arith.constant 0 : index
    %c0_18 = arith.constant 0 : index
    %32 = vector.load %arg5[%c0_17, %c0_18] : memref<1x32xf32, #tpu.memory_space<vmem>>, vector<1x32xf32>
    %33 = vector.broadcast %32 : vector<1x32xf32> to vector<64x32xf32>
    %34 = arith.mulf %31, %33 : vector<64x32xf32>
    %c0_19 = arith.constant 0 : index
    %c0_20 = arith.constant 0 : index
    %35 = vector.load %arg6[%c0_19, %c0_20] : memref<1x32xf32, #tpu.memory_space<vmem>>, vector<1x32xf32>
    %36 = vector.broadcast %35 : vector<1x32xf32> to vector<64x32xf32>
    %37 = arith.addf %34, %36 : vector<64x32xf32>
    %c0_21 = arith.constant 0 : index
    %c0_22 = arith.constant 0 : index
    %38 = vector.load %arg8[%c0_21, %c0_22] : memref<32x64xf32, #tpu.memory_space<vmem>>, vector<32x64xf32>
    %cst_23 = arith.constant dense<0.000000e+00> : vector<64x64xf32>
    %39 = tpu.matmul %37, %38, %cst_23 {dimension_numbers = #tpu.dot_dimension_numbers<[1], [0], [0], [1], [0, 0, 1, 1], [], []>} : vector<64x32xf32>, vector<32x64xf32>, vector<64x64xf32> -> vector<64x64xf32>
    %40 = vector.extract_strided_slice %39 {offsets = [0, 0], sizes = [64, 32], strides = [1, 1]} : vector<64x64xf32> to vector<64x32xf32>
    %41 = vector.extract_strided_slice %39 {offsets = [0, 32], sizes = [64, 32], strides = [1, 1]} : vector<64x64xf32> to vector<64x32xf32>
    %c0_24 = arith.constant 0 : index
    %c0_25 = arith.constant 0 : index
    %42 = vector.load %arg9[%c0_24, %c0_25] : memref<32x256xf32, #tpu.memory_space<vmem>>, vector<32x256xf32>
    %c0_26 = arith.constant 0 : index
    %c0_27 = arith.constant 0 : index
    %43 = vector.load %arg10[%c0_26, %c0_27] : memref<256x32xf32, #tpu.memory_space<vmem>>, vector<256x32xf32>
    %44 = tpu.transpose %40, [1, 0] : vector<64x32xf32> -> vector<32x64xf32>
    %45 = tpu.concatenate %44, %44, %44, %44 in 1 : vector<32x64xf32>, vector<32x64xf32>, vector<32x64xf32>, vector<32x64xf32> -> vector<32x256xf32>
    %46 = arith.mulf %45, %42 : vector<32x256xf32>
    %47 = tpu.concatenate %41, %41, %41, %41 in 0 : vector<64x32xf32>, vector<64x32xf32>, vector<64x32xf32>, vector<64x32xf32> -> vector<256x32xf32>
    %48 = arith.mulf %47, %43 : vector<256x32xf32>
    %cst_28 = arith.constant dense<0.000000e+00> : vector<256x256xf32>
    %49 = tpu.matmul %3, %46, %cst_28 {dimension_numbers = #tpu.dot_dimension_numbers<[1], [0], [0], [1], [0, 0, 1, 1], [], []>} : vector<256x32xf32>, vector<32x256xf32>, vector<256x256xf32> -> vector<256x256xf32>
    %50 = vector.extract_strided_slice %49 {offsets = [0, 0], sizes = [256, 64], strides = [1, 1]} : vector<256x256xf32> to vector<256x64xf32>
    %cst_29 = arith.constant dense<0xFF800000> : vector<256xf32>
    %51 = vector.multi_reduction <maximumf>, %50, %cst_29 [1] : vector<256x64xf32> to vector<256xf32>
    %52 = vector.shape_cast %51 : vector<256xf32> to vector<256x1xf32>
    %53 = vector.broadcast %52 : vector<256x1xf32> to vector<256x64xf32>
    %54 = arith.subf %50, %53 : vector<256x64xf32>
    %55 = math.exp %54 : vector<256x64xf32>
    %56 = vector.extract_strided_slice %49 {offsets = [0, 64], sizes = [256, 64], strides = [1, 1]} : vector<256x256xf32> to vector<256x64xf32>
    %cst_30 = arith.constant dense<0xFF800000> : vector<256xf32>
    %57 = vector.multi_reduction <maximumf>, %56, %cst_30 [1] : vector<256x64xf32> to vector<256xf32>
    %58 = vector.shape_cast %57 : vector<256xf32> to vector<256x1xf32>
    %59 = vector.broadcast %58 : vector<256x1xf32> to vector<256x64xf32>
    %60 = arith.subf %56, %59 : vector<256x64xf32>
    %61 = math.exp %60 : vector<256x64xf32>
    %62 = vector.extract_strided_slice %49 {offsets = [0, 128], sizes = [256, 64], strides = [1, 1]} : vector<256x256xf32> to vector<256x64xf32>
    %cst_31 = arith.constant dense<0xFF800000> : vector<256xf32>
    %63 = vector.multi_reduction <maximumf>, %62, %cst_31 [1] : vector<256x64xf32> to vector<256xf32>
    %64 = vector.shape_cast %63 : vector<256xf32> to vector<256x1xf32>
    %65 = vector.broadcast %64 : vector<256x1xf32> to vector<256x64xf32>
    %66 = arith.subf %62, %65 : vector<256x64xf32>
    %67 = math.exp %66 : vector<256x64xf32>
    %68 = vector.extract_strided_slice %49 {offsets = [0, 192], sizes = [256, 64], strides = [1, 1]} : vector<256x256xf32> to vector<256x64xf32>
    %cst_32 = arith.constant dense<0xFF800000> : vector<256xf32>
    %69 = vector.multi_reduction <maximumf>, %68, %cst_32 [1] : vector<256x64xf32> to vector<256xf32>
    %70 = vector.shape_cast %69 : vector<256xf32> to vector<256x1xf32>
    %71 = vector.broadcast %70 : vector<256x1xf32> to vector<256x64xf32>
    %72 = arith.subf %68, %71 : vector<256x64xf32>
    %73 = math.exp %72 : vector<256x64xf32>
    %74 = tpu.concatenate %55, %61, %67, %73 in 1 : vector<256x64xf32>, vector<256x64xf32>, vector<256x64xf32>, vector<256x64xf32> -> vector<256x256xf32>
    %75 = tpu.concatenate %48, %43 in 1 : vector<256x32xf32>, vector<256x32xf32> -> vector<256x64xf32>
    %cst_33 = arith.constant dense<0.000000e+00> : vector<256x64xf32>
    %76 = tpu.matmul %74, %75, %cst_33 {dimension_numbers = #tpu.dot_dimension_numbers<[1], [0], [0], [1], [0, 0, 1, 1], [], []>} : vector<256x256xf32>, vector<256x64xf32>, vector<256x64xf32> -> vector<256x64xf32>
    %77 = vector.extract_strided_slice %76 {offsets = [0, 0], sizes = [256, 32], strides = [1, 1]} : vector<256x64xf32> to vector<256x32xf32>
    %78 = vector.extract_strided_slice %76 {offsets = [0, 32], sizes = [256, 32], strides = [1, 1]} : vector<256x64xf32> to vector<256x32xf32>
    %79 = arith.divf %77, %78 : vector<256x32xf32>
    %c0_34 = arith.constant 0 : index
    %c0_35 = arith.constant 0 : index
    %80 = vector.load %arg11[%c0_34, %c0_35] : memref<32x32xf32, #tpu.memory_space<vmem>>, vector<32x32xf32>
    %cst_36 = arith.constant dense<0.000000e+00> : vector<256x32xf32>
    %81 = tpu.matmul %79, %80, %cst_36 {dimension_numbers = #tpu.dot_dimension_numbers<[1], [0], [0], [1], [0, 0, 1, 1], [], []>} : vector<256x32xf32>, vector<32x32xf32>, vector<256x32xf32> -> vector<256x32xf32>
    %c0_37 = arith.constant 0 : index
    %c0_38 = arith.constant 0 : index
    %82 = vector.load %arg12[%c0_37, %c0_38] : memref<1x32xf32, #tpu.memory_space<vmem>>, vector<1x32xf32>
    %83 = vector.broadcast %82 : vector<1x32xf32> to vector<256x32xf32>
    %84 = arith.addf %81, %83 : vector<256x32xf32>
    %c0_39 = arith.constant 0 : index
    %c0_40 = arith.constant 0 : index
    %c0_41 = arith.constant 0 : index
    %85 = vector.load %arg13[%c0_39, %c0_40, %c0_41] : memref<1x256x32xf32, #tpu.memory_space<vmem>>, vector<1x256x32xf32>
    %86 = vector.shape_cast %85 : vector<1x256x32xf32> to vector<256x32xf32>
    %87 = vector.shape_cast %84 : vector<256x32xf32> to vector<1x256x32xf32>
    tpu.vector_store %arg13[%c0_39, %c0_40, %c0_41], %87 {strides = array<i32>} : memref<1x256x32xf32, #tpu.memory_space<vmem>>, vector<1x256x32xf32>,
    return
  }
  func.func @transform_0(%arg0: i32) -> (i32, i32, i32) {
    %c0_i32 = arith.constant 0 : i32
    %c0_i32_0 = arith.constant 0 : i32
    %c0_i32_1 = arith.constant 0 : i32
    return %arg0, %c0_i32, %c0_i32_0 : i32, i32, i32
  }
  func.func @transform_1(%arg0: i32) -> (i32, i32) {
    %c0_i32 = arith.constant 0 : i32
    %c0_i32_0 = arith.constant 0 : i32
    %c0_i32_1 = arith.constant 0 : i32
    return %c0_i32, %c0_i32_0 : i32, i32
  }
  func.func @transform_2(%arg0: i32) -> (i32, i32) {
    %c0_i32 = arith.constant 0 : i32
    %c0_i32_0 = arith.constant 0 : i32
    %c0_i32_1 = arith.constant 0 : i32
    return %c0_i32, %c0_i32_0 : i32, i32
  }
  func.func @transform_3(%arg0: i32) -> (i32, i32) {
    %c0_i32 = arith.constant 0 : i32
    %c0_i32_0 = arith.constant 0 : i32
    %c0_i32_1 = arith.constant 0 : i32
    return %c0_i32, %c0_i32_0 : i32, i32
  }
  func.func @transform_4(%arg0: i32) -> (i32, i32) {
    %c0_i32 = arith.constant 0 : i32
    %c0_i32_0 = arith.constant 0 : i32
    %c0_i32_1 = arith.constant 0 : i32
    return %c0_i32, %c0_i32_0 : i32, i32
  }
  func.func @transform_5(%arg0: i32) -> (i32, i32) {
    %c0_i32 = arith.constant 0 : i32
    %c0_i32_0 = arith.constant 0 : i32
    %c0_i32_1 = arith.constant 0 : i32
    return %c0_i32, %c0_i32_0 : i32, i32
  }
  func.func @transform_6(%arg0: i32) -> (i32, i32) {
    %c0_i32 = arith.constant 0 : i32
    %c0_i32_0 = arith.constant 0 : i32
    %c0_i32_1 = arith.constant 0 : i32
    return %c0_i32, %c0_i32_0 : i32, i32
  }
  func.func @transform_7(%arg0: i32) -> (i32, i32) {
    %c0_i32 = arith.constant 0 : i32
    %c0_i32_0 = arith.constant 0 : i32
    %c0_i32_1 = arith.constant 0 : i32
    return %c0_i32, %c0_i32_0 : i32, i32
  }
  func.func @transform_8(%arg0: i32) -> (i32, i32) {
    %c0_i32 = arith.constant 0 : i32
    %c0_i32_0 = arith.constant 0 : i32
    %c0_i32_1 = arith.constant 0 : i32
    return %c0_i32, %c0_i32_0 : i32, i32
  }
  func.func @transform_9(%arg0: i32) -> (i32, i32) {
    %c0_i32 = arith.constant 0 : i32
    %c0_i32_0 = arith.constant 0 : i32
    %c0_i32_1 = arith.constant 0 : i32
    return %c0_i32, %c0_i32_0 : i32, i32
  }
  func.func @transform_10(%arg0: i32) -> (i32, i32) {
    %c0_i32 = arith.constant 0 : i32
    %c0_i32_0 = arith.constant 0 : i32
    %c0_i32_1 = arith.constant 0 : i32
    return %c0_i32, %c0_i32_0 : i32, i32
  }
  func.func @transform_11(%arg0: i32) -> (i32, i32) {
    %c0_i32 = arith.constant 0 : i32
    %c0_i32_0 = arith.constant 0 : i32
    %c0_i32_1 = arith.constant 0 : i32
    return %c0_i32, %c0_i32_0 : i32, i32
  }
  func.func @transform_12(%arg0: i32) -> (i32, i32, i32) {
    %c0_i32 = arith.constant 0 : i32
    %c0_i32_0 = arith.constant 0 : i32
    %c0_i32_1 = arith.constant 0 : i32
    return %arg0, %c0_i32, %c0_i32_0 : i32, i32, i32
  }
}

</mosaic_0001>

<bundles_post_ra>
// kernel: tpu_custom_call.1
= control target key start
LH: loop header
LB: loop body
LE: loop exit
PB: predicated region body
PF: predicated region fallthrough
CT: control target
= control target key end

     0   :  { %s4843_s21 = smov 0   ;;  %s7455_s0 = inlined_call_operand.vmem [shape: f32[2,256,32], index: 0, kind: input, shape index: {}]   ;;  %s7456_s1 = inlined_call_operand.vmem [shape: f32[256,256], index: 1, kind: input, shape index: {}]   ;;  %s7457_s2 = inlined_call_operand.vmem [shape: f32[128,32], index: 2, kind: input, shape index: {}]   ;;  %s7458_s3 = inlined_call_operand.vmem [shape: f32[1,32], index: 3, kind: input, shape index: {}]   ;;  %s7459_s4 = inlined_call_operand.vmem [shape: f32[1,32], index: 4, kind: input, shape index: {}]   ;;  %s7460_s5 = inlined_call_operand.vmem [shape: f32[1,32], index: 5, kind: input, shape index: {}]   ;;  %s7461_s6 = inlined_call_operand.vmem [shape: f32[32,32], index: 6, kind: input, shape index: {}]   ;;  %s7462_s7 = inlined_call_operand.vmem [shape: f32[32,64], index: 7, kind: input, shape index: {}]   ;;  %s7463_s8 = inlined_call_operand.vmem [shape: f32[32,256], index: 8, kind: input, shape index: {}]   ;;  %s7464_s9 = inlined_call_operand.vmem [shape: f32[256,32], index: 9, kind: input, shape index: {}]   ;;  %s7465_s10 = inlined_call_operand.vmem [shape: f32[32,32], index: 10, kind: input, shape index: {}]   ;;  %s7466_s11 = inlined_call_operand.vmem [shape: f32[1,32], index: 11, kind: input, shape index: {}]   ;;  %s7467_s12 = inlined_call_operand.vmem [shape: f32[2,256,32], index: 12, kind: output, shape index: {}]  }
   0x1 LB: > { %s4122_s22 = sadd.s32 4294967295, %s4772_s21   ;;  %p4126_p0 = scmp.ge.s32.totalorder %s4772_s21, 1  ;;  %s4772_s21 = sphi %s4843_s21, %s22_s21  }
   0x2   : > { %p362_p1 = scmp.lt.s32.totalorder %s4772_s21, 3 }
   0x4   : > { %p363_p2 = pnand %p4126_p0, %p362_p1 }
   0x6   : > { %366 = sbr.rel (%p363_p2) target bundleno = 2538 (0x9ea), region = 68 }
   0xb   : > { %p404_p3 = scmp.lt.s32.totalorder %s4122_s22, 1  ;;  %v661_v31 = vld [vmem:[%s7456_s1 + $0x8] sm:$0xff]  ;;  %v660_v33 = vld [vmem:[%s7456_s1] sm:$0xff]  ;;  %v663_v34 = vld [vmem:[%s7456_s1 + $0x18] sm:$0xff]  ;;  %vm450_vm0 = vcmask 261120   ;;  %s4774_s20 = smov 32  }
   0xc   : > { %v662_v35 = vld [vmem:[%s7456_s1 + $0x10] sm:$0xff]  ;;  %v665_v36 = vld [vmem:[%s7456_s1 + $0x28] sm:$0xff]  ;;  %v664_v37 = vld [vmem:[%s7456_s1 + $0x20] sm:$0xff]  ;;  %s4775_s24 = smov 64   ;;  %s4776_s15 = smov 96   ;;  %vm1054_vm1 = vcmask 523264  }
   0xd   : > { %s7546_s22 = smov (!%p404_p3, %s4122_s22), 1  ;;  %v667_v38 = vld [vmem:[%s7456_s1 + $0x38] sm:$0xff]  ;;  %v666_v39 = vld [vmem:[%s7456_s1 + $0x30] sm:$0xff]  ;;  %v669_v40 = vld [vmem:[%s7456_s1 + $0x48] sm:$0xff]  ;;  %vm1063_vm2 = vcmask 785408  }
   0xe   : > { %s4269_s23 = sshll.u32 %s7546_s22, 8  ;;  %v668_v41 = vld [vmem:[%s7456_s1 + $0x40] sm:$0xff]  ;;  %v671_v42 = vld [vmem:[%s7456_s1 + $0x58] sm:$0xff]  ;;  %v670_v43 = vld [vmem:[%s7456_s1 + $0x50] sm:$0xff] }
   0xf   : > { %s4859_s26 = scalar_lea.vmem %s7455_s0, %s4269_s23  ;;  %v673_v44 = vld [vmem:[%s7456_s1 + $0x68] sm:$0xff]  ;;  %v672_v45 = vld [vmem:[%s7456_s1 + $0x60] sm:$0xff]  ;;  %v675_v46 = vld [vmem:[%s7456_s1 + $0x78] sm:$0xff] }
  0x10   : > { %v4862_v0 = vld [vmem:[%s4859_s26 + $0xf8] sm:$0xff]  ;;  %v4865_v1 = vld [vmem:[%s4859_s26 + $0xf0] sm:$0xff]  ;;  %v4875_v4 = vld [vmem:[%s4859_s26 + $0xe8] sm:$0xff] }
  0x11   : > { %837 = vmatpush.msra.mxu2 %v4862_v0  ;;  %v4869_v2 = vld [vmem:[%s4859_s26 + $0x78] sm:$0xff]  ;;  %v4872_v3 = vld [vmem:[%s4859_s26 + $0x70] sm:$0xff]  ;;  %v4880_v5 = vld [vmem:[%s4859_s26 + $0x68] sm:$0xff] }
  0x12   : > { %724 = vmatpush.msra.mxu1 %v4869_v2  ;;  %v4883_v6 = vld [vmem:[%s4859_s26 + $0xe0] sm:$0xff]  ;;  %v4891_v8 = vld [vmem:[%s4859_s26 + $0xd8] sm:$0xff]  ;;  %v4899_v10 = vld [vmem:[%s4859_s26 + $0xd0] sm:$0xff] }
  0x13   : > { %838 = vmatpush.msra.mxu2 %v4865_v1  ;;  %v4888_v7 = vld [vmem:[%s4859_s26 + $0x60] sm:$0xff]  ;;  %v4896_v9 = vld [vmem:[%s4859_s26 + $0x58] sm:$0xff]  ;;  %v4904_v11 = vld [vmem:[%s4859_s26 + $0x50] sm:$0xff] }
  0x14   : > { %725 = vmatpush.msra.mxu1 %v4872_v3  ;;  %v4907_v12 = vld [vmem:[%s4859_s26 + $0xc8] sm:$0xff]  ;;  %v4915_v14 = vld [vmem:[%s4859_s26 + $0xc0] sm:$0xff]  ;;  %v4923_v16 = vld [vmem:[%s4859_s26 + $0xb8] sm:$0xff] }
  0x15   : > { %839 = vmatpush.msra.mxu2 %v4875_v4  ;;  %v4912_v13 = vld [vmem:[%s4859_s26 + $0x48] sm:$0xff]  ;;  %v4920_v15 = vld [vmem:[%s4859_s26 + $0x40] sm:$0xff]  ;;  %v4928_v17 = vld [vmem:[%s4859_s26 + $0x38] sm:$0xff] }
  0x16   : > { %726 = vmatpush.msra.mxu1 %v4880_v5  ;;  %v4931_v18 = vld [vmem:[%s4859_s26 + $0xb0] sm:$0xff]  ;;  %v4939_v20 = vld [vmem:[%s4859_s26 + $0xa8] sm:$0xff]  ;;  %v4947_v22 = vld [vmem:[%s4859_s26 + $0xa0] sm:$0xff] }
  0x17   : > { %840 = vmatpush.msra.mxu2 %v4883_v6  ;;  %v4936_v19 = vld [vmem:[%s4859_s26 + $0x30] sm:$0xff]  ;;  %v4944_v21 = vld [vmem:[%s4859_s26 + $0x28] sm:$0xff]  ;;  %v4952_v23 = vld [vmem:[%s4859_s26 + $0x20] sm:$0xff] }
  0x18   : > { %727 = vmatpush.msra.mxu1 %v4888_v7  ;;  %v4955_v24 = vld [vmem:[%s4859_s26 + $0x98] sm:$0xff]  ;;  %v4963_v26 = vld [vmem:[%s4859_s26 + $0x90] sm:$0xff]  ;;  %v4971_v28 = vld [vmem:[%s4859_s26 + $0x88] sm:$0xff] }
  0x19   : > { %841 = vmatpush.msra.mxu2 %v4891_v8  ;;  %v4960_v25 = vld [vmem:[%s4859_s26 + $0x18] sm:$0xff]  ;;  %v4968_v27 = vld [vmem:[%s4859_s26 + $0x10] sm:$0xff]  ;;  %v4976_v29 = vld [vmem:[%s4859_s26 + $0x8] sm:$0xff] }
  0x1a   : > { %728 = vmatpush.msra.mxu1 %v4896_v9  ;;  %v4979_v30 = vld [vmem:[%s4859_s26 + $0x80] sm:$0xff]  ;;  %v674_v47 = vld [vmem:[%s7456_s1 + $0x70] sm:$0xff]  ;;  %v677_v48 = vld [vmem:[%s7456_s1 + $0x88] sm:$0xff] }
  0x1b   : > { %842 = vmatpush.msra.mxu2 %v4899_v10  ;;  %v4987_v32 = vld [vmem:[%s4859_s26] sm:$0xff]  ;;  %v679_v50 = vld [vmem:[%s7456_s1 + $0x98] sm:$0xff]  ;;  %v678_v51 = vld [vmem:[%s7456_s1 + $0x90] sm:$0xff] }
  0x1c   : > { %729 = vmatpush.msra.mxu1 %v4904_v11  ;;  %v676_v49 = vld [vmem:[%s7456_s1 + $0x80] sm:$0xff]  ;;  %v681_v52 = vld [vmem:[%s7456_s1 + $0xa8] sm:$0xff]  ;;  %v683_v54 = vld [vmem:[%s7456_s1 + $0xb8] sm:$0xff] }
  0x1d   : > { %843 = vmatpush.msra.mxu2 %v4907_v12  ;;  %v680_v53 = vld [vmem:[%s7456_s1 + $0xa0] sm:$0xff]  ;;  %v682_v55 = vld [vmem:[%s7456_s1 + $0xb0] sm:$0xff]  ;;  %v685_v56 = vld [vmem:[%s7456_s1 + $0xc8] sm:$0xff] }
  0x1e   : > { %730 = vmatpush.msra.mxu1 %v4912_v13  ;;  %v684_v57 = vld [vmem:[%s7456_s1 + $0xc0] sm:$0xff]  ;;  %v687_v58 = vld [vmem:[%s7456_s1 + $0xd8] sm:$0xff]  ;;  %v686_v59 = vld [vmem:[%s7456_s1 + $0xd0] sm:$0xff] }
  0x1f   : > { %844 = vmatpush.msra.mxu2 %v4915_v14  ;;  %v689_v60 = vld [vmem:[%s7456_s1 + $0xe8] sm:$0xff]  ;;  %v688_v61 = vld [vmem:[%s7456_s1 + $0xe0] sm:$0xff]  ;;  %v691_v62 = vld [vmem:[%s7456_s1 + $0xf8] sm:$0xff] }
  0x20   : > { %731 = vmatpush.msra.mxu1 %v4920_v15  ;;  %v690_v63 = vld [vmem:[%s7456_s1 + $0xf0] sm:$0xff] }
  0x21   : > { %845 = vmatpush.msra.mxu2 %v4923_v16 }
  0x22   : > { %732 = vmatpush.msra.mxu1 %v4928_v17 }
  0x23   : > { %846 = vmatpush.msra.mxu2 %v4931_v18 }
  0x24   : > { %733 = vmatpush.msra.mxu1 %v4936_v19 }
  0x25   : > { %847 = vmatpush.msra.mxu2 %v4939_v20 }
  0x26   : > { %734 = vmatpush.msra.mxu1 %v4944_v21 }
  0x27   : > { %848 = vmatpush.msra.mxu2 %v4947_v22 }
  0x28   : > { %735 = vmatpush.msra.mxu1 %v4952_v23 }
  0x29   : > { %849 = vmatpush.msra.mxu2 %v4955_v24 }
  0x2a   : > { %736 = vmatpush.msra.mxu1 %v4960_v25 }
  0x2b   : > { %850 = vmatpush.msra.mxu2 %v4963_v26 }
  0x2c   : > { %737 = vmatpush.msra.mxu1 %v4968_v27 }
  0x2d   : > { %851 = vmatpush.msra.mxu2 %v4971_v28 }
  0x2e   : > { %738 = vmatpush.msra.mxu1 %v4976_v29 }
  0x2f   : > { %852 = vmatpush.msra.mxu2 %v4979_v30 }
  0x30   : > { %853 = vmatmul.f32.vlgmr.msra.gmra.mxu2 %v661_v31  ;;  %739 = vmatpush.msra.mxu1 %v4987_v32  ;;  %v693_v31 = vld [vmem:[%s7456_s1 + $0x108] sm:$0xff] }
  0x31   : > { %740 = vmatmul.f32.vlgmr.msra.gmra.mxu1 %v660_v33 }
  0x38   : > { %856 = vmatmul.f32.gmra.mxu2 %v663_v34  ;;  %v692_v34 = vld [vmem:[%s7456_s1 + $0x100] sm:$0xff] }
  0x39   : > { %743 = vmatmul.f32.gmra.mxu1 %v662_v35 }
  0x40   : > { %859 = vmatmul.f32.gmra.mxu2 %v665_v36 }
  0x41   : > { %746 = vmatmul.f32.gmra.mxu1 %v664_v37  ;;  %v695_v37 = vld [vmem:[%s7456_s1 + $0x118] sm:$0xff] }
  0x48   : > { %862 = vmatmul.f32.gmra.mxu2 %v667_v38 }
  0x49   : > { %749 = vmatmul.f32.gmra.mxu1 %v666_v39  ;;  %v694_v39 = vld [vmem:[%s7456_s1 + $0x110] sm:$0xff] }
  0x50   : > { %865 = vmatmul.f32.gmra.mxu2 %v669_v40 }
  0x51   : > { %752 = vmatmul.f32.gmra.mxu1 %v668_v41 }
  0x58   : > { %868 = vmatmul.f32.gmra.mxu2 %v671_v42  ;;  %v697_v42 = vld [vmem:[%s7456_s1 + $0x128] sm:$0xff] }
  0x59   : > { %755 = vmatmul.f32.gmra.mxu1 %v670_v43 }
  0x60   : > { %871 = vmatmul.f32.gmra.mxu2 %v673_v44  ;;  %v696_v44 = vld [vmem:[%s7456_s1 + $0x120] sm:$0xff] }
  0x61   : > { %758 = vmatmul.f32.gmra.mxu1 %v672_v45 }
  0x68   : > { %874 = vmatmul.f32.gmra.mxu2 %v675_v46 }
  0x69   : > { %761 = vmatmul.f32.gmra.mxu1 %v674_v47  ;;  %v699_v47 = vld [vmem:[%s7456_s1 + $0x138] sm:$0xff] }
  0x70   : > { %877 = vmatmul.f32.gmra.mxu2 %v677_v48 }
  0x71   : > { %764 = vmatmul.f32.gmra.mxu1 %v676_v49  ;;  %v698_v49 = vld [vmem:[%s7456_s1 + $0x130] sm:$0xff] }
  0x78   : > { %880 = vmatmul.f32.gmra.mxu2 %v679_v50 }
  0x79   : > { %767 = vmatmul.f32.gmra.mxu1 %v678_v51 }
  0x80   : > { %883 = vmatmul.f32.gmra.mxu2 %v681_v52  ;;  %v449_v52 = vld [vmem:[%s7461_s6 + $0x18] sm:$0xff] }
  0x81   : > { %770 = vmatmul.f32.gmra.mxu1 %v680_v53  ;;  %v701_v53 = vld [vmem:[%s7456_s1 + $0x148] sm:$0xff]  ;;  %559 = vmatpush.msra.mxu0 %v449_v52 }
  0x88   : > { %886 = vmatmul.f32.gmra.mxu2 %v683_v54 }
  0x89   : > { %773 = vmatmul.f32.gmra.mxu1 %v682_v55  ;;  %v700_v55 = vld [vmem:[%s7456_s1 + $0x140] sm:$0xff] }
  0x90   : > { %889 = vmatmul.f32.gmra.mxu2 %v685_v56  ;;  %v448_v56 = vld [vmem:[%s7461_s6 + $0x10] sm:$0xff] }
  0x91   : > { %776 = vmatmul.f32.gmra.mxu1 %v684_v57  ;;  %v447_v57 = vld [vmem:[%s7461_s6 + $0x8] sm:$0xff]  ;;  %560 = vmatpush.msra.mxu0 %v448_v56 }
  0x93   : > { %561 = vmatpush.msra.mxu0 %v447_v57  ;;  %v712_v57 = vld [vmem:[%s7456_s1 + $0x1a0] sm:$0xff] }
  0x98   : > { %892 = vmatmul.f32.gmra.mxu2 %v687_v58 }
  0x99   : > { %779 = vmatmul.f32.gmra.mxu1 %v686_v59 }
  0xa0   : > { %895 = vmatmul.f32.gmra.mxu2 %v689_v60  ;;  %v446_v60 = vld [vmem:[%s7461_s6] sm:$0xff] }
  0xa1   : > { %782 = vmatmul.f32.gmra.mxu1 %v688_v61  ;;  %v703_v61 = vld [vmem:[%s7456_s1 + $0x158] sm:$0xff]  ;;  %562 = vmatpush.msra.mxu0 %v446_v60 }
  0xa2   : > { %4131 = vmatmul.msk.f32.vlgmr.msra.gmra.mxu0 %vm450_vm0, %v4987_v32 }
  0xa8   : > { %898 = vmatmul.f32.gmra.mxu2 %v691_v62 }
  0xa9   : > { %785 = vmatmul.f32.gmra.mxu1 %v690_v63  ;;  %v702_v63 = vld [vmem:[%s7456_s1 + $0x150] sm:$0xff] }
  0xaa   : > { %4132 = vmatmul.msk.f32.gmra.mxu0 %vm450_vm0, %v4976_v29 }
  0xae   : > { %v741_v33 = vpop.f32.mrf.mxu1 }
  0xb0   : > { %901 = vmatmul.f32.gmra.mxu2 %v693_v31 }
  0xb1   : > { %788 = vmatmul.f32.gmra.mxu1 %v692_v34  ;;  %v705_v34 = vld [vmem:[%s7456_s1 + $0x168] sm:$0xff] }
  0xb2   : > { %4133 = vmatmul.msk.f32.gmra.mxu0 %vm450_vm0, %v4968_v27 }
  0xb3   : > { %v854_v35 = vpop.f32.mrf.mxu2 }
  0xb4   : > { %v5091_v36 = vadd.f32 %v854_v35, %v741_v33 }
  0xb6   : > { %v744_v38 = vpop.f32.mrf.mxu1 }
  0xb8   : > { %904 = vmatmul.f32.gmra.mxu2 %v695_v37  ;;  %v704_v37 = vld [vmem:[%s7456_s1 + $0x160] sm:$0xff] }
  0xb9   : > { %791 = vmatmul.f32.gmra.mxu1 %v694_v39  ;;  %v707_v39 = vld [vmem:[%s7456_s1 + $0x178] sm:$0xff] }
  0xba   : > { %4134 = vmatmul.msk.f32.gmra.mxu0 %vm450_vm0, %v4960_v25 }
  0xbb   : > { %v857_v40 = vpop.f32.mrf.mxu2 }
  0xbc   : > { %v5099_v41 = vadd.f32 %v857_v40, %v744_v38 }
  0xbe   : > { %v747_v43 = vpop.f32.mrf.mxu1 }
  0xc0   : > { %907 = vmatmul.f32.gmra.mxu2 %v697_v42  ;;  %v706_v42 = vld [vmem:[%s7456_s1 + $0x170] sm:$0xff] }
  0xc1   : > { %794 = vmatmul.f32.gmra.mxu1 %v696_v44  ;;  %v709_v44 = vld [vmem:[%s7456_s1 + $0x188] sm:$0xff] }
  0xc2   : > { %4135 = vmatmul.msk.f32.gmra.mxu0 %vm450_vm0, %v4952_v23 }
  0xc3   : > { %v860_v45 = vpop.f32.mrf.mxu2 }
  0xc4   : > { %v5107_v46 = vadd.f32 %v860_v45, %v747_v43 }
  0xc6   : > { %v750_v48 = vpop.f32.mrf.mxu1 }
  0xc8   : > { %910 = vmatmul.f32.gmra.mxu2 %v699_v47  ;;  %v708_v47 = vld [vmem:[%s7456_s1 + $0x180] sm:$0xff] }
  0xc9   : > { %797 = vmatmul.f32.gmra.mxu1 %v698_v49 }
  0xca   : > { %4136 = vmatmul.msk.f32.gmra.mxu0 %vm450_vm0, %v4944_v21 }
  0xcb   : > { %v863_v50 = vpop.f32.mrf.mxu2 }
  0xcc   : > { %v5115_v51 = vadd.f32 %v863_v50, %v750_v48  ;;  %v711_v48 = vld [vmem:[%s7456_s1 + $0x198] sm:$0xff]  ;;  %v710_v50 = vld [vmem:[%s7456_s1 + $0x190] sm:$0xff] }
  0xce   : > { %v753_v54 = vpop.f32.mrf.mxu1 }
  0xd0   : > { %913 = vmatmul.f32.gmra.mxu2 %v701_v53 }
  0xd1   : > { %800 = vmatmul.f32.gmra.mxu1 %v700_v55 }
  0xd2   : > { %4137 = vmatmul.msk.f32.gmra.mxu0 %vm450_vm0, %v4936_v19  ;;  %v1087_v19 = vld [vmem:[%s7457_s2 + $0x78] sm:$0xff] }
  0xd3   : > { %v866_v58 = vpop.f32.mrf.mxu2  ;;  %1092 = vmatpush.msrb.mxu0 %v1087_v19 }
  0xd4   : > { %v5132_v59 = vadd.f32 %v866_v58, %v753_v54  ;;  %v713_v54 = vld [vmem:[%s7456_s1 + $0x1a8] sm:$0xff]  ;;  %v715_v58 = vld [vmem:[%s7456_s1 + $0x1b8] sm:$0xff] }
  0xd6   : > { %v756_v62 = vpop.f32.mrf.mxu1 }
  0xd8   : > { %916 = vmatmul.f32.gmra.mxu2 %v703_v61  ;;  %v714_v61 = vld [vmem:[%s7456_s1 + $0x1b0] sm:$0xff] }
  0xd9   : > { %803 = vmatmul.f32.gmra.mxu1 %v702_v63 }
  0xda   : > { %4138 = vmatmul.msk.f32.gmra.mxu0 %vm450_vm0, %v4928_v17 }
  0xdb   : > { %v869_v31 = vpop.f32.mrf.mxu2 }
  0xdc   : > { %v5145_v33 = vadd.f32 %v869_v31, %v756_v62  ;;  %v717_v62 = vld [vmem:[%s7456_s1 + $0x1c8] sm:$0xff]  ;;  %v716_v31 = vld [vmem:[%s7456_s1 + $0x1c0] sm:$0xff] }
  0xde   : > { %v759_v35 = vpop.f32.mrf.mxu1 }
  0xe0   : > { %919 = vmatmul.f32.gmra.mxu2 %v705_v34 }
  0xe1   : > { %806 = vmatmul.f32.gmra.mxu1 %v704_v37 }
  0xe2   : > { %4139 = vmatmul.msk.f32.gmra.mxu0 %vm450_vm0, %v4920_v15 }
  0xe3   : > { %v872_v32 = vpop.f32.mrf.mxu2 }
  0xe4   : > { %v5155_v38 = vadd.f32 %v872_v32, %v759_v35  ;;  %v719_v35 = vld [vmem:[%s7456_s1 + $0x1d8] sm:$0xff]  ;;  %v718_v32 = vld [vmem:[%s7456_s1 + $0x1d0] sm:$0xff] }
  0xe6   : > { %v762_v40 = vpop.f32.mrf.mxu1 }
  0xe8   : > { %922 = vmatmul.f32.gmra.mxu2 %v707_v39  ;;  %v721_v39 = vld [vmem:[%s7456_s1 + $0x1e8] sm:$0xff] }
  0xe9   : > { %809 = vmatmul.f32.gmra.mxu1 %v706_v42  ;;  %v720_v42 = vld [vmem:[%s7456_s1 + $0x1e0] sm:$0xff] }
  0xea   : > { %4140 = vmatmul.msk.f32.gmra.mxu0 %vm450_vm0, %v4912_v13 }
  0xeb   : > { %v875_v29 = vpop.f32.mrf.mxu2 }
  0xec   : > { %v5165_v43 = vadd.f32 %v875_v29, %v762_v40  ;;  %v1086_v29 = vld [vmem:[%s7457_s2 + $0x70] sm:$0xff] }
  0xed   : > { %1093 = vmatpush.msrb.mxu0 %v1086_v29 }
  0xee   : > { %v765_v45 = vpop.f32.mrf.mxu1 }
  0xf0   : > { %925 = vmatmul.f32.gmra.mxu2 %v709_v44  ;;  %v723_v44 = vld [vmem:[%s7456_s1 + $0x1f8] sm:$0xff] }
  0xf1   : > { %812 = vmatmul.f32.gmra.mxu1 %v708_v47  ;;  %v722_v47 = vld [vmem:[%s7456_s1 + $0x1f0] sm:$0xff] }
  0xf2   : > { %4141 = vmatmul.msk.f32.gmra.mxu0 %vm450_vm0, %v4904_v11 }
  0xf3   : > { %v878_v27 = vpop.f32.mrf.mxu2 }
  0xf4   : > { %v879_v53 = vadd.f32 %v878_v27, %v765_v45  ;;  %v1085_v27 = vld [vmem:[%s7457_s2 + $0x68] sm:$0xff] }
  0xf5   : > { %1094 = vmatpush.msrb.mxu0 %v1085_v27  ;;  %v1081_v27 = vld [vmem:[%s7457_s2 + $0x48] sm:$0xff] }
  0xf6   : > { %v768_v49 = vpop.f32.mrf.mxu1 }
  0xf8   : > { %928 = vmatmul.f32.gmra.mxu2 %v711_v48 }
  0xf9   : > { %815 = vmatmul.f32.gmra.mxu1 %v710_v50 }
  0xfa   : > { %4142 = vmatmul.msk.f32.gmra.mxu0 %vm450_vm0, %v4896_v9 }
  0xfb   : > { %v881_v52 = vpop.f32.mrf.mxu2 }
  0xfc   : > { %v882_v25 = vadd.f32 %v881_v52, %v768_v49 }
  0xfe   : > { %v4284_v55 = vpack.i.bf16 %v882_v25, %v879_v53  ;;  %v5186_v56 = vpop.f32.mrf.mxu1 }
 0x100   : > { %4285 = vrot.lane.b32.xlu0 %v4284_v55, %s4774_s20  ;;  %931 = vmatmul.f32.gmra.mxu2 %v713_v54  ;;  %v1084_v55 = vld [vmem:[%s7457_s2 + $0x60] sm:$0xff] }
 0x101   : > { %818 = vmatmul.f32.gmra.mxu1 %v712_v57  ;;  %1095 = vmatpush.msrb.mxu0 %v1084_v55 }
 0x102   : > { %4143 = vmatmul.msk.f32.gmra.mxu0 %vm450_vm0, %v4888_v7 }
 0x103   : > { %v5194_v23 = vpop.f32.mrf.mxu2 }
 0x106   : > { %v5199_v60 = vpop.f32.mrf.mxu1 }
 0x108   : > { %934 = vmatmul.f32.gmra.mxu2 %v715_v58 }
 0x109   : > { %821 = vmatmul.f32.gmra.mxu1 %v714_v61 }
 0x10a   : > { %4144 = vmatmul.msk.f32.gmra.mxu0 %vm450_vm0, %v4880_v5 }
 0x10b   : > { %v5206_v21 = vpop.f32.mrf.mxu2 }
 0x10e   : > { %v777_v63 = vpop.f32.mrf.mxu1 }
 0x110   : > { %937 = vmatmul.f32.gmra.mxu2 %v717_v62 }
 0x111   : > { %824 = vmatmul.f32.gmra.mxu1 %v716_v31 }
 0x112   : > { %4145 = vmatmul.msk.f32.gmra.mxu0 %vm450_vm0, %v4872_v3 }
 0x113   : > { %v890_v34 = vpop.f32.mrf.mxu2 }
 0x114   : > { %v891_v58 = vadd.f32 %v890_v34, %v777_v63  ;;  %v1083_v63 = vld [vmem:[%s7457_s2 + $0x58] sm:$0xff] }
 0x115   : > { %1096 = vmatpush.msrb.mxu0 %v1083_v63 }
 0x116   : > { %v780_v37 = vpop.f32.mrf.mxu1 }
 0x118   : > { %940 = vmatmul.f32.gmra.mxu2 %v719_v35 }
 0x119   : > { %827 = vmatmul.f32.gmra.mxu1 %v718_v32 }
 0x11a   : > { %4146 = vmatmul.msk.f32.gmra.mxu0 %vm450_vm0, %v4869_v2  ;;  %v1082_v2 = vld [vmem:[%s7457_s2 + $0x50] sm:$0xff] }
 0x11b   : > { %v893_v17 = vpop.f32.mrf.mxu2  ;;  %1097 = vmatpush.msrb.mxu0 %v1082_v2 }
 0x11c   : > { %v894_v9 = vadd.f32 %v893_v17, %v780_v37 }
 0x11d   : > { %1098 = vmatpush.msrb.mxu0 %v1081_v27 }
 0x11e   : > { %v783_v40 = vpop.f32.mrf.mxu1  ;;  %v4314_v7 = vpack.i.bf16 %v894_v9, %v891_v58  ;;  %v885_v9 = vadd.f32 %v5194_v23, %v5186_v56  ;;  %v1079_v56 = vld [vmem:[%s7457_s2 + $0x38] sm:$0xff] }
 0x11f   : > { %v5269_v34 = vpop.f32.mrf.mxu0 }
 0x120   : > { %943 = vmatmul.f32.gmra.mxu2 %v721_v39 }
 0x121   : > { %830 = vmatmul.f32.gmra.mxu1 %v720_v42 }
 0x122   : > { %4147 = vmatmul.msk.f32.gmra.mxu0 %vm450_vm0, %v4979_v30 }
 0x123   : > { %v896_v15 = vpop.f32.mrf.mxu2 }
 0x124   : > { %v897_v31 = vadd.f32 %v896_v15, %v783_v40 }
 0x126   : > { %v786_v45 = vpop.f32.mrf.mxu1 }
 0x127   : > { %v5273_v40 = vpop.f32.mrf.mxu0 }
 0x128   : > { %946 = vmatmul.f32.gmra.mxu2 %v723_v44 }
 0x129   : > { %833 = vmatmul.f32.gmra.mxu1 %v722_v47 }
 0x12a   : > { %4148 = vmatmul.msk.f32.gmra.mxu0 %vm450_vm0, %v4971_v28 }
 0x12b   : > { %v899_v13 = vpop.f32.mrf.mxu2 }
 0x12c   : > { %v900_v62 = vadd.f32 %v899_v13, %v786_v45 }
 0x12e   : > { %v789_v48 = vpop.f32.mrf.mxu1  ;;  %v4329_v32 = vpack.i.bf16 %v900_v62, %v897_v31 }
 0x12f   : > { %v5280_v44 = vpop.f32.mrf.mxu0 }
 0x132   : > { %4149 = vmatmul.msk.f32.gmra.mxu0 %vm450_vm0, %v4963_v26 }
 0x133   : > { %v902_v49 = vpop.f32.mrf.mxu2 }
 0x134   : > { %v903_v53 = vadd.f32 %v902_v49, %v789_v48 }
 0x136   : > { %v792_v50 = vpop.f32.mrf.mxu1 }
 0x137   : > { %v5284_v47 = vpop.f32.mrf.mxu0 }
 0x13a   : > { %4150 = vmatmul.msk.f32.gmra.mxu0 %vm450_vm0, %v4955_v24  ;;  %v1080_v24 = vld [vmem:[%s7457_s2 + $0x40] sm:$0xff] }
 0x13b   : > { %v905_v52 = vpop.f32.mrf.mxu2  ;;  %1099 = vmatpush.msrb.mxu0 %v1080_v24  ;;  %v1073_v24 = vld [vmem:[%s7457_s2 + $0x8] sm:$0xff] }
 0x13c   : > { %v906_v11 = vadd.f32 %v905_v52, %v792_v50 }
 0x13d   : > { %1100 = vmatpush.msrb.mxu0 %v1079_v56 }
 0x13e   : > { %v4289_v25 = vpack.i.bf16 %v906_v11, %v903_v53  ;;  %v795_v54 = vpop.f32.mrf.mxu1 }
 0x13f   : > { %v5291_v48 = vpop.f32.mrf.mxu0 }
 0x140   : > { %4290 = vrot.lane.b32.xlu0 %v4289_v25, %s4775_s24 }
 0x142   : > { %4151 = vmatmul.msk.f32.gmra.mxu0 %vm450_vm0, %v4947_v22  ;;  %v888_v22 = vadd.f32 %v5206_v21, %v5199_v60 }
 0x143   : > { %v908_v57 = vpop.f32.mrf.mxu2 }
 0x144   : > { %v909_v19 = vadd.f32 %v908_v57, %v795_v54  ;;  %v4299_v57 = vpack.i.bf16 %v888_v22, %v885_v9 }
 0x146   : > { %v798_v61 = vpop.f32.mrf.mxu1 }
 0x147   : > { %v5295_v50 = vpop.f32.mrf.mxu0 }
 0x148   : > { %4315 = vrot.lane.b32.xlu0 %v4314_v7, %s4774_s20 }
 0x14a   : > { %4152 = vmatmul.msk.f32.gmra.mxu0 %vm450_vm0, %v4939_v20 }
 0x14b   : > { %v911_v5 = vpop.f32.mrf.mxu2 }
 0x14c   : > { %v912_v35 = vadd.f32 %v911_v5, %v798_v61 }
 0x14e   : > { %v4304_v39 = vpack.i.bf16 %v912_v35, %v909_v19  ;;  %v801_v42 = vpop.f32.mrf.mxu1 }
 0x14f   : > { %v5305_v55 = vpop.f32.mrf.mxu0 }
 0x150   : > { %4330 = vrot.lane.b32.xlu0 %v4329_v32, %s4774_s20  ;;  %4305 = vrot.lane.b32.xlu2 %v4304_v39, %s4775_s24 }
 0x152   : > { %4153 = vmatmul.msk.f32.gmra.mxu0 %vm450_vm0, %v4931_v18 }
 0x153   : > { %v914_v3 = vpop.f32.mrf.mxu2 }
 0x154   : > { %v915_v5 = vadd.f32 %v914_v3, %v801_v42 }
 0x156   : > { %v804_v37 = vpop.f32.mrf.mxu1 }
 0x157   : > { %v5312_v62 = vpop.f32.mrf.mxu0 }
 0x15a   : > { %4154 = vmatmul.msk.f32.gmra.mxu0 %vm450_vm0, %v4923_v16 }
 0x15b   : > { %v917_v17 = vpop.f32.mrf.mxu2 }
 0x15c   : > { %v918_v20 = vadd.f32 %v917_v17, %v804_v37  ;;  %v1078_v37 = vld [vmem:[%s7457_s2 + $0x30] sm:$0xff] }
 0x15d   : > { %1101 = vmatpush.msrb.mxu0 %v1078_v37 }
 0x15e   : > { %v807_v29 = vpop.f32.mrf.mxu1  ;;  %v4319_v21 = vpack.i.bf16 %v918_v20, %v915_v5 }
 0x15f   : > { %v5321_v35 = vpop.f32.mrf.mxu0 }
 0x162   : > { %4155 = vmatmul.msk.f32.gmra.mxu0 %vm450_vm0, %v4915_v14 }
 0x163   : > { %v920_v15 = vpop.f32.mrf.mxu2 }
 0x164   : > { %v921_v32 = vadd.f32 %v920_v15, %v807_v29 }
 0x166   : > { %v810_v45 = vpop.f32.mrf.mxu1 }
 0x167   : > { %v5326_v3 = vpop.f32.mrf.mxu0 }
 0x168   : > { %7491 = vst [vmem:[#allocation2_spill] sm:$0xff] %v5326_v3 }
 0x16a   : > { %4156 = vmatmul.msk.f32.gmra.mxu0 %vm450_vm0, %v4907_v12 }
 0x16b   : > { %v923_v30 = vpop.f32.mrf.mxu2 }
 0x16c   : > { %v924_v18 = vadd.f32 %v923_v30, %v810_v45  ;;  %v1077_v45 = vld [vmem:[%s7457_s2 + $0x28] sm:$0xff]  ;;  %v1076_v30 = vld [vmem:[%s7457_s2 + $0x20] sm:$0xff] }
 0x16d   : > { %1102 = vmatpush.msrb.mxu0 %v1077_v45 }
 0x16e   : > { %v813_v13 = vpop.f32.mrf.mxu1  ;;  %v4334_v39 = vpack.i.bf16 %v924_v18, %v921_v32 }
 0x16f   : > { %v5334_v15 = vpop.f32.mrf.mxu0  ;;  %1103 = vmatpush.msrb.mxu0 %v1076_v30 }
 0x170   : > { %7492 = vst [vmem:[#allocation3_spill] sm:$0xff] %v5334_v15 }
 0x172   : > { %4157 = vmatmul.msk.f32.gmra.mxu0 %vm450_vm0, %v4899_v10 }
 0x173   : > { %v926_v28 = vpop.f32.mrf.mxu2 }
 0x174   : > { %v927_v52 = vadd.f32 %v926_v28, %v813_v13 }
 0x176   : > { %v816_v49 = vpop.f32.mrf.mxu1 }
 0x177   : > { %v5344_v28 = vpop.f32.mrf.mxu0 }
 0x178   : > { %7493 = vst [vmem:[#allocation4_spill] sm:$0xff] %v5344_v28 }
 0x17a   : > { %4158 = vmatmul.msk.f32.gmra.mxu0 %vm450_vm0, %v4891_v8 }
 0x17b   : > { %v929_v26 = vpop.f32.mrf.mxu2 }
 0x17c   : > { %v930_v53 = vadd.f32 %v929_v26, %v816_v49 }
 0x17e   : > { %v4294_v11 = vpack.i.bf16 %v930_v53, %v927_v52  ;;  %v819_v25 = vpop.f32.mrf.mxu1  ;;  %v1075_v52 = vld [vmem:[%s7457_s2 + $0x18] sm:$0xff]  ;;  %v1074_v53 = vld [vmem:[%s7457_s2 + $0x10] sm:$0xff] }
 0x17f   : > { %1104 = vmatpush.msrb.mxu0 %v1075_v52  ;;  %v5355_v10 = vpop.f32.mrf.mxu0 }
 0x180   : > { %4295 = vrot.lane.b32.xlu1 %v4294_v11, %s4776_s15  ;;  %7494 = vst [vmem:[#allocation5_spill] sm:$0xff] %v5355_v10 }
 0x181   : > { %1105 = vmatpush.msrb.mxu0 %v1074_v53 }
 0x182   : > { %4159 = vmatmul.msk.f32.gmra.mxu0 %vm450_vm0, %v4883_v6 }
 0x183   : > { %v932_v54 = vpop.f32.mrf.mxu2  ;;  %1106 = vmatpush.msrb.mxu0 %v1073_v24 }
 0x184   : > { %v933_v7 = vadd.f32 %v932_v54, %v819_v25 }
 0x186   : > { %v822_v58 = vpop.f32.mrf.mxu1 }
 0x187   : > { %v5359_v11 = vpop.f32.mrf.mxu0 }
 0x188   : > { %4300 = vrot.lane.b32.xlu1 %v4299_v57, %s4774_s20  ;;  %7495 = vst [vmem:[#allocation6_spill] sm:$0xff] %v5359_v11 }
 0x18a   : > { %4160 = vmatmul.msk.f32.gmra.mxu0 %vm450_vm0, %v4875_v4  ;;  %v1072_v4 = vld [vmem:[%s7457_s2] sm:$0xff] }
 0x18b   : > { %v935_v61 = vpop.f32.mrf.mxu2  ;;  %1107 = vmatpush.msrb.mxu0 %v1072_v4 }
 0x18c   : > { %v936_v60 = vadd.f32 %v935_v61, %v822_v58 }
 0x18e   : > { %v4309_v31 = vpack.i.bf16 %v936_v60, %v933_v7  ;;  %v825_v19 = vpop.f32.mrf.mxu1 }
 0x18f   : > { %v5363_v8 = vpop.f32.mrf.mxu0 }
 0x190   : > { %4320 = vrot.lane.b32.xlu1 %v4319_v21, %s4775_s24  ;;  %4310 = vrot.lane.b32.xlu2 %v4309_v31, %s4776_s15  ;;  %7496 = vst [vmem:[#allocation7_spill] sm:$0xff] %v5363_v8 }
 0x192   : > { %4161 = vmatmul.msk.f32.gmra.mxu0 %vm450_vm0, %v4865_v1  ;;  %v4286_v1 = vpop.permute.xlu0 %4285 }
 0x193   : > { %v938_v23 = vpop.f32.mrf.mxu2  ;;  %v4287_v57 = vunpack.i.l.bf16 %v4286_v1  ;;  %v4288_v21 = vunpack.i.h.bf16 %v4286_v1 }
 0x194   : > { %v939_v16 = vadd.f32 %v938_v23, %v825_v19 }
 0x195   : > { %v1046_v61 = vsel %vm450_vm0, %v5091_v36, %v4287_v57  ;;  %v1047_v32 = vsel %vm450_vm0, %v5099_v41, %v4288_v21 }
 0x196   : > { %v828_v42 = vpop.f32.mrf.mxu1 }
 0x197   : > { %v5367_v25 = vpop.f32.mrf.mxu0 }
 0x198   : > { %4335 = vrot.lane.b32.xlu1 %v4334_v39, %s4775_s24  ;;  %7497 = vst [vmem:[#allocation8_spill] sm:$0xff] %v5367_v25 }
 0x19a   : > { %4162 = vmatmul.msk.f32.gmra.mxu0 %vm450_vm0, %v4862_v0 }
 0x19b   : > { %v941_v63 = vpop.f32.mrf.mxu2 }
 0x19c   : > { %v942_v17 = vadd.f32 %v941_v63, %v828_v42 }
 0x19e   : > { %v4324_v2 = vpack.i.bf16 %v942_v17, %v939_v16  ;;  %v831_v29 = vpop.f32.mrf.mxu1 }
 0x19f   : > { %v5374_v6 = vpop.f32.mrf.mxu0 }
 0x1a0   : > { %4325 = vrot.lane.b32.xlu2 %v4324_v2, %s4776_s15  ;;  %7498 = vst [vmem:[#allocation9_spill] sm:$0xff] %v5374_v6 }
 0x1a3   : > { %v944_v14 = vpop.f32.mrf.mxu2 }
 0x1a4   : > { %v945_v13 = vadd.f32 %v944_v14, %v831_v29 }
 0x1a6   : > { %v834_v12 = vpop.f32.mrf.mxu1 }
 0x1a7   : > { %v5379_v22 = vpop.f32.mrf.mxu0 }
 0x1a8   : > { %7499 = vst [vmem:[#allocation10_spill] sm:$0xff] %v5379_v22 }
 0x1aa   : > { %v4306_v31 = vpop.permute.xlu2 %4305 }
 0x1ab   : > { %v947_v27 = vpop.f32.mrf.mxu2  ;;  %v4307_v63 = vunpack.i.l.bf16 %v4306_v31  ;;  %v4308_v30 = vunpack.i.h.bf16 %v4306_v31  ;;  %v1448_v31 = vld [vmem:[%s7464_s9 + $0xf8] sm:$0xff] }
 0x1ac   : > { %v948_v49 = vadd.f32 %v947_v27, %v834_v12 }
 0x1ae   : > { %v4339_v26 = vpack.i.bf16 %v948_v49, %v945_v13 }
 0x1af   : > { %v5381_v54 = vpop.f32.mrf.mxu0 }
 0x1b0   : > { %4340 = vrot.lane.b32.xlu2 %v4339_v26, %s4776_s15  ;;  %7500 = vst [vmem:[#allocation11_spill] sm:$0xff] %v5381_v54 }
 0x1b2   : > { %v4291_v9 = vpop.permute.xlu0 %4290 }
 0x1b3   : > { %v4292_v0 = vunpack.i.l.bf16 %v4291_v9  ;;  %v4293_v19 = vunpack.i.h.bf16 %v4291_v9  ;;  %v1417_v9 = vld [vmem:[%s7464_s9] sm:$0xff] }
 0x1b4   : > { %1541 = vrot.lane.b32.xlu1 %v1417_v9, %s4774_s20 }
 0x1b5   : > { %v1055_v5 = vsel %vm1054_vm1, %v1046_v61, %v4292_v0  ;;  %v1056_v42 = vsel %vm1054_vm1, %v1047_v32, %v4293_v19 }
 0x1b7   : > { %v5383_v58 = vpop.f32.mrf.mxu0 }
 0x1b8   : > { %7501 = vst [vmem:[#allocation12_spill] sm:$0xff] %v5383_v58  ;;  %1603 = vrot.lane.b32.xlu2 %v1448_v31, %s4774_s20 }
 0x1ba   : > { %v4316_v12 = vpop.permute.xlu0 %4315 }
 0x1bb   : > { %v4317_v49 = vunpack.i.l.bf16 %v4316_v12  ;;  %v4318_v57 = vunpack.i.h.bf16 %v4316_v12 }
 0x1bd   : > { %v1050_v1 = vsel %vm450_vm0, %v5132_v59, %v4317_v49  ;;  %v1051_v61 = vsel %vm450_vm0, %v5145_v33, %v4318_v57 }
 0x1bf   : > { %v5391_v39 = vpop.f32.mrf.mxu0 }
 0x1c0   : > { %7502 = vst [vmem:[#allocation13_spill] sm:$0xff] %v5391_v39 }
 0x1c2   : > { %v4331_v59 = vpop.permute.xlu0 %4330 }
 0x1c3   : > { %v4332_v19 = vunpack.i.l.bf16 %v4331_v59 }
 0x1c5   : > { %v1052_v33 = vsel %vm450_vm0, %v5155_v38, %v4332_v19 }
 0x1c7   : > { %v5399_v45 = vpop.f32.mrf.mxu0 }
 0x1c8   : > { %7503 = vst [vmem:[#allocation14_spill] sm:$0xff] %v5399_v45 }
 0x1cf   : > { %v5405_v24 = vpop.f32.mrf.mxu0 }
 0x1d0   : > { %7504 = vst [vmem:[#allocation15_spill] sm:$0xff] %v5405_v24 }
 0x1ea   : > { %v4311_v37 = vpop.permute.xlu2 %4310 }
 0x1eb   : > { %v4312_v29 = vunpack.i.l.bf16 %v4311_v37  ;;  %v4313_v27 = vunpack.i.h.bf16 %v4311_v37 }
 0x1f2   : > { %v4296_v20 = vpop.permute.xlu1 %4295 }
 0x1f3   : > { %v4297_v7 = vunpack.i.l.bf16 %v4296_v20  ;;  %v4298_v56 = vunpack.i.h.bf16 %v4296_v20 }
 0x1f5   : > { %v1064_v60 = vsel %vm1063_vm2, %v1055_v5, %v4297_v7  ;;  %v1065_v36 = vsel %vm1063_vm2, %v1056_v42, %v4298_v56  ;;  %v5417_v5 = vpop.f32.mrf.mxu0 }
 0x1f6   : > { %1108 = vmatmul.f32.vlgmr.msrb.gmra.mxu0 %v1064_v60  ;;  %7505 = vst [vmem:[#allocation16_spill] sm:$0xff] %v5417_v5 }
 0x1fa   : > { %v4301_v18 = vpop.permute.xlu1 %4300  ;;  %v4326_v53 = vpop.permute.xlu2 %4325 }
 0x1fb   : > { %v4302_v23 = vunpack.i.l.bf16 %v4301_v18  ;;  %v4303_v2 = vunpack.i.h.bf16 %v4301_v18  ;;  %v4327_v4 = vunpack.i.l.bf16 %v4326_v53  ;;  %v4328_v7 = vunpack.i.h.bf16 %v4326_v53 }
 0x1fd   : > { %v1048_v16 = vsel %vm450_vm0, %v5107_v46, %v4302_v23  ;;  %v1049_v41 = vsel %vm450_vm0, %v5115_v51, %v4303_v2 }
 0x1fe   : > { %1111 = vmatmul.f32.gmra.mxu0 %v1065_v36  ;;  %v1057_v17 = vsel %vm1054_vm1, %v1048_v16, %v4307_v63  ;;  %v1058_v13 = vsel %vm1054_vm1, %v1049_v41, %v4308_v30  ;;  %v5428_v36 = vpop.f32.mrf.mxu0  ;;  %v4333_v16 = vunpack.i.h.bf16 %v4331_v59 }
 0x1ff   : > { %v1066_v14 = vsel %vm1063_vm2, %v1057_v17, %v4312_v29  ;;  %v1067_v26 = vsel %vm1063_vm2, %v1058_v13, %v4313_v27  ;;  %7506 = vst [vmem:[#allocation17_spill] sm:$0xff] %v5428_v36 }
 0x200   : > { %v1053_v2 = vsel %vm450_vm0, %v5165_v43, %v4333_v16  ;;  %v4424_v43 = vld [vmem:[%s7458_s3] ss:$0 sm:$0xff]  ;;  %v4777_v16 = vmov 32.0  }
 0x201   : > { %4428 = vrcp.f32 %v4777_v16 }
 0x202   : > { %v4321_v46 = vpop.permute.xlu1 %4320 }
 0x203   : > { %v4322_v52 = vunpack.i.l.bf16 %v4321_v46  ;;  %v4323_v20 = vunpack.i.h.bf16 %v4321_v46 }
 0x205   : > { %v1059_v51 = vsel %vm1054_vm1, %v1050_v1, %v4322_v52  ;;  %v1060_v60 = vsel %vm1054_vm1, %v1051_v61, %v4323_v20 }
 0x206   : > { %1114 = vmatmul.f32.gmra.mxu0 %v1066_v14  ;;  %v1068_v0 = vsel %vm1063_vm2, %v1059_v51, %v4327_v4  ;;  %v1069_v56 = vsel %vm1063_vm2, %v1060_v60, %v4328_v7  ;;  %v5435_v41 = vpop.f32.mrf.mxu0 }
 0x207   : > { %7507 = vst [vmem:[#allocation18_spill] sm:$0xff] %v5435_v41 }
 0x20a   : > { %v4336_v21 = vpop.permute.xlu1 %4335  ;;  %v4341_v23 = vpop.permute.xlu2 %4340 }
 0x20b   : > { %v4337_v18 = vunpack.i.l.bf16 %v4336_v21  ;;  %v4342_v32 = vunpack.i.l.bf16 %v4341_v23  ;;  %v4338_v37 = vunpack.i.h.bf16 %v4336_v21  ;;  %v4343_v17 = vunpack.i.h.bf16 %v4341_v23 }
 0x20d   : > { %v1061_v42 = vsel %vm1054_vm1, %v1052_v33, %v4337_v18  ;;  %v1062_v29 = vsel %vm1054_vm1, %v1053_v2, %v4338_v37 }
 0x20e   : > { %1117 = vmatmul.f32.gmra.mxu0 %v1067_v26  ;;  %v1070_v63 = vsel %vm1063_vm2, %v1061_v42, %v4342_v32  ;;  %v1071_v14 = vsel %vm1063_vm2, %v1062_v29, %v4343_v17  ;;  %v5437_v38 = vpop.f32.mrf.mxu0 }
 0x20f   : > { %7508 = vst [vmem:[#allocation19_spill] sm:$0xff] %v5437_v38 }
 0x216   : > { %1120 = vmatmul.f32.gmra.mxu0 %v1068_v0  ;;  %v5439_v30 = vpop.f32.mrf.mxu0 }
 0x217   : > { %7509 = vst [vmem:[#allocation20_spill] sm:$0xff] %v5439_v30 }
 0x21e   : > { %1123 = vmatmul.f32.gmra.mxu0 %v1069_v56  ;;  %v5441_v12 = vpop.f32.mrf.mxu0 }
 0x21f   : > { %7510 = vst [vmem:[#allocation21_spill] sm:$0xff] %v5441_v12 }
 0x226   : > { %1126 = vmatmul.f32.gmra.mxu0 %v1070_v63  ;;  %v5443_v13 = vpop.f32.mrf.mxu0  ;;  %v4429_v63 = vpop.eup %4428 }
 0x227   : > { %7511 = vst [vmem:[#allocation22_spill] sm:$0xff] %v5443_v13  ;;  %v1158_v37 = vmul.f32 32.0, %v4429_v63  ;;  %vm1162_vm3 = vweird.f32 %v4429_v63 }
 0x229   : > { %v1159_v17 = vsub.f32 1.0, %v1158_v37  ;;  %v1446_v37 = vld [vmem:[%s7464_s9 + $0xe8] sm:$0xff] }
 0x22b   : > { %v1160_v2 = vmul.f32 %v4429_v63, %v1159_v17 }
 0x22d   : > { %v1161_v29 = vadd.f32 %v4429_v63, %v1160_v2 }
 0x22e   : > { %1129 = vmatmul.f32.gmra.mxu0 %v1071_v14  ;;  %v5445_v27 = vpop.f32.mrf.mxu0 }
 0x22f   : > { %7512 = vst [vmem:[#allocation23_spill] sm:$0xff] %v5445_v27  ;;  %v5463_v14 = vsel %vm1162_vm3, %v4429_v63, %v1161_v29 }
 0x236   : > { %v5447_v46 = vpop.f32.mrf.mxu0 }
 0x237   : > { %7513 = vst [vmem:[#allocation24_spill] sm:$0xff] %v5447_v46 }
 0x273   : > { %v1109_v49 = vpop.f32.mrf.mxu0 }
 0x274   : > { %v1110_v26 = vadd.f32 %v4424_v43, %v1109_v49  ;;  %v5465_v49 = vpop.permute.xlu1 %1541 }
 0x276   : > { %v1133_v52 = vsel %vm450_vm0, %v1110_v26, 0.0 }
 0x277   : > { %1134 = vadd.xlane.f32.xlu0 %v1133_v52 }
 0x27b   : > { %v1112_v53 = vpop.f32.mrf.mxu0 }
 0x27c   : > { %v1113_v4 = vadd.f32 %v4424_v43, %v1112_v53 }
 0x27e   : > { %v1136_v1 = vsel %vm450_vm0, %v1113_v4, 0.0 }
 0x27f   : > { %1137 = vadd.xlane.f32.xlu1 %v1136_v1 }
 0x283   : > { %v1115_v51 = vpop.f32.mrf.mxu0 }
 0x284   : > { %v1116_v9 = vadd.f32 %v4424_v43, %v1115_v51 }
 0x286   : > { %v1139_v57 = vsel %vm450_vm0, %v1116_v9, 0.0 }
 0x287   : > { %1140 = vadd.xlane.f32.xlu2 %v1139_v57  ;;  %v5473_v57 = vpop.permute.xlu2 %1603 }
 0x28b   : > { %v1118_v0 = vpop.f32.mrf.mxu0 }
 0x28c   : > { %v1119_v20 = vadd.f32 %v4424_v43, %v1118_v0 }
 0x28e   : > { %v1142_v7 = vsel %vm450_vm0, %v1119_v20, 0.0 }
 0x28f   : > { %1143 = vadd.xlane.f32.xlu2 %v1142_v7 }
 0x293   : > { %v1121_v61 = vpop.f32.mrf.mxu0 }
 0x294   : > { %v1122_v59 = vadd.f32 %v4424_v43, %v1121_v61 }
 0x296   : > { %v1145_v60 = vsel %vm450_vm0, %v1122_v59, 0.0 }
 0x297   : > { %1146 = vadd.xlane.f32.xlu0 %v1145_v60 }
 0x29b   : > { %v1124_v21 = vpop.f32.mrf.mxu0 }
 0x29c   : > { %v1125_v31 = vadd.f32 %v4424_v43, %v1124_v21 }
 0x29e   : > { %v1148_v19 = vsel %vm450_vm0, %v1125_v31, 0.0 }
 0x29f   : > { %1149 = vadd.xlane.f32.xlu1 %v1148_v19 }
 0x2a3   : > { %v1127_v56 = vpop.f32.mrf.mxu0 }
 0x2a4   : > { %v1128_v18 = vadd.f32 %v4424_v43, %v1127_v56 }
 0x2a6   : > { %v1151_v23 = vsel %vm450_vm0, %v1128_v18, 0.0 }
 0x2a7   : > { %1152 = vadd.xlane.f32.xlu0 %v1151_v23 }
 0x2ab   : > { %v1130_v32 = vpop.f32.mrf.mxu0 }
 0x2ac   : > { %v5459_v33 = vadd.f32 %v4424_v43, %v1130_v32 }
 0x2ae   : > { %v1154_v42 = vsel %vm450_vm0, %v5459_v33, 0.0 }
 0x2af   : > { %1155 = vadd.xlane.f32.xlu2 %v1154_v42 }
 0x2ea   : > { %v1135_v52 = vpop.xlane.xlu0 %1134 }
 0x2eb   : > { %v1164_v43 = vmul.f32 %v5463_v14, %v1135_v52 }
 0x2ed   : > { %v5468_v53 = vsub.f32 %v1110_v26, %v1164_v43  ;;  %v1447_v43 = vld [vmem:[%s7464_s9 + $0xf0] sm:$0xff] }
 0x2ef   : > { %v1180_v1 = vmul.f32 %v5468_v53, %v5468_v53 }
 0x2f1   : > { %v1188_v51 = vsel %vm450_vm0, %v1180_v1, 0.0 }
 0x2f2   : > { %v1138_v0 = vpop.xlane.xlu1 %1137  ;;  %1189 = vadd.xlane.f32.xlu2 %v1188_v51 }
 0x2f3   : > { %v1165_v7 = vmul.f32 %v5463_v14, %v1138_v0 }
 0x2f5   : > { %v5476_v61 = vsub.f32 %v1113_v4, %v1165_v7 }
 0x2f7   : > { %v1181_v60 = vmul.f32 %v5476_v61, %v5476_v61 }
 0x2f9   : > { %v1191_v21 = vsel %vm450_vm0, %v1181_v60, 0.0 }
 0x2fa   : > { %v1141_v26 = vpop.xlane.xlu2 %1140  ;;  %1192 = vadd.xlane.f32.xlu1 %v1191_v21 }
 0x2fb   : > { %v1166_v19 = vmul.f32 %v5463_v14, %v1141_v26 }
 0x2fd   : > { %v5482_v56 = vsub.f32 %v1116_v9, %v1166_v19  ;;  %v1445_v19 = vld [vmem:[%s7464_s9 + $0xe0] sm:$0xff] }
 0x2ff   : > { %v1182_v23 = vmul.f32 %v5482_v56, %v5482_v56 }
 0x301   : > { %v1194_v32 = vsel %vm450_vm0, %v1182_v23, 0.0 }
 0x302   : > { %v1144_v42 = vpop.xlane.xlu2 %1143  ;;  %1195 = vadd.xlane.f32.xlu0 %v1194_v32  ;;  %v1444_v32 = vld [vmem:[%s7464_s9 + $0xd8] sm:$0xff] }
 0x303   : > { %v1167_v4 = vmul.f32 %v5463_v14, %v1144_v42  ;;  %v1342_v42 = vld [vmem:[%s7462_s7 + $0x10] sm:$0xff] }
 0x305   : > { %v5488_v16 = vsub.f32 %v1119_v20, %v1167_v4 }
 0x307   : > { %v1183_v63 = vmul.f32 %v5488_v16, %v5488_v16 }
 0x309   : > { %v1197_v9 = vsel %vm450_vm0, %v1183_v63, 0.0  ;;  %v1341_v63 = vld [vmem:[%s7462_s7 + $0x8] sm:$0xff] }
 0x30a   : > { %1198 = vadd.xlane.f32.xlu1 %v1197_v9  ;;  %1599 = vrot.lane.b32.xlu2 %v1446_v37, %s4774_s20  ;;  %v1147_v1 = vpop.xlane.xlu0 %1146  ;;  %v1340_v37 = vld [vmem:[%s7462_s7] sm:$0xff]  ;;  %v1432_v9 = vld [vmem:[%s7464_s9 + $0x78] sm:$0xff] }
 0x30b   : > { %v1168_v51 = vmul.f32 %v5463_v14, %v1147_v1 }
 0x30d   : > { %v5508_v0 = vsub.f32 %v1122_v59, %v1168_v51 }
 0x312   : > { %v1150_v17 = vpop.xlane.xlu1 %1149 }
 0x313   : > { %v1169_v2 = vmul.f32 %v5463_v14, %v1150_v17 }
 0x315   : > { %v5498_v29 = vsub.f32 %v1125_v31, %v1169_v2  ;;  %v1184_v31 = vmul.f32 %v5508_v0, %v5508_v0 }
 0x317   : > { %v1185_v20 = vmul.f32 %v5498_v29, %v5498_v29  ;;  %v1200_v7 = vsel %vm450_vm0, %v1184_v31, 0.0 }
 0x319   : > { %v1203_v52 = vsel %vm450_vm0, %v1185_v20, 0.0 }
 0x31a   : > { %1204 = vadd.xlane.f32.xlu0 %v1203_v52  ;;  %v1153_v60 = vpop.xlane.xlu0 %1152  ;;  %v1431_v52 = vld [vmem:[%s7464_s9 + $0x70] sm:$0xff] }
 0x31b   : > { %v1170_v21 = vmul.f32 %v5463_v14, %v1153_v60 }
 0x31d   : > { %v5514_v26 = vsub.f32 %v1128_v18, %v1170_v21  ;;  %v1343_v18 = vld [vmem:[%s7462_s7 + $0x18] sm:$0xff] }
 0x31e   : > { %1380 = vmatpush.msra.mxu3 %v1343_v18 }
 0x31f   : > { %v1186_v23 = vmul.f32 %v5514_v26, %v5514_v26 }
 0x320   : > { %1381 = vmatpush.msra.mxu3 %v1342_v42 }
 0x321   : > { %v1206_v59 = vsel %vm450_vm0, %v1186_v23, 0.0  ;;  %v1430_v23 = vld [vmem:[%s7464_s9 + $0x68] sm:$0xff] }
 0x322   : > { %v1156_v4 = vpop.xlane.xlu2 %1155  ;;  %1382 = vmatpush.msra.mxu3 %v1341_v63 }
 0x323   : > { %1601 = vrot.lane.b32.xlu1 %v1447_v43, %s4774_s20  ;;  %v1171_v51 = vmul.f32 %v5463_v14, %v1156_v4 }
 0x324   : > { %1383 = vmatpush.msra.mxu3 %v1340_v37 }
 0x325   : > { %v5551_v21 = vsub.f32 %v5459_v33, %v1171_v51 }
 0x327   : > { %v1187_v4 = vmul.f32 %v5551_v21, %v5551_v21 }
 0x333   : > { %1201 = vadd.xlane.f32.xlu2 %v1200_v7 }
 0x34b   : > { %1597 = vrot.lane.b32.xlu2 %v1445_v19, %s4774_s20 }
 0x34d   : > { %1207 = vadd.xlane.f32.xlu1 %v1206_v59 }
 0x353   : > { %1595 = vrot.lane.b32.xlu2 %v1444_v32, %s4774_s20 }
 0x365   : > { %v1190_v17 = vpop.xlane.xlu2 %1189 }
 0x366   : > { %v1212_v2 = vmul.f32 %v1190_v17, %v5463_v14  ;;  %1571 = vrot.lane.b32.xlu1 %v1432_v9, %s4774_s20  ;;  %v5563_v17 = vld [vmem:[%s7459_s4] ss:$0 sm:$0xff] }
 0x368   : > { %v1220_v20 = vadd.f32 1e-05, %v1212_v2  ;;  %v1426_v2 = vld [vmem:[%s7464_s9 + $0x48] sm:$0xff] }
 0x369   : > { %1559 = vrot.lane.b32.xlu0 %v1426_v2, %s4774_s20  ;;  %v1428_v2 = vld [vmem:[%s7464_s9 + $0x58] sm:$0xff] }
 0x36a   : > { %4430 = vrsqrt.f32 %v1220_v20  ;;  %vm1234_vm5 = vweird.f32 %v1220_v20 }
 0x36d   : > { %v1193_v43 = vpop.xlane.xlu1 %1192 }
 0x36e   : > { %v1213_v1 = vmul.f32 %v1193_v43, %v5463_v14  ;;  %1569 = vrot.lane.b32.xlu1 %v1431_v52, %s4774_s20  ;;  %v1209_v43 = vsel %vm450_vm0, %v1187_v4, 0.0 }
 0x370   : > { %v4431_v31 = vpop.eup %4430  ;;  %v1221_v7 = vadd.f32 1e-05, %v1213_v1  ;;  %v1429_v1 = vld [vmem:[%s7464_s9 + $0x60] sm:$0xff] }
 0x371   : > { %v1229_v60 = vmul.f32 %v4431_v31, %v1220_v20  ;;  %vm1235_vm4 = vweird.f32 %v4431_v31 }
 0x372   : > { %4432 = vrsqrt.f32 %v1221_v7  ;;  %vm1236_vm6 = vmor %vm1234_vm5, %vm1235_vm4  ;;  %vm1244_vm8 = vweird.f32 %v1221_v7 }
 0x373   : > { %v1230_v19 = vmul.f32 %v4431_v31, %v1229_v60  ;;  %v5577_v60 = vld [vmem:[%s7460_s5] ss:$0 sm:$0xff] }
 0x375   : > { %v1231_v59 = vmul.f32 0.5, %v1230_v19  ;;  %v1196_v32 = vpop.xlane.xlu0 %1195 }
 0x376   : > { %v1214_v18 = vmul.f32 %v1196_v32, %v5463_v14  ;;  %1567 = vrot.lane.b32.xlu1 %v1430_v23, %s4774_s20 }
 0x377   : > { %v1232_v42 = vsub.f32 1.5, %v1231_v59 }
 0x378   : > { %v4433_v63 = vpop.eup %4432  ;;  %v1222_v37 = vadd.f32 1e-05, %v1214_v18 }
 0x379   : > { %v1233_v33 = vmul.f32 %v4431_v31, %v1232_v42  ;;  %v1239_v9 = vmul.f32 %v4433_v63, %v1221_v7  ;;  %vm1245_vm7 = vweird.f32 %v4433_v63 }
 0x37a   : > { %4434 = vrsqrt.f32 %v1222_v37  ;;  %vm1246_vm9 = vmor %vm1244_vm8, %vm1245_vm7  ;;  %vm1254_vm11 = vweird.f32 %v1222_v37 }
 0x37b   : > { %v1240_v52 = vmul.f32 %v4433_v63, %v1239_v9  ;;  %v1237_v20 = vsel %vm1236_vm6, %v4431_v31, %v1233_v33 }
 0x37c   : > { %1210 = vadd.xlane.f32.xlu2 %v1209_v43  ;;  %v1308_v51 = vmul.f32 %v1237_v20, %v5468_v53 }
 0x37d   : > { %v1241_v19 = vmul.f32 0.5, %v1240_v52  ;;  %v1199_v23 = vpop.xlane.xlu1 %1198 }
 0x37e   : > { %v1215_v59 = vmul.f32 %v1199_v23, %v5463_v14  ;;  %1565 = vrot.lane.b32.xlu1 %v1429_v1, %s4774_s20  ;;  %v1320_v32 = vmul.f32 %v5563_v17, %v1308_v51 }
 0x37f   : > { %v1242_v18 = vsub.f32 1.5, %v1241_v19 }
 0x380   : > { %v4435_v31 = vpop.eup %4434  ;;  %v1223_v42 = vadd.f32 1e-05, %v1215_v59  ;;  %v1332_v4 = vadd.f32 %v5577_v60, %v1320_v32 }
 0x381   : > { %v1243_v53 = vmul.f32 %v4433_v63, %v1242_v18  ;;  %v1249_v33 = vmul.f32 %v4435_v31, %v1222_v37  ;;  %vm1255_vm10 = vweird.f32 %v4435_v31 }
 0x382   : > { %4436 = vrsqrt.f32 %v1223_v42  ;;  %4163 = vmatmul.msk.f32.vlgmr.msra.gmra.mxu3 %vm450_vm0, %v1332_v4  ;;  %vm1256_vm12 = vmor %vm1254_vm11, %vm1255_vm10  ;;  %vm1264_vm14 = vweird.f32 %v1223_v42 }
 0x383   : > { %v1250_v9 = vmul.f32 %v4435_v31, %v1249_v33  ;;  %v1247_v52 = vsel %vm1246_vm9, %v4433_v63, %v1243_v53 }
 0x384   : > { %v1309_v43 = vmul.f32 %v1247_v52, %v5476_v61  ;;  %v1427_v61 = vld [vmem:[%s7464_s9 + $0x50] sm:$0xff] }
 0x385   : > { %v1251_v1 = vmul.f32 0.5, %v1250_v9 }
 0x386   : > { %1563 = vrot.lane.b32.xlu1 %v1428_v2, %s4774_s20  ;;  %v1321_v20 = vmul.f32 %v5563_v17, %v1309_v43  ;;  %v1443_v2 = vld [vmem:[%s7464_s9 + $0xd0] sm:$0xff] }
 0x387   : > { %v1252_v51 = vsub.f32 1.5, %v1251_v1 }
 0x388   : > { %v4437_v7 = vpop.eup %4436  ;;  %v1333_v19 = vadd.f32 %v5577_v60, %v1321_v20 }
 0x389   : > { %v1253_v23 = vmul.f32 %v4435_v31, %v1252_v51  ;;  %v1259_v59 = vmul.f32 %v4437_v7, %v1223_v42  ;;  %vm1265_vm13 = vweird.f32 %v4437_v7  ;;  %v1442_v51 = vld [vmem:[%s7464_s9 + $0xc8] sm:$0xff] }
 0x38a   : > { %4164 = vmatmul.msk.f32.gmra.mxu3 %vm450_vm0, %v1333_v19  ;;  %vm1266_vm15 = vmor %vm1264_vm14, %vm1265_vm13  ;;  %v5620_v19 = vpop.permute.xlu2 %1599  ;;  %vm2183_vm14 = vcmask 1048064  }
 0x38b   : > { %v1260_v32 = vmul.f32 %v4437_v7, %v1259_v59  ;;  %v1257_v63 = vsel %vm1256_vm12, %v4435_v31, %v1253_v23  ;;  %v1441_v23 = vld [vmem:[%s7464_s9 + $0xc0] sm:$0xff] }
 0x38c   : > { %v1310_v18 = vmul.f32 %v1257_v63, %v5482_v56  ;;  %v1439_v56 = vld [vmem:[%s7464_s9 + $0xb0] sm:$0xff]  ;;  %v1437_v59 = vld [vmem:[%s7464_s9 + $0xa0] sm:$0xff] }
 0x38d   : > { %v1261_v4 = vmul.f32 0.5, %v1260_v32  ;;  %v1205_v43 = vpop.xlane.xlu0 %1204 }
 0x38e   : > { %1561 = vrot.lane.b32.xlu1 %v1427_v61, %s4774_s20  ;;  %v1322_v53 = vmul.f32 %v5563_v17, %v1310_v18  ;;  %v1217_v20 = vmul.f32 %v1205_v43, %v5463_v14 }
 0x38f   : > { %v1262_v33 = vsub.f32 1.5, %v1261_v4  ;;  %v1440_v4 = vld [vmem:[%s7464_s9 + $0xb8] sm:$0xff] }
 0x390   : > { %v1334_v37 = vadd.f32 %v5577_v60, %v1322_v53 }
 0x391   : > { %v1263_v9 = vmul.f32 %v4437_v7, %v1262_v33  ;;  %v1436_v33 = vld [vmem:[%s7464_s9 + $0x98] sm:$0xff] }
 0x392   : > { %4165 = vmatmul.msk.f32.gmra.mxu3 %vm450_vm0, %v1334_v37 }
 0x393   : > { %v1267_v31 = vsel %vm1266_vm15, %v4437_v7, %v1263_v9  ;;  %v1225_v7 = vadd.f32 1e-05, %v1217_v20 }
 0x394   : > { %v1311_v52 = vmul.f32 %v1267_v31, %v5488_v16  ;;  %1593 = vrot.lane.b32.xlu2 %v1443_v2, %s4774_s20  ;;  %v1438_v16 = vld [vmem:[%s7464_s9 + $0xa8] sm:$0xff]  ;;  %v1425_v2 = vld [vmem:[%s7464_s9 + $0x40] sm:$0xff] }
 0x395   : > { %4438 = vrsqrt.f32 %v1225_v7  ;;  %v5648_v20 = vpop.permute.xlu1 %1601  ;;  %vm1284_vm6 = vweird.f32 %v1225_v7 }
 0x396   : > { %1585 = vrot.lane.b32.xlu1 %v1439_v56, %s4774_s20  ;;  %v1323_v42 = vmul.f32 %v5563_v17, %v1311_v52  ;;  %v1435_v52 = vld [vmem:[%s7464_s9 + $0x90] sm:$0xff] }
 0x398   : > { %v1335_v1 = vadd.f32 %v5577_v60, %v1323_v42 }
 0x39a   : > { %4166 = vmatmul.msk.f32.gmra.mxu3 %vm450_vm0, %v1335_v1 }
 0x39b   : > { %v4439_v61 = vpop.eup %4438 }
 0x39c   : > { %1591 = vrot.lane.b32.xlu2 %v1442_v51, %s4774_s20  ;;  %v1279_v53 = vmul.f32 %v4439_v61, %v1225_v7  ;;  %vm1285_vm3 = vweird.f32 %v4439_v61  ;;  %v1423_v7 = vld [vmem:[%s7464_s9 + $0x30] sm:$0xff] }
 0x39d   : > { %vm1286_vm7 = vmor %vm1284_vm6, %vm1285_vm3 }
 0x39e   : > { %1583 = vrot.lane.b32.xlu1 %v1438_v16, %s4774_s20  ;;  %v1280_v37 = vmul.f32 %v4439_v61, %v1279_v53  ;;  %v1424_v16 = vld [vmem:[%s7464_s9 + $0x38] sm:$0xff] }
 0x3a0   : > { %v1281_v56 = vmul.f32 0.5, %v1280_v37 }
 0x3a2   : > { %v1282_v42 = vsub.f32 1.5, %v1281_v56 }
 0x3a4   : > { %1589 = vrot.lane.b32.xlu2 %v1441_v23, %s4774_s20  ;;  %v1283_v23 = vmul.f32 %v4439_v61, %v1282_v42 }
 0x3a6   : > { %v1202_v32 = vpop.xlane.xlu2 %1201  ;;  %1581 = vrot.lane.b32.xlu1 %v1437_v59, %s4774_s20  ;;  %v1287_v53 = vsel %vm1286_vm7, %v4439_v61, %v1283_v23 }
 0x3a7   : > { %v1216_v63 = vmul.f32 %v1202_v32, %v5463_v14  ;;  %v1434_v32 = vld [vmem:[%s7464_s9 + $0x88] sm:$0xff]  ;;  %v1313_v56 = vmul.f32 %v1287_v53, %v5498_v29 }
 0x3a9   : > { %v1224_v18 = vadd.f32 1e-05, %v1216_v63  ;;  %v1325_v61 = vmul.f32 %v5563_v17, %v1313_v56 }
 0x3ab   : > { %4440 = vrsqrt.f32 %v1224_v18  ;;  %vm1274_vm4 = vweird.f32 %v1224_v18  ;;  %v1337_v29 = vadd.f32 %v5577_v60, %v1325_v61 }
 0x3ac   : > { %1587 = vrot.lane.b32.xlu2 %v1440_v4, %s4774_s20 }
 0x3ae   : > { %1579 = vrot.lane.b32.xlu1 %v1436_v33, %s4774_s20 }
 0x3b1   : > { %v4441_v9 = vpop.eup %4440 }
 0x3b2   : > { %v1269_v31 = vmul.f32 %v4441_v9, %v1224_v18  ;;  %vm1275_vm2 = vweird.f32 %v4441_v9 }
 0x3b3   : > { %vm1276_vm5 = vmor %vm1274_vm4, %vm1275_vm2 }
 0x3b4   : > { %v1270_v43 = vmul.f32 %v4441_v9, %v1269_v31  ;;  %1557 = vrot.lane.b32.xlu2 %v1425_v2, %s4774_s20  ;;  %v1422_v31 = vld [vmem:[%s7464_s9 + $0x28] sm:$0xff] }
 0x3b6   : > { %v1271_v1 = vmul.f32 0.5, %v1270_v43  ;;  %1577 = vrot.lane.b32.xlu1 %v1435_v52, %s4774_s20  ;;  %v1418_v43 = vld [vmem:[%s7464_s9 + $0x8] sm:$0xff] }
 0x3b8   : > { %v1272_v51 = vsub.f32 1.5, %v1271_v1 }
 0x3ba   : > { %v1273_v59 = vmul.f32 %v4441_v9, %v1272_v51 }
 0x3bc   : > { %v1277_v63 = vsel %vm1276_vm5, %v4441_v9, %v1273_v59  ;;  %1555 = vrot.lane.b32.xlu2 %v1424_v16, %s4774_s20  ;;  %v1421_v16 = vld [vmem:[%s7464_s9 + $0x20] sm:$0xff] }
 0x3bd   : > { %v1312_v4 = vmul.f32 %v1277_v63, %v5508_v0  ;;  %v1433_v0 = vld [vmem:[%s7464_s9 + $0x80] sm:$0xff] }
 0x3be   : > { %1575 = vrot.lane.b32.xlu1 %v1434_v32, %s4774_s20 }
 0x3bf   : > { %v1324_v33 = vmul.f32 %v5563_v17, %v1312_v4 }
 0x3c0   : > { %v1208_v37 = vpop.xlane.xlu1 %1207 }
 0x3c1   : > { %v1218_v18 = vmul.f32 %v1208_v37, %v5463_v14  ;;  %v1336_v2 = vadd.f32 %v5577_v60, %v1324_v33  ;;  %v1420_v33 = vld [vmem:[%s7464_s9 + $0x18] sm:$0xff] }
 0x3c3   : > { %v1226_v9 = vadd.f32 1e-05, %v1218_v18  ;;  %4167 = vmatmul.msk.f32.gmra.mxu3 %vm450_vm0, %v1336_v2  ;;  %v5696_v18 = vpop.permute.xlu2 %1597 }
 0x3c4   : > { %1553 = vrot.lane.b32.xlu2 %v1423_v7, %s4774_s20 }
 0x3c5   : > { %4442 = vrsqrt.f32 %v1226_v9  ;;  %vm1294_vm9 = vweird.f32 %v1226_v9 }
 0x3c6   : > { %1573 = vrot.lane.b32.xlu1 %v1433_v0, %s4774_s20 }
 0x3cb   : > { %v4443_v52 = vpop.eup %4442  ;;  %4168 = vmatmul.msk.f32.gmra.mxu3 %vm450_vm0, %v1337_v29  ;;  %v5705_v56 = vpop.permute.xlu2 %1595 }
 0x3cc   : > { %v1289_v42 = vmul.f32 %v4443_v52, %v1226_v9  ;;  %1551 = vrot.lane.b32.xlu2 %v1422_v31, %s4774_s20  ;;  %vm1295_vm8 = vweird.f32 %v4443_v52 }
 0x3cd   : > { %vm1296_vm10 = vmor %vm1294_vm9, %vm1295_vm8 }
 0x3ce   : > { %v1290_v1 = vmul.f32 %v4443_v52, %v1289_v42  ;;  %1543 = vrot.lane.b32.xlu1 %v1418_v43, %s4774_s20 }
 0x3d0   : > { %v1291_v51 = vmul.f32 0.5, %v1290_v1 }
 0x3d2   : > { %v1292_v23 = vsub.f32 1.5, %v1291_v51 }
 0x3d4   : > { %v1293_v59 = vmul.f32 %v4443_v52, %v1292_v23  ;;  %1549 = vrot.lane.b32.xlu2 %v1421_v16, %s4774_s20 }
 0x3d6   : > { %v1297_v32 = vsel %vm1296_vm10, %v4443_v52, %v1293_v59 }
 0x3d7   : > { %v1314_v63 = vmul.f32 %v1297_v32, %v5514_v26  ;;  %v1419_v26 = vld [vmem:[%s7464_s9 + $0x10] sm:$0xff] }
 0x3d8   : > { %v5688_v4 = vpop.permute.xlu1 %1571 }
 0x3d9   : > { %v1326_v53 = vmul.f32 %v5563_v17, %v1314_v63 }
 0x3db   : > { %v1338_v37 = vadd.f32 %v5577_v60, %v1326_v53 }
 0x3dc   : > { %1547 = vrot.lane.b32.xlu2 %v1420_v33, %s4774_s20 }
 0x3dd   : > { %4169 = vmatmul.msk.f32.gmra.mxu3 %vm450_vm0, %v1338_v37 }
 0x3e0   : > { %v5699_v2 = vpop.permute.xlu1 %1569 }
 0x3e4   : > { %1545 = vrot.lane.b32.xlu2 %v1419_v26, %s4774_s20  ;;  %s7233_s20 = scalar_lea.vmem %s7467_s12, %s4269_s23 }
 0x3e8   : > { %v5707_v7 = vpop.permute.xlu1 %1567 }
 0x3ef   : > { %v1211_v9 = vpop.xlane.xlu2 %1210 }
 0x3f0   : > { %v1219_v0 = vmul.f32 %v1211_v9, %v5463_v14  ;;  %v5710_v61 = vpop.permute.xlu1 %1565 }
 0x3f2   : > { %v1227_v29 = vadd.f32 1e-05, %v1219_v0 }
 0x3f4   : > { %4444 = vrsqrt.f32 %v1227_v29  ;;  %vm1304_vm12 = vweird.f32 %v1227_v29 }
 0x3f7   : > { %v5712_v31 = vpop.permute.xlu2 %1593 }
 0x3f8   : > { %v5714_v52 = vpop.permute.xlu1 %1563 }
 0x3fa   : > { %v4445_v43 = vpop.eup %4444 }
 0x3fb   : > { %v1299_v42 = vmul.f32 %v4445_v43, %v1227_v29  ;;  %vm1305_vm11 = vweird.f32 %v4445_v43 }
 0x3fc   : > { %vm1306_vm13 = vmor %vm1304_vm12, %vm1305_vm11 }
 0x3fd   : > { %v1300_v1 = vmul.f32 %v4445_v43, %v1299_v42 }
 0x3ff   : > { %v1301_v51 = vmul.f32 0.5, %v1300_v1  ;;  %v5716_v16 = vpop.permute.xlu2 %1591 }
 0x400   : > { %v5718_v23 = vpop.permute.xlu1 %1561 }
 0x401   : > { %v1302_v59 = vsub.f32 1.5, %v1301_v51 }
 0x403   : > { %v1303_v32 = vmul.f32 %v4445_v43, %v1302_v59 }
 0x405   : > { %v5720_v14 = vpop.f32.mrf.mxu3  ;;  %v1307_v63 = vsel %vm1306_vm13, %v4445_v43, %v1303_v32 }
 0x406   : > { %v1315_v53 = vmul.f32 %v1307_v63, %v5551_v21  ;;  %v1637_v38 = vmul.f32 %v5465_v49, %v5720_v14 }
 0x407   : > { %v5723_v33 = vpop.permute.xlu2 %1589 }
 0x408   : > { %v5725_v37 = vpop.permute.xlu1 %1585  ;;  %v1327_v26 = vmul.f32 %v5563_v17, %v1315_v53  ;;  %v1661_v21 = vmul.f32 %v5723_v33, %v5720_v14 }
 0x40a   : > { %v1339_v9 = vadd.f32 %v5577_v60, %v1327_v26 }
 0x40c   : > { %4170 = vmatmul.msk.f32.gmra.mxu3 %vm450_vm0, %v1339_v9 }
 0x40d   : > { %v5730_v0 = vpop.f32.mrf.mxu3 }
 0x40e   : > { %v1662_v63 = vmul.f32 %v5716_v16, %v5730_v0 }
 0x40f   : > { %v5732_v42 = vpop.permute.xlu2 %1587 }
 0x410   : > { %v5734_v29 = vpop.permute.xlu1 %1583 }
 0x415   : > { %v5736_v1 = vpop.f32.mrf.mxu3 }
 0x416   : > { %v1647_v43 = vmul.f32 %v5718_v23, %v5736_v1 }
 0x417   : > { %v5742_v51 = vpop.permute.xlu2 %1557 }
 0x418   : > { %v5744_v17 = vpop.permute.xlu1 %1581  ;;  %v4349_v60 = vpack.i.bf16 %v1647_v43, %v1661_v21 }
 0x41a   : > { %4350 = vrot.lane.b32.xlu2 %v4349_v60, %s4776_s15 }
 0x41d   : > { %v5747_v59 = vpop.f32.mrf.mxu3 }
 0x41e   : > { %v1648_v32 = vmul.f32 %v5714_v52, %v5747_v59 }
 0x41f   : > { %v5753_v53 = vpop.permute.xlu2 %1555 }
 0x420   : > { %v5755_v26 = vpop.permute.xlu1 %1579  ;;  %v4359_v9 = vpack.i.bf16 %v1648_v32, %v1662_v63 }
 0x422   : > { %4360 = vrot.lane.b32.xlu1 %v4359_v9, %s4776_s15 }
 0x427   : > { %v5758_v46 = vpop.permute.xlu2 %1553 }
 0x428   : > { %v5760_v21 = vpop.permute.xlu1 %1577 }
 0x429   : > { %v1655_v6 = vmul.f32 %v5760_v21, %v5736_v1 }
 0x42f   : > { %v5762_v43 = vpop.permute.xlu2 %1551 }
 0x430   : > { %v5764_v60 = vpop.permute.xlu1 %1575 }
 0x431   : > { %v1654_v30 = vmul.f32 %v5764_v60, %v5730_v0 }
 0x437   : > { %v5766_v27 = vpop.permute.xlu2 %1549 }
 0x438   : > { %v5768_v13 = vpop.permute.xlu1 %1573 }
 0x439   : > { %v1653_v45 = vmul.f32 %v5768_v13, %v5720_v14 }
 0x43f   : > { %v5770_v12 = vpop.permute.xlu2 %1547 }
 0x440   : > { %v1640_v32 = vmul.f32 %v5770_v12, %v5747_v59  ;;  %v5776_v63 = vpop.permute.xlu1 %1543 }
 0x441   : > { %v1638_v9 = vmul.f32 %v5776_v63, %v5730_v0 }
 0x442   : > { %v4364_v41 = vpack.i.bf16 %v1640_v32, %v1654_v30  ;;  %v1664_v30 = vmul.f32 %v5705_v56, %v5747_v59 }
 0x443   : > { %v4344_v36 = vpack.i.bf16 %v1637_v38, %v1638_v9 }
 0x444   : > { %4365 = vrot.lane.b32.xlu1 %v4364_v41, %s4776_s15  ;;  %v1656_v41 = vmul.f32 %v5755_v26, %v5747_v59 }
 0x445   : > { %4345 = vrot.lane.b32.xlu0 %v4344_v36, %s4776_s15 }
 0x446   : > { %v1397_v5 = vpop.f32.mrf.mxu3 }
 0x447   : > { %v5784_v24 = vpop.permute.xlu2 %1545  ;;  %v1649_v38 = vmul.f32 %v5710_v61, %v1397_v5  ;;  %v1641_v22 = vmul.f32 %v5766_v27, %v1397_v5 }
 0x448   : > { %v1639_v39 = vmul.f32 %v5784_v24, %v5736_v1 }
 0x449   : > { %v4374_v25 = vpack.i.bf16 %v1641_v22, %v1655_v6 }
 0x44a   : > { %v4354_v58 = vpack.i.bf16 %v1639_v39, %v1653_v45  ;;  %v1663_v39 = vmul.f32 %v5712_v31, %v5736_v1 }
 0x44c   : > { %4355 = vrot.lane.b32.xlu2 %v4354_v58, %s4776_s15  ;;  %v4369_v9 = vpack.i.bf16 %v1649_v38, %v1663_v39 }
 0x44e   : > { %v5791_v54 = vpop.f32.mrf.mxu3 }
 0x44f   : > { %v1650_v36 = vmul.f32 %v5707_v7, %v5791_v54  ;;  %v1642_v32 = vmul.f32 %v5762_v43, %v5791_v54 }
 0x451   : > { %v4379_v58 = vpack.i.bf16 %v1650_v36, %v1664_v30  ;;  %v4384_v45 = vpack.i.bf16 %v1642_v32, %v1656_v41  ;;  %v1665_v41 = vmul.f32 %v5696_v18, %v1397_v5  ;;  %v1657_v36 = vmul.f32 %v5744_v17, %v1397_v5 }
 0x453   : > { %4380 = vrot.lane.b32.xlu1 %v4379_v58, %s4776_s15  ;;  %4385 = vrot.lane.b32.xlu0 %v4384_v45, %s4776_s15 }
 0x454   : > { %4370 = vrot.lane.b32.xlu2 %v4369_v9, %s4776_s15  ;;  %v1666_v9 = vmul.f32 %v5620_v19, %v5791_v54 }
 0x45c   : > { %4375 = vrot.lane.b32.xlu2 %v4374_v25, %s4776_s15  ;;  %v1645_v25 = vmul.f32 %v5742_v51, %v5720_v14 }
 0x460   : > { %v1403_v8 = vpop.f32.mrf.mxu3 }
 0x461   : > { %v1651_v11 = vmul.f32 %v5699_v2, %v1403_v8  ;;  %v1643_v38 = vmul.f32 %v5758_v46, %v1403_v8  ;;  %v1659_v39 = vmul.f32 %v5725_v37, %v1403_v8 }
 0x463   : > { %v4389_v30 = vpack.i.bf16 %v1651_v11, %v1665_v41  ;;  %v4399_v32 = vpack.i.bf16 %v1643_v38, %v1657_v36  ;;  %v4394_v6 = vpack.i.bf16 %v1645_v25, %v1659_v39  ;;  %v1667_v11 = vmul.f32 %v5648_v20, %v1403_v8 }
 0x465   : > { %4390 = vrot.lane.b32.xlu2 %v4389_v30, %s4776_s15  ;;  %4400 = vrot.lane.b32.xlu0 %v4399_v32, %s4776_s15 }
 0x46d   : > { %4395 = vrot.lane.b32.xlu2 %v4394_v6, %s4776_s15 }
 0x474   : > { %v4351_v39 = vpop.permute.xlu2 %4350 }
 0x487   : > { %1449 = vxpose.xlu0.b32.start [1/8] (short) (narrow) %v5720_v14, 32  ;;  %v5834_v14 = vpop.permute.xlu0 %1559 }
 0x488   : > { %v1646_v30 = vmul.f32 %v5834_v14, %v5730_v0 }
 0x48f   : > { %1450 = vxpose.xlu0.b32.cont [2/8] (short) (narrow) %v5730_v0, 32  ;;  %v5823_v22 = vpop.f32.mrf.mxu3 }
 0x490   : > { %v1668_v58 = vmul.f32 %v5473_v57, %v5823_v22  ;;  %v1652_v45 = vmul.f32 %v5688_v4, %v5823_v22  ;;  %v1660_v36 = vmul.f32 %v5732_v42, %v5823_v22 }
 0x492   : > { %v4404_v41 = vpack.i.bf16 %v1667_v11, %v1668_v58  ;;  %v4409_v38 = vpack.i.bf16 %v1652_v45, %v1666_v9  ;;  %v4414_v32 = vpack.i.bf16 %v1646_v30, %v1660_v36 }
 0x494   : > { %4405 = vrot.lane.b32.xlu2 %v4404_v41, %s4776_s15  ;;  %4410 = vrot.lane.b32.xlu1 %v4409_v38, %s4776_s15  ;;  %v4361_v0 = vpop.permute.xlu1 %4360 }
 0x497   : > { %1451 = vxpose.xlu0.b32.cont [3/8] (short) (narrow) %v5736_v1, 32 }
 0x49c   : > { %4415 = vrot.lane.b32.xlu1 %v4414_v32, %s4776_s15 }
 0x49f   : > { %1452 = vxpose.xlu0.b32.cont [4/8] (short) (narrow) %v5747_v59, 32 }
 0x4a6   : > { %v5844_v25 = vpop.permute.xlu2 %4355 }
 0x4a7   : > { %1453 = vxpose.xlu0.b32.cont [5/8] (short) (narrow) %v1397_v5, 32 }
 0x4ae   : > { %v4371_v6 = vpop.permute.xlu2 %4370 }
 0x4af   : > { %1454 = vxpose.xlu0.b32.cont [6/8] (short) (narrow) %v5791_v54, 32 }
 0x4b6   : > { %v5847_v11 = vpop.permute.xlu2 %4375  ;;  %v5853_v59 = vpop.permute.xlu1 %4365 }
 0x4b7   : > { %1455 = vxpose.xlu0.b32.cont [7/8] (short) (narrow) %v1403_v8, 32 }
 0x4bf   : > { %1456 = vxpose.xlu0.b32.end [8/8] (short) (narrow) %v5823_v22, 32  ;;  %v4391_v1 = vpop.permute.xlu2 %4390 }
 0x4c0   : > { %v4393_v30 = vunpack.i.h.bf16 %v4391_v1  ;;  %v4392_v32 = vunpack.i.l.bf16 %v4391_v1 }
 0x4c2   : > { %v2980_v1 = vsel %vm450_vm0, %v4392_v32, %v5696_v18 }
 0x4c5   : > { %v4381_v38 = vpop.permute.xlu1 %4380 }
 0x4c6   : > { %v4383_v15 = vunpack.i.h.bf16 %v4381_v38  ;;  %v4382_v3 = vunpack.i.l.bf16 %v4381_v38 }
 0x4c7   : > { %v4396_v58 = vpop.permute.xlu2 %4395 }
 0x4ee   : > { %v4406_v45 = vpop.permute.xlu2 %4405 }
 0x4ef   : > { %v4408_v9 = vunpack.i.h.bf16 %v4406_v45  ;;  %v4407_v41 = vunpack.i.l.bf16 %v4406_v45 }
 0x4f1   : > { %v2983_v5 = vsel %vm450_vm0, %v4407_v41, %v5473_v57  ;;  %v2982_v8 = vsel %vm450_vm0, %v4408_v9, %v5648_v20  ;;  %v4373_v20 = vunpack.i.h.bf16 %v4371_v6  ;;  %v4372_v9 = vunpack.i.l.bf16 %v4371_v6 }
 0x4f2   : > { %3097 = vmatpush.msrb.mxu2 %v2983_v5  ;;  %v2966_v41 = vsel %vm450_vm0, %v4393_v30, %v5699_v2  ;;  %v4363_v5 = vunpack.i.h.bf16 %v4361_v0  ;;  %v4352_v6 = vunpack.i.l.bf16 %v4351_v39  ;;  %v1644_v30 = vmul.f32 %v5753_v53, %v5823_v22 }
 0x4f3   : > { %v2964_v2 = vsel %vm450_vm0, %v4373_v20, %v5710_v61  ;;  %v2978_v18 = vsel %vm450_vm0, %v4372_v9, %v5712_v31 }
 0x4f4   : > { %3098 = vmatpush.msrb.mxu2 %v2982_v8  ;;  %v4362_v8 = vunpack.i.l.bf16 %v4361_v0  ;;  %v2976_v31 = vsel %vm450_vm0, %v4352_v6, %v5723_v33  ;;  %v4368_v6 = vunpack.i.h.bf16 %v5853_v59 }
 0x506   : > { %v4411_v36 = vpop.permute.xlu1 %4410 }
 0x507   : > { %v4413_v10 = vunpack.i.h.bf16 %v4411_v36  ;;  %v4412_v28 = vunpack.i.l.bf16 %v4411_v36 }
 0x509   : > { %v2967_v45 = vsel %vm450_vm0, %v4413_v10, %v5688_v4  ;;  %v2981_v57 = vsel %vm450_vm0, %v4412_v28, %v5620_v19  ;;  %v2965_v10 = vsel %vm450_vm0, %v4383_v15, %v5707_v7  ;;  %v2979_v28 = vsel %vm450_vm0, %v4382_v3, %v5705_v56  ;;  %v5875_v56 = vpop.permute.xlu0 %4345 }
 0x50a   : > { %2984 = vmatpush.msrb.mxu1 %v2967_v45  ;;  %3099 = vmatpush.msrb.mxu2 %v2981_v57  ;;  %v4353_v4 = vunpack.i.h.bf16 %v4351_v39  ;;  %v2963_v15 = vsel %vm450_vm0, %v4363_v5, %v5714_v52  ;;  %v2977_v3 = vsel %vm450_vm0, %v4362_v8, %v5716_v16  ;;  %v4398_v7 = vunpack.i.h.bf16 %v4396_v58 }
 0x50b   : > { %v4397_v39 = vunpack.i.l.bf16 %v4396_v58 }
 0x50c   : > { %2985 = vmatpush.msrb.mxu1 %v2966_v41  ;;  %3100 = vmatpush.msrb.mxu2 %v2980_v1  ;;  %v2962_v61 = vsel %vm450_vm0, %v4353_v4, %v5718_v23  ;;  %v2960_v36 = vsel %vm450_vm0, %v4398_v7, %v5742_v51 }
 0x50d   : > { %v2974_v58 = vsel %vm450_vm0, %v4397_v39, %v5725_v37 }
 0x50e   : > { %2986 = vmatpush.msrb.mxu1 %v2965_v10  ;;  %3101 = vmatpush.msrb.mxu2 %v2979_v28  ;;  %v4416_v19 = vpop.permute.xlu1 %4415  ;;  %v4378_v10 = vunpack.i.h.bf16 %v5847_v11  ;;  %v4377_v28 = vunpack.i.l.bf16 %v5847_v11  ;;  %v4358_v11 = vunpack.i.h.bf16 %v5844_v25 }
 0x50f   : > { %v4418_v0 = vunpack.i.h.bf16 %v4416_v19  ;;  %v4417_v38 = vunpack.i.l.bf16 %v4416_v19 }
 0x510   : > { %2987 = vmatpush.msrb.mxu1 %v2964_v2  ;;  %3102 = vmatpush.msrb.mxu2 %v2978_v18  ;;  %v2970_v18 = vsel %vm450_vm0, %v4377_v28, %v5760_v21  ;;  %v7523_v28 = vld [vmem:[#allocation11_spill] sm:$0xff] }
 0x511   : > { %v2961_v52 = vsel %vm450_vm0, %v4418_v0, %v5834_v14  ;;  %v2975_v16 = vsel %vm450_vm0, %v4417_v38, %v5732_v42  ;;  %v4386_v23 = vpop.permute.xlu0 %4385  ;;  %v1658_v14 = vmul.f32 %v5734_v29, %v5791_v54 }
 0x512   : > { %2988 = vmatpush.msrb.mxu1 %v2963_v15  ;;  %3103 = vmatpush.msrb.mxu2 %v2977_v3  ;;  %v4388_v41 = vunpack.i.h.bf16 %v4386_v23  ;;  %v4387_v1 = vunpack.i.l.bf16 %v4386_v23  ;;  %v1416_v3 = vld [vmem:[%s7463_s8 + $0x38] sm:$0xff]  ;;  %v1410_v23 = vld [vmem:[%s7463_s8 + $0x8] sm:$0xff] }
 0x513   : > { %v4419_v42 = vpack.i.bf16 %v1644_v30, %v1658_v14  ;;  %v1409_v30 = vld [vmem:[%s7463_s8] sm:$0xff] }
 0x514   : > { %2989 = vmatpush.msrb.mxu1 %v2962_v61  ;;  %3104 = vmatpush.msrb.mxu2 %v2976_v31  ;;  %v2971_v2 = vsel %vm450_vm0, %v4387_v1, %v5755_v26  ;;  %v1412_v31 = vld [vmem:[%s7463_s8 + $0x18] sm:$0xff] }
 0x516   : > { %2990 = vmatpush.msrb.mxu1 %v2961_v52  ;;  %3105 = vmatpush.msrb.mxu2 %v2975_v16  ;;  %v1411_v16 = vld [vmem:[%s7463_s8 + $0x10] sm:$0xff] }
 0x518   : > { %2991 = vmatpush.msrb.mxu1 %v2960_v36  ;;  %3106 = vmatpush.msrb.mxu2 %v2974_v58 }
 0x519   : > { %v4401_v33 = vpop.permute.xlu0 %4400 }
 0x51a   : > { %v4403_v45 = vunpack.i.h.bf16 %v4401_v33  ;;  %v4402_v57 = vunpack.i.l.bf16 %v4401_v33 }
 0x51c   : > { %v2958_v19 = vsel %vm450_vm0, %v4403_v45, %v5758_v46  ;;  %v2972_v4 = vsel %vm450_vm0, %v4402_v57, %v5744_v17  ;;  %v4357_v46 = vunpack.i.l.bf16 %v5844_v25  ;;  %v2956_v17 = vsel %vm450_vm0, %v4378_v10, %v5766_v27 }
 0x51d   : > { %v4348_v25 = vunpack.i.h.bf16 %v5875_v56  ;;  %v2954_v27 = vsel %vm450_vm0, %v4358_v11, %v5784_v24  ;;  %v1415_v24 = vld [vmem:[%s7463_s8 + $0x30] sm:$0xff] }
 0x51e   : > { %v2968_v21 = vsel %vm450_vm0, %v4357_v46, %v5768_v13 }
 0x52b   : > { %v5893_v32 = vpop.trf.xlu0 }
 0x52c   : > { %1485 = vrot.lane.b32.xlu2 %v5893_v32, %s4775_s24 }
 0x52d   : > { %4420 = vrot.lane.b32.xlu0 %v4419_v42, %s4776_s15 }
 0x533   : > { %v5898_v51 = vpop.trf.xlu0 }
 0x534   : > { %1487 = vrot.lane.b32.xlu1 %v5898_v51, %s4775_s24 }
 0x53b   : > { %v1467_v37 = vpop.trf.xlu0 }
 0x53c   : > { %1489 = vrot.lane.b32.xlu2 %v1467_v37, %s4775_s24 }
 0x543   : > { %v1468_v22 = vpop.trf.xlu0 }
 0x544   : > { %1491 = vrot.lane.b32.xlu1 %v1468_v22, %s4775_s24 }
 0x586   : > { %v1486_v0 = vpop.permute.xlu2 %1485 }
 0x587   : > { %v1497_v33 = vsel %vm1054_vm1, %v5893_v32, %v1486_v0 }
 0x596   : > { %v1490_v15 = vpop.permute.xlu2 %1489 }
 0x59f   : > { %v4421_v54 = vpop.permute.xlu0 %4420 }
 0x5a0   : > { %v4423_v20 = vunpack.i.h.bf16 %v4421_v54  ;;  %v4422_v9 = vunpack.i.l.bf16 %v4421_v54 }
 0x5a2   : > { %v2959_v5 = vsel %vm450_vm0, %v4423_v20, %v5753_v53  ;;  %v2973_v8 = vsel %vm450_vm0, %v4422_v9, %v5734_v29  ;;  %v4367_v53 = vunpack.i.l.bf16 %v5853_v59  ;;  %v2957_v29 = vsel %vm450_vm0, %v4388_v41, %v5762_v43  ;;  %v7522_v9 = vld [vmem:[#allocation10_spill] sm:$0xff] }
 0x5a3   : > { %2992 = vmatpush.msrb.mxu1 %v2959_v5  ;;  %3107 = vmatpush.msrb.mxu2 %v2973_v8  ;;  %v4347_v59 = vunpack.i.l.bf16 %v5875_v56  ;;  %v2955_v43 = vsel %vm450_vm0, %v4368_v6, %v5770_v12  ;;  %v1414_v56 = vld [vmem:[%s7463_s8 + $0x28] sm:$0xff] }
 0x5a4   : > { %v2969_v26 = vsel %vm450_vm0, %v4367_v53, %v5764_v60  ;;  %v2952_v60 = vsel %vm450_vm0, %v4348_v25, %v5465_v49  ;;  %v1413_v49 = vld [vmem:[%s7463_s8 + $0x20] sm:$0xff] }
 0x5a5   : > { %2993 = vmatpush.msrb.mxu1 %v2958_v19  ;;  %3108 = vmatpush.msrb.mxu2 %v2972_v4  ;;  %v2953_v12 = vsel %vm450_vm0, %v4347_v59, %v5776_v63  ;;  %v1499_v63 = vsel %vm1054_vm1, %v1467_v37, %v1490_v15  ;;  %v1501_v37 = vmul.f32 %v1497_v33, %v1409_v30 }
 0x5a6   : > { %v1488_v38 = vpop.permute.xlu1 %1487  ;;  %v1506_v36 = vmul.f32 %v1499_v63, %v1414_v56  ;;  %v1505_v58 = vmul.f32 %v1499_v63, %v1413_v49 }
 0x5a7   : > { %2994 = vmatpush.msrb.mxu1 %v2957_v29  ;;  %3109 = vmatpush.msrb.mxu2 %v2971_v2  ;;  %v1498_v52 = vsel %vm1054_vm1, %v5898_v51, %v1488_v38  ;;  %v1502_v51 = vmul.f32 %v1497_v33, %v1410_v23  ;;  %v7524_v2 = vld [vmem:[#allocation12_spill] sm:$0xff]  ;;  %v7526_v38 = vld [vmem:[#allocation14_spill] sm:$0xff] }
 0x5a8   : > { %v1504_v14 = vmul.f32 %v1498_v52, %v1412_v31  ;;  %v1503_v42 = vmul.f32 %v1498_v52, %v1411_v16 }
 0x5a9   : > { %2995 = vmatpush.msrb.mxu1 %v2956_v17  ;;  %3110 = vmatpush.msrb.mxu2 %v2970_v18 }
 0x5ab   : > { %2996 = vmatpush.msrb.mxu1 %v2955_v43  ;;  %3111 = vmatpush.msrb.mxu2 %v2969_v26  ;;  %v7525_v43 = vld [vmem:[#allocation13_spill] sm:$0xff] }
 0x5ad   : > { %2997 = vmatpush.msrb.mxu1 %v2954_v27  ;;  %3112 = vmatpush.msrb.mxu2 %v2968_v21 }
 0x5af   : > { %2998 = vmatpush.msrb.mxu1 %v2953_v12 }
 0x5b1   : > { %2999 = vmatpush.msrb.mxu1 %v2952_v60 }
 0x5b6   : > { %v1492_v13 = vpop.permute.xlu1 %1491 }
 0x5b7   : > { %v1500_v7 = vsel %vm1054_vm1, %v1468_v22, %v1492_v13  ;;  %v7521_v22 = vld [vmem:[#allocation9_spill] sm:$0xff]  ;;  %v7527_v13 = vld [vmem:[#allocation15_spill] sm:$0xff] }
 0x5b8   : > { %v1508_v39 = vmul.f32 %v1500_v7, %v1416_v3  ;;  %v1507_v61 = vmul.f32 %v1500_v7, %v1415_v24 }
 0x5ba   : > { %1777 = vmatpush.msrb.mxu3 %v1507_v61  ;;  %1890 = vmatpush.msra.mxu0 %v1508_v39  ;;  %v7528_v61 = vld [vmem:[#allocation16_spill] sm:$0xff] }
 0x5bc   : > { %1778 = vmatpush.msrb.mxu3 %v1505_v58  ;;  %1891 = vmatpush.msra.mxu0 %v1506_v36  ;;  %v7529_v58 = vld [vmem:[#allocation17_spill] sm:$0xff] }
 0x5be   : > { %1779 = vmatpush.msrb.mxu3 %v1503_v42  ;;  %1892 = vmatpush.msra.mxu0 %v1504_v14  ;;  %v7530_v42 = vld [vmem:[#allocation18_spill] sm:$0xff] }
 0x5c0   : > { %1780 = vmatpush.msrb.mxu3 %v1501_v37  ;;  %1893 = vmatpush.msra.mxu0 %v1502_v51 }
 0x5c1   : > { %4171 = vmatmul.msk.f32.vlgmr.msrb.gmra.mxu3 %vm450_vm0, %v5269_v34  ;;  %4203 = vmatmul.msk.f32.vlgmr.msra.gmra.mxu0 %vm450_vm0, %v5269_v34  ;;  %v7514_v34 = vld [vmem:[#allocation2_spill] sm:$0xff] }
 0x5c9   : > { %4172 = vmatmul.msk.f32.gmra.mxu3 %vm450_vm0, %v5273_v40  ;;  %4204 = vmatmul.msk.f32.gmra.mxu0 %vm450_vm0, %v5273_v40  ;;  %v7515_v40 = vld [vmem:[#allocation3_spill] sm:$0xff] }
 0x5d1   : > { %4173 = vmatmul.msk.f32.gmra.mxu3 %vm450_vm0, %v5280_v44  ;;  %4205 = vmatmul.msk.f32.gmra.mxu0 %vm450_vm0, %v5280_v44  ;;  %v7516_v44 = vld [vmem:[#allocation4_spill] sm:$0xff] }
 0x5d9   : > { %4174 = vmatmul.msk.f32.gmra.mxu3 %vm450_vm0, %v5284_v47  ;;  %4206 = vmatmul.msk.f32.gmra.mxu0 %vm450_vm0, %v5284_v47  ;;  %v7517_v47 = vld [vmem:[#allocation5_spill] sm:$0xff] }
 0x5e1   : > { %4175 = vmatmul.msk.f32.gmra.mxu3 %vm450_vm0, %v5291_v48  ;;  %4207 = vmatmul.msk.f32.gmra.mxu0 %vm450_vm0, %v5291_v48  ;;  %v7518_v48 = vld [vmem:[#allocation6_spill] sm:$0xff] }
 0x5e9   : > { %4176 = vmatmul.msk.f32.gmra.mxu3 %vm450_vm0, %v5295_v50  ;;  %4208 = vmatmul.msk.f32.gmra.mxu0 %vm450_vm0, %v5295_v50  ;;  %v7519_v50 = vld [vmem:[#allocation7_spill] sm:$0xff] }
 0x5f1   : > { %4177 = vmatmul.msk.f32.gmra.mxu3 %vm450_vm0, %v5305_v55  ;;  %4209 = vmatmul.msk.f32.gmra.mxu0 %vm450_vm0, %v5305_v55  ;;  %v7520_v55 = vld [vmem:[#allocation8_spill] sm:$0xff] }
 0x5f9   : > { %4178 = vmatmul.msk.f32.gmra.mxu3 %vm450_vm0, %v5312_v62  ;;  %4210 = vmatmul.msk.f32.gmra.mxu0 %vm450_vm0, %v5312_v62 }
 0x601   : > { %4179 = vmatmul.msk.f32.gmra.mxu3 %vm450_vm0, %v5321_v35  ;;  %4211 = vmatmul.msk.f32.gmra.mxu0 %vm450_vm0, %v5321_v35 }
 0x609   : > { %4180 = vmatmul.msk.f32.gmra.mxu3 %vm450_vm0, %v7514_v34  ;;  %4212 = vmatmul.msk.f32.gmra.mxu0 %vm450_vm0, %v7514_v34 }
 0x611   : > { %4181 = vmatmul.msk.f32.gmra.mxu3 %vm450_vm0, %v7515_v40  ;;  %4213 = vmatmul.msk.f32.gmra.mxu0 %vm450_vm0, %v7515_v40 }
 0x619   : > { %4182 = vmatmul.msk.f32.gmra.mxu3 %vm450_vm0, %v7516_v44  ;;  %4214 = vmatmul.msk.f32.gmra.mxu0 %vm450_vm0, %v7516_v44 }
 0x621   : > { %4183 = vmatmul.msk.f32.gmra.mxu3 %vm450_vm0, %v7517_v47  ;;  %4215 = vmatmul.msk.f32.gmra.mxu0 %vm450_vm0, %v7517_v47  ;;  %v7531_v47 = vld [vmem:[#allocation19_spill] sm:$0xff] }
 0x629   : > { %4184 = vmatmul.msk.f32.gmra.mxu3 %vm450_vm0, %v7518_v48  ;;  %4216 = vmatmul.msk.f32.gmra.mxu0 %vm450_vm0, %v7518_v48 }
 0x631   : > { %4185 = vmatmul.msk.f32.gmra.mxu3 %vm450_vm0, %v7519_v50  ;;  %4217 = vmatmul.msk.f32.gmra.mxu0 %vm450_vm0, %v7519_v50 }
 0x639   : > { %4186 = vmatmul.msk.f32.gmra.mxu3 %vm450_vm0, %v7520_v55  ;;  %4218 = vmatmul.msk.f32.gmra.mxu0 %vm450_vm0, %v7520_v55 }
 0x63e   : > { %v6034_v62 = vpop.f32.mrf.mxu0 }
 0x63f   : > { %v2568_v35 = vsel %vm2183_vm14, %v6034_v62, -inf  ;;  %v2376_v32 = vsel %vm1054_vm1, %v6034_v62, -inf }
 0x640   : > { %2569 = vmax.xlane.f32.xlu2 %v2568_v35  ;;  %2377 = vmax.xlane.f32.xlu1 %v2376_v32 }
 0x641   : > { %4187 = vmatmul.msk.f32.gmra.mxu3 %vm450_vm0, %v7521_v22  ;;  %4219 = vmatmul.msk.f32.gmra.mxu0 %vm450_vm0, %v7521_v22  ;;  %v7532_v22 = vld [vmem:[#allocation20_spill] sm:$0xff] }
 0x644   : > { %v6044_v54 = vpop.f32.mrf.mxu3 }
 0x645   : > { %v1991_v45 = vsel %vm1054_vm1, %v6044_v54, -inf  ;;  %v2184_v20 = vsel %vm2183_vm14, %v6044_v54, -inf }
 0x646   : > { %v6048_v57 = vpop.f32.mrf.mxu0  ;;  %1992 = vmax.xlane.f32.xlu0 %v1991_v45 }
 0x647   : > { %v2379_v10 = vsel %vm1054_vm1, %v6048_v57, -inf  ;;  %v2571_v29 = vsel %vm2183_vm14, %v6048_v57, -inf }
 0x648   : > { %2185 = vmax.xlane.f32.xlu1 %v2184_v20 }
 0x649   : > { %4188 = vmatmul.msk.f32.gmra.mxu3 %vm450_vm0, %v7522_v9  ;;  %4220 = vmatmul.msk.f32.gmra.mxu0 %vm450_vm0, %v7522_v9 }
 0x64c   : > { %v6056_v41 = vpop.f32.mrf.mxu3 }
 0x64d   : > { %v2187_v1 = vsel %vm2183_vm14, %v6056_v41, -inf  ;;  %v1994_v5 = vsel %vm1054_vm1, %v6056_v41, -inf }
 0x64e   : > { %v6062_v8 = vpop.f32.mrf.mxu0  ;;  %2188 = vmax.xlane.f32.xlu0 %v2187_v1  ;;  %1995 = vmax.xlane.f32.xlu2 %v1994_v5 }
 0x64f   : > { %v2574_v4 = vsel %vm2183_vm14, %v6062_v8, -inf  ;;  %v2382_v18 = vsel %vm1054_vm1, %v6062_v8, -inf }
 0x650   : > { %2380 = vmax.xlane.f32.xlu1 %v2379_v10  ;;  %v7533_v10 = vld [vmem:[#allocation21_spill] sm:$0xff] }
 0x651   : > { %4189 = vmatmul.msk.f32.gmra.mxu3 %vm450_vm0, %v7523_v28  ;;  %4221 = vmatmul.msk.f32.gmra.mxu0 %vm450_vm0, %v7523_v28 }
 0x654   : > { %v6070_v19 = vpop.f32.mrf.mxu3 }
 0x655   : > { %v1997_v6 = vsel %vm1054_vm1, %v6070_v19, -inf  ;;  %v2190_v46 = vsel %vm2183_vm14, %v6070_v19, -inf }
 0x656   : > { %v6076_v53 = vpop.f32.mrf.mxu0  ;;  %2575 = vmax.xlane.f32.xlu0 %v2574_v4  ;;  %1998 = vmax.xlane.f32.xlu2 %v1997_v6 }
 0x657   : > { %v2577_v25 = vsel %vm2183_vm14, %v6076_v53, -inf  ;;  %v2385_v27 = vsel %vm1054_vm1, %v6076_v53, -inf }
 0x658   : > { %2572 = vmax.xlane.f32.xlu1 %v2571_v29 }
 0x659   : > { %4190 = vmatmul.msk.f32.gmra.mxu3 %vm450_vm0, %v7524_v2  ;;  %4222 = vmatmul.msk.f32.gmra.mxu0 %vm450_vm0, %v7524_v2  ;;  %v7534_v2 = vld [vmem:[#allocation22_spill] sm:$0xff] }
 0x65c   : > { %v6084_v11 = vpop.f32.mrf.mxu3 }
 0x65d   : > { %v2193_v60 = vsel %vm2183_vm14, %v6084_v11, -inf  ;;  %v2000_v3 = vsel %vm1054_vm1, %v6084_v11, -inf }
 0x65e   : > { %v6088_v17 = vpop.f32.mrf.mxu0  ;;  %2191 = vmax.xlane.f32.xlu2 %v2190_v46 }
 0x65f   : > { %v2580_v59 = vsel %vm2183_vm14, %v6088_v17, -inf  ;;  %v2388_v7 = vsel %vm1054_vm1, %v6088_v17, -inf }
 0x660   : > { %2383 = vmax.xlane.f32.xlu1 %v2382_v18  ;;  %2581 = vmax.xlane.f32.xlu0 %v2580_v59 }
 0x661   : > { %4191 = vmatmul.msk.f32.gmra.mxu3 %vm450_vm0, %v7525_v43  ;;  %4223 = vmatmul.msk.f32.gmra.mxu0 %vm450_vm0, %v7525_v43 }
 0x664   : > { %v6098_v26 = vpop.f32.mrf.mxu3 }
 0x665   : > { %v2003_v63 = vsel %vm1054_vm1, %v6098_v26, -inf  ;;  %v2196_v52 = vsel %vm2183_vm14, %v6098_v26, -inf }
 0x666   : > { %v6102_v0 = vpop.f32.mrf.mxu0  ;;  %2578 = vmax.xlane.f32.xlu2 %v2577_v25  ;;  %v7535_v25 = vld [vmem:[#allocation23_spill] sm:$0xff] }
 0x667   : > { %v2391_v21 = vsel %vm1054_vm1, %v6102_v0, -inf  ;;  %v2583_v31 = vsel %vm2183_vm14, %v6102_v0, -inf }
 0x668   : > { %2386 = vmax.xlane.f32.xlu1 %v2385_v27  ;;  %2392 = vmax.xlane.f32.xlu0 %v2391_v21 }
 0x669   : > { %4192 = vmatmul.msk.f32.gmra.mxu3 %vm450_vm0, %v7526_v38  ;;  %4224 = vmatmul.msk.f32.gmra.mxu0 %vm450_vm0, %v7526_v38 }
 0x66c   : > { %v6112_v12 = vpop.f32.mrf.mxu3 }
 0x66d   : > { %v2199_v24 = vsel %vm2183_vm14, %v6112_v12, -inf  ;;  %v2006_v30 = vsel %vm1054_vm1, %v6112_v12, -inf }
 0x66e   : > { %v6116_v15 = vpop.f32.mrf.mxu0  ;;  %2194 = vmax.xlane.f32.xlu2 %v2193_v60 }
 0x66f   : > { %v2394_v33 = vsel %vm1054_vm1, %v6116_v15, -inf  ;;  %v2586_v40 = vsel %vm2183_vm14, %v6116_v15, -inf }
 0x670   : > { %2001 = vmax.xlane.f32.xlu1 %v2000_v3  ;;  %2200 = vmax.xlane.f32.xlu0 %v2199_v24 }
 0x671   : > { %4193 = vmatmul.msk.f32.gmra.mxu3 %vm450_vm0, %v7527_v13  ;;  %4225 = vmatmul.msk.f32.gmra.mxu0 %vm450_vm0, %v7527_v13 }
 0x674   : > { %v6126_v56 = vpop.f32.mrf.mxu3 }
 0x675   : > { %v2009_v49 = vsel %vm1054_vm1, %v6126_v56, -inf  ;;  %v2202_v34 = vsel %vm2183_vm14, %v6126_v56, -inf }
 0x676   : > { %2004 = vmax.xlane.f32.xlu2 %v2003_v63  ;;  %v6134_v39 = vpop.f32.mrf.mxu0 }
 0x677   : > { %v2589_v16 = vsel %vm2183_vm14, %v6134_v39, -inf  ;;  %v2397_v35 = vsel %vm1054_vm1, %v6134_v39, -inf }
 0x678   : > { %2389 = vmax.xlane.f32.xlu1 %v2388_v7  ;;  %2010 = vmax.xlane.f32.xlu0 %v2009_v49 }
 0x679   : > { %4194 = vmatmul.msk.f32.gmra.mxu3 %vm450_vm0, %v7528_v61  ;;  %4226 = vmatmul.msk.f32.gmra.mxu0 %vm450_vm0, %v7528_v61 }
 0x67c   : > { %v6146_v36 = vpop.f32.mrf.mxu3 }
 0x67d   : > { %v2012_v50 = vsel %vm1054_vm1, %v6146_v36, -inf  ;;  %v2205_v9 = vsel %vm2183_vm14, %v6146_v36, -inf }
 0x67e   : > { %2584 = vmax.xlane.f32.xlu2 %v2583_v31  ;;  %v6152_v23 = vpop.f32.mrf.mxu0  ;;  %v7536_v31 = vld [vmem:[#allocation24_spill] sm:$0xff] }
 0x67f   : > { %v2400_v14 = vsel %vm1054_vm1, %v6152_v23, -inf  ;;  %v2592_v45 = vsel %vm2183_vm14, %v6152_v23, -inf }
 0x680   : > { %2197 = vmax.xlane.f32.xlu1 %v2196_v52  ;;  %2590 = vmax.xlane.f32.xlu0 %v2589_v16 }
 0x681   : > { %4195 = vmatmul.msk.f32.gmra.mxu3 %vm450_vm0, %v7529_v58  ;;  %4227 = vmatmul.msk.f32.gmra.mxu0 %vm450_vm0, %v7529_v58 }
 0x684   : > { %v6164_v51 = vpop.f32.mrf.mxu3 }
 0x685   : > { %v2208_v44 = vsel %vm2183_vm14, %v6164_v51, -inf  ;;  %v2015_v4 = vsel %vm1054_vm1, %v6164_v51, -inf }
 0x686   : > { %2395 = vmax.xlane.f32.xlu2 %v2394_v33  ;;  %v6166_v37 = vpop.f32.mrf.mxu0 }
 0x687   : > { %v2403_v28 = vsel %vm1054_vm1, %v6166_v37, -inf  ;;  %v2595_v59 = vsel %vm2183_vm14, %v6166_v37, -inf }
 0x688   : > { %2007 = vmax.xlane.f32.xlu1 %v2006_v30  ;;  %2401 = vmax.xlane.f32.xlu0 %v2400_v14 }
 0x689   : > { %4196 = vmatmul.msk.f32.gmra.mxu3 %vm450_vm0, %v7530_v42  ;;  %4228 = vmatmul.msk.f32.gmra.mxu0 %vm450_vm0, %v7530_v42 }
 0x68c   : > { %v6178_v48 = vpop.f32.mrf.mxu3 }
 0x68d   : > { %v2018_v32 = vsel %vm1054_vm1, %v6178_v48, -inf  ;;  %v2211_v18 = vsel %vm2183_vm14, %v6178_v48, -inf }
 0x68e   : > { %2203 = vmax.xlane.f32.xlu2 %v2202_v34  ;;  %v6182_v55 = vpop.f32.mrf.mxu0 }
 0x68f   : > { %v2598_v1 = vsel %vm2183_vm14, %v6182_v55, -inf  ;;  %v2406_v49 = vsel %vm1054_vm1, %v6182_v55, -inf }
 0x690   : > { %2587 = vmax.xlane.f32.xlu1 %v2586_v40  ;;  %2209 = vmax.xlane.f32.xlu0 %v2208_v44 }
 0x691   : > { %4197 = vmatmul.msk.f32.gmra.mxu3 %vm450_vm0, %v7531_v47  ;;  %4229 = vmatmul.msk.f32.gmra.mxu0 %vm450_vm0, %v7531_v47 }
 0x694   : > { %v6194_v20 = vpop.f32.mrf.mxu3 }
 0x695   : > { %v2021_v13 = vsel %vm1054_vm1, %v6194_v20, -inf  ;;  %v2214_v47 = vsel %vm2183_vm14, %v6194_v20, -inf }
 0x696   : > { %2013 = vmax.xlane.f32.xlu2 %v2012_v50  ;;  %v6200_v5 = vpop.f32.mrf.mxu0 }
 0x697   : > { %v2409_v6 = vsel %vm1054_vm1, %v6200_v5, -inf  ;;  %v2601_v14 = vsel %vm2183_vm14, %v6200_v5, -inf }
 0x698   : > { %2398 = vmax.xlane.f32.xlu1 %v2397_v35  ;;  %2019 = vmax.xlane.f32.xlu0 %v2018_v32 }
 0x699   : > { %4198 = vmatmul.msk.f32.gmra.mxu3 %vm450_vm0, %v7532_v22  ;;  %4230 = vmatmul.msk.f32.gmra.mxu0 %vm450_vm0, %v7532_v22 }
 0x69c   : > { %v6212_v29 = vpop.f32.mrf.mxu3 }
 0x69d   : > { %v2217_v43 = vsel %vm2183_vm14, %v6212_v29, -inf }
 0x69e   : > { %2593 = vmax.xlane.f32.xlu2 %v2592_v45  ;;  %v6218_v46 = vpop.f32.mrf.mxu0 }
 0x6a0   : > { %2206 = vmax.xlane.f32.xlu1 %v2205_v9  ;;  %2599 = vmax.xlane.f32.xlu0 %v2598_v1 }
 0x6a1   : > { %4199 = vmatmul.msk.f32.gmra.mxu3 %vm450_vm0, %v7533_v10  ;;  %4231 = vmatmul.msk.f32.gmra.mxu0 %vm450_vm0, %v7533_v10 }
 0x6a4   : > { %v6230_v27 = vpop.f32.mrf.mxu3 }
 0x6a5   : > { %v2027_v61 = vsel %vm1054_vm1, %v6230_v27, -inf }
 0x6a6   : > { %2404 = vmax.xlane.f32.xlu2 %v2403_v28  ;;  %v6232_v60 = vpop.f32.mrf.mxu0 }
 0x6a7   : > { %v2607_v50 = vsel %vm2183_vm14, %v6232_v60, -inf }
 0x6a8   : > { %2016 = vmax.xlane.f32.xlu1 %v2015_v4  ;;  %2410 = vmax.xlane.f32.xlu0 %v2409_v6  ;;  %v2412_v4 = vsel %vm1054_vm1, %v6218_v46, -inf }
 0x6a9   : > { %4200 = vmatmul.msk.f32.gmra.mxu3 %vm450_vm0, %v7534_v2  ;;  %4232 = vmatmul.msk.f32.gmra.mxu0 %vm450_vm0, %v7534_v2 }
 0x6ac   : > { %v6247_v58 = vpop.f32.mrf.mxu3 }
 0x6ae   : > { %2212 = vmax.xlane.f32.xlu2 %v2211_v18  ;;  %v6252_v34 = vpop.f32.mrf.mxu0  ;;  %v2024_v18 = vsel %vm1054_vm1, %v6212_v29, -inf }
 0x6b0   : > { %2596 = vmax.xlane.f32.xlu1 %v2595_v59  ;;  %2218 = vmax.xlane.f32.xlu0 %v2217_v43 }
 0x6b1   : > { %4201 = vmatmul.msk.f32.gmra.mxu3 %vm450_vm0, %v7535_v25  ;;  %4233 = vmatmul.msk.f32.gmra.mxu0 %vm450_vm0, %v7535_v25 }
 0x6b3   : > { %v2570_v21 = vpop.xlane.xlu2 %2569  ;;  %v2378_v38 = vpop.xlane.xlu1 %2377 }
 0x6b4   : > { %v2664_v3 = vsub.f32 %v6034_v62, %v2570_v21  ;;  %v2472_v24 = vsub.f32 %v6034_v62, %v2378_v38  ;;  %v6263_v2 = vpop.f32.mrf.mxu3 }
 0x6b6   : > { %v2696_v63 = vmul.f32 1.442695, %v2664_v3  ;;  %v2504_v7 = vmul.f32 1.442695, %v2472_v24  ;;  %2022 = vmax.xlane.f32.xlu2 %v2021_v13  ;;  %v6271_v25 = vpop.f32.mrf.mxu0 }
 0x6b8   : > { %4446 = vpow2.f32 %v2696_v63  ;;  %2407 = vmax.xlane.f32.xlu1 %v2406_v49  ;;  %2028 = vmax.xlane.f32.xlu0 %v2027_v61  ;;  %v2220_v61 = vsel %vm2183_vm14, %v6230_v27, -inf }
 0x6b9   : > { %4448 = vpow2.f32 %v2504_v7  ;;  %4202 = vmatmul.msk.f32.gmra.mxu3 %vm450_vm0, %v7536_v31  ;;  %4234 = vmatmul.msk.f32.gmra.mxu0 %vm450_vm0, %v7536_v31  ;;  %v1993_v62 = vpop.xlane.xlu0 %1992 }
 0x6ba   : > { %v2087_v52 = vsub.f32 %v6044_v54, %v1993_v62 }
 0x6bb   : > { %v2186_v16 = vpop.xlane.xlu1 %2185 }
 0x6bc   : > { %v2119_v33 = vmul.f32 1.442695, %v2087_v52  ;;  %v2280_v30 = vsub.f32 %v6044_v54, %v2186_v16  ;;  %v2604_v52 = vsel %vm2183_vm14, %v6218_v46, -inf  ;;  %v2226_v16 = vsel %vm2183_vm14, %v6263_v2, -inf }
 0x6be   : > { %v4447_v42 = vpop.eup %4446  ;;  %v2312_v40 = vmul.f32 1.442695, %v2280_v30  ;;  %2602 = vmax.xlane.f32.xlu2 %v2601_v14  ;;  %4450 = vpow2.f32 %v2119_v33  ;;  %v6282_v33 = vpop.f32.mrf.mxu3 }
 0x6bf   : > { %v4449_v44 = vpop.eup %4448 }
 0x6c0   : > { %4452 = vpow2.f32 %v2312_v40  ;;  %2215 = vmax.xlane.f32.xlu1 %v2214_v47  ;;  %2608 = vmax.xlane.f32.xlu0 %v2607_v50  ;;  %v2792_v54 = vsel %vm1054_vm1, %v4449_v44, %v4447_v42  ;;  %v6285_v42 = vpop.f32.mrf.mxu0 }
 0x6c1   : > { %3113 = vmatmul.f32.vlgmr.msrb.gmra.mxu2 %v2792_v54  ;;  %v1996_v35 = vpop.xlane.xlu2 %1995  ;;  %v2189_v32 = vpop.xlane.xlu0 %2188 }
 0x6c2   : > { %v2088_v22 = vsub.f32 %v6056_v41, %v1996_v35  ;;  %v2281_v45 = vsub.f32 %v6056_v41, %v2189_v32  ;;  %v2418_v41 = vsel %vm1054_vm1, %v6252_v34, -inf }
 0x6c3   : > { %v2381_v9 = vpop.xlane.xlu1 %2380 }
 0x6c4   : > { %v2121_v1 = vmul.f32 1.442695, %v2088_v22  ;;  %v2314_v10 = vmul.f32 1.442695, %v2281_v45  ;;  %v4451_v28 = vpop.eup %4450  ;;  %v2473_v59 = vsub.f32 %v6048_v57, %v2381_v9  ;;  %v2030_v22 = vsel %vm1054_vm1, %v6247_v58, -inf }
 0x6c6   : > { %v4453_v6 = vpop.eup %4452  ;;  %4454 = vpow2.f32 %v2121_v1  ;;  %2413 = vmax.xlane.f32.xlu2 %v2412_v4  ;;  %v2506_v38 = vmul.f32 1.442695, %v2473_v59  ;;  %v2036_v1 = vsel %vm1054_vm1, %v6282_v33, -inf }
 0x6c7   : > { %4456 = vpow2.f32 %v2314_v10  ;;  %v2760_v43 = vsel %vm1054_vm1, %v4451_v28, %v4453_v6  ;;  %v6298_v28 = vpop.f32.mrf.mxu3 }
 0x6c8   : > { %2025 = vmax.xlane.f32.xlu1 %v2024_v18  ;;  %2419 = vmax.xlane.f32.xlu0 %v2418_v41  ;;  %4458 = vpow2.f32 %v2506_v38 }
 0x6c9   : > { %3000 = vmatmul.f32.vlgmr.msrb.gmra.mxu1 %v2760_v43  ;;  %v1999_v21 = vpop.xlane.xlu2 %1998  ;;  %v2576_v3 = vpop.xlane.xlu0 %2575 }
 0x6ca   : > { %v2089_v49 = vsub.f32 %v6070_v19, %v1999_v21  ;;  %v2666_v62 = vsub.f32 %v6062_v8, %v2576_v3  ;;  %v6303_v43 = vpop.f32.mrf.mxu0 }
 0x6cb   : > { %v2573_v24 = vpop.xlane.xlu1 %2572 }
 0x6cc   : > { %v4455_v13 = vpop.eup %4454  ;;  %v2665_v63 = vsub.f32 %v6048_v57, %v2573_v24  ;;  %v2123_v30 = vmul.f32 1.442695, %v2089_v49  ;;  %v2700_v44 = vmul.f32 1.442695, %v2666_v62  ;;  %v2610_v24 = vsel %vm2183_vm14, %v6252_v34, -inf }
 0x6cd   : > { %v4457_v7 = vpop.eup %4456  ;;  %v2223_v49 = vsel %vm2183_vm14, %v6247_v58, -inf }
 0x6ce   : > { %v2698_v31 = vmul.f32 1.442695, %v2665_v63  ;;  %2221 = vmax.xlane.f32.xlu2 %v2220_v61  ;;  %v2761_v57 = vsel %vm1054_vm1, %v4455_v13, %v4457_v7  ;;  %v4459_v32 = vpop.eup %4458  ;;  %v2616_v61 = vsel %vm2183_vm14, %v6285_v42, -inf }
 0x6d0   : > { %4460 = vpow2.f32 %v2698_v31  ;;  %2605 = vmax.xlane.f32.xlu1 %v2604_v52  ;;  %2227 = vmax.xlane.f32.xlu0 %v2226_v16 }
 0x6d1   : > { %3003 = vmatmul.f32.gmra.mxu1 %v2761_v57  ;;  %v2192_v14 = vpop.xlane.xlu2 %2191  ;;  %4462 = vpow2.f32 %v2123_v30  ;;  %v6317_v57 = vpop.f32.mrf.mxu3 }
 0x6d2   : > { %v2282_v40 = vsub.f32 %v6070_v19, %v2192_v14  ;;  %v2415_v19 = vsel %vm1054_vm1, %v6232_v60, -inf }
 0x6d3   : > { %v2384_v47 = vpop.xlane.xlu1 %2383  ;;  %v6288_v50 = vpop.xlane.xlu0 %2581 }
 0x6d4   : > { %v2316_v54 = vmul.f32 1.442695, %v2282_v40  ;;  %v2474_v35 = vsub.f32 %v6062_v8, %v2384_v47 }
 0x6d6   : > { %v4461_v45 = vpop.eup %4460  ;;  %4464 = vpow2.f32 %v2316_v54  ;;  %v2508_v9 = vmul.f32 1.442695, %v2474_v35  ;;  %2031 = vmax.xlane.f32.xlu2 %v2030_v22  ;;  %v6322_v54 = vpop.f32.mrf.mxu0  ;;  %v2668_v22 = vsub.f32 %v6088_v17, %v6288_v50  ;;  %v2229_v50 = vsel %vm2183_vm14, %v6282_v33, -inf }
 0x6d7   : > { %4466 = vpow2.f32 %v2700_v44  ;;  %v2793_v10 = vsel %vm1054_vm1, %v4459_v32, %v4461_v45  ;;  %v4463_v6 = vpop.eup %4462  ;;  %v2421_v44 = vsel %vm1054_vm1, %v6271_v25, -inf  ;;  %v2033_v32 = vsel %vm1054_vm1, %v6263_v2, -inf }
 0x6d8   : > { %4468 = vpow2.f32 %v2508_v9  ;;  %2416 = vmax.xlane.f32.xlu1 %v2415_v19  ;;  %2037 = vmax.xlane.f32.xlu0 %v2036_v1  ;;  %v2427_v45 = vsel %vm1054_vm1, %v6303_v43, -inf  ;;  %v2704_v19 = vmul.f32 1.442695, %v2668_v22 }
 0x6d9   : > { %3116 = vmatmul.f32.gmra.mxu2 %v2793_v10  ;;  %v2579_v8 = vpop.xlane.xlu2 %2578 }
 0x6da   : > { %v2667_v4 = vsub.f32 %v6076_v53, %v2579_v8 }
 0x6db   : > { %v2387_v18 = vpop.xlane.xlu1 %2386  ;;  %v6301_v59 = vpop.xlane.xlu0 %2392 }
 0x6dc   : > { %v4465_v41 = vpop.eup %4464  ;;  %v2702_v21 = vmul.f32 1.442695, %v2667_v4  ;;  %v2475_v38 = vsub.f32 %v6076_v53, %v2387_v18  ;;  %v6336_v18 = vpop.f32.mrf.mxu3 }
 0x6dd   : > { %v4467_v3 = vpop.eup %4466  ;;  %v2762_v13 = vsel %vm1054_vm1, %v4463_v6, %v4465_v41 }
 0x6de   : > { %v4469_v63 = vpop.eup %4468  ;;  %v2510_v7 = vmul.f32 1.442695, %v2475_v38  ;;  %2611 = vmax.xlane.f32.xlu2 %v2610_v24  ;;  %3006 = vmatmul.f32.gmra.mxu1 %v2762_v13  ;;  %4470 = vpow2.f32 %v2702_v21  ;;  %v2613_v38 = vsel %vm2183_vm14, %v6271_v25, -inf  ;;  %v6344_v24 = vpop.f32.mrf.mxu0  ;;  %v2477_v13 = vsub.f32 %v6102_v0, %v6301_v59 }
 0x6df   : > { %v2794_v31 = vsel %vm1054_vm1, %v4469_v63, %v4467_v3  ;;  %v2235_v3 = vsel %vm2183_vm14, %v6317_v57, -inf  ;;  %v2424_v59 = vsel %vm1054_vm1, %v6285_v42, -inf }
 0x6e0   : > { %4472 = vpow2.f32 %v2510_v7  ;;  %2224 = vmax.xlane.f32.xlu1 %v2223_v49  ;;  %2617 = vmax.xlane.f32.xlu0 %v2616_v61 }
 0x6e1   : > { %3119 = vmatmul.f32.gmra.mxu2 %v2794_v31  ;;  %v2195_v53 = vpop.xlane.xlu2 %2194 }
 0x6e2   : > { %v2283_v62 = vsub.f32 %v6084_v11, %v2195_v53 }
 0x6e3   : > { %v2002_v52 = vpop.xlane.xlu1 %2001  ;;  %v6315_v16 = vpop.xlane.xlu0 %2200 }
 0x6e4   : > { %v2318_v30 = vmul.f32 1.442695, %v2283_v62  ;;  %v2090_v14 = vsub.f32 %v6084_v11, %v2002_v52  ;;  %v4471_v40 = vpop.eup %4470 }
 0x6e6   : > { %v4473_v47 = vpop.eup %4472  ;;  %v2125_v35 = vmul.f32 1.442695, %v2090_v14  ;;  %2422 = vmax.xlane.f32.xlu2 %v2421_v44  ;;  %4474 = vpow2.f32 %v2318_v30  ;;  %v2514_v30 = vmul.f32 1.442695, %v2477_v13  ;;  %v2039_v14 = vsel %vm1054_vm1, %v6298_v28, -inf  ;;  %v6363_v22 = vpop.f32.mrf.mxu0 }
 0x6e7   : > { %v2795_v11 = vsel %vm1054_vm1, %v4473_v47, %v4471_v40  ;;  %v2045_v47 = vsel %vm1054_vm1, %v6336_v18, -inf }
 0x6e8   : > { %4476 = vpow2.f32 %v2125_v35  ;;  %2034 = vmax.xlane.f32.xlu1 %v2033_v32  ;;  %2428 = vmax.xlane.f32.xlu0 %v2427_v45  ;;  %v6361_v35 = vpop.f32.mrf.mxu3 }
 0x6e9   : > { %3122 = vmatmul.f32.gmra.mxu2 %v2795_v11  ;;  %v2005_v9 = vpop.xlane.xlu2 %2004  ;;  %4478 = vpow2.f32 %v2704_v19 }
 0x6ea   : > { %v2091_v41 = vsub.f32 %v6098_v26, %v2005_v9 }
 0x6eb   : > { %v2390_v1 = vpop.xlane.xlu1 %2389  ;;  %v6331_v10 = vpop.xlane.xlu0 %2010 }
 0x6ec   : > { %v2476_v8 = vsub.f32 %v6088_v17, %v2390_v1  ;;  %v4475_v4 = vpop.eup %4474  ;;  %v2127_v7 = vmul.f32 1.442695, %v2091_v41 }
 0x6ee   : > { %v4477_v6 = vpop.eup %4476  ;;  %v2512_v21 = vmul.f32 1.442695, %v2476_v8  ;;  %2230 = vmax.xlane.f32.xlu2 %v2229_v50  ;;  %v2619_v8 = vsel %vm2183_vm14, %v6303_v43, -inf }
 0x6ef   : > { %v2763_v17 = vsel %vm1054_vm1, %v4477_v6, %v4475_v4  ;;  %v4479_v52 = vpop.eup %4478 }
 0x6f0   : > { %4480 = vpow2.f32 %v2512_v21  ;;  %2614 = vmax.xlane.f32.xlu1 %v2613_v38  ;;  %2236 = vmax.xlane.f32.xlu0 %v2235_v3  ;;  %v2232_v21 = vsel %vm2183_vm14, %v6298_v28, -inf  ;;  %v2625_v38 = vsel %vm2183_vm14, %v6344_v24, -inf }
 0x6f1   : > { %3009 = vmatmul.f32.gmra.mxu1 %v2763_v17  ;;  %v2585_v63 = vpop.xlane.xlu2 %2584  ;;  %4482 = vpow2.f32 %v2127_v7  ;;  %v2093_v17 = vsub.f32 %v6126_v56, %v6331_v10  ;;  %v2430_v10 = vsel %vm1054_vm1, %v6322_v54, -inf }
 0x6f2   : > { %v2669_v49 = vsub.f32 %v6102_v0, %v2585_v63  ;;  %v2285_v0 = vsub.f32 %v6112_v12, %v6315_v16  ;;  %v6379_v63 = vpop.f32.mrf.mxu3 }
 0x6f3   : > { %v2198_v61 = vpop.xlane.xlu1 %2197  ;;  %v6349_v31 = vpop.xlane.xlu0 %2590 }
 0x6f4   : > { %v2706_v53 = vmul.f32 1.442695, %v2669_v49  ;;  %v2284_v62 = vsub.f32 %v6098_v26, %v2198_v61  ;;  %v2322_v45 = vmul.f32 1.442695, %v2285_v0  ;;  %v2671_v0 = vsub.f32 %v6134_v39, %v6349_v31 }
 0x6f6   : > { %v4481_v40 = vpop.eup %4480  ;;  %v2320_v44 = vmul.f32 1.442695, %v2284_v62  ;;  %2040 = vmax.xlane.f32.xlu2 %v2039_v14  ;;  %4484 = vpow2.f32 %v2706_v53  ;;  %v6384_v62 = vpop.f32.mrf.mxu0 }
 0x6f7   : > { %v2796_v26 = vsel %vm1054_vm1, %v4481_v40, %v4479_v52  ;;  %v4483_v16 = vpop.eup %4482  ;;  %v2131_v40 = vmul.f32 1.442695, %v2093_v17 }
 0x6f8   : > { %4486 = vpow2.f32 %v2320_v44  ;;  %2425 = vmax.xlane.f32.xlu1 %v2424_v59  ;;  %2046 = vmax.xlane.f32.xlu0 %v2045_v47  ;;  %v2436_v47 = vsel %vm1054_vm1, %v6363_v22, -inf }
 0x6f9   : > { %4488 = vpow2.f32 %v2514_v30  ;;  %3125 = vmatmul.f32.gmra.mxu2 %v2796_v26  ;;  %v2396_v32 = vpop.xlane.xlu2 %2395 }
 0x6fa   : > { %v2478_v50 = vsub.f32 %v6116_v15, %v2396_v32  ;;  %4490 = vpow2.f32 %v2322_v45  ;;  %v2710_v32 = vmul.f32 1.442695, %v2671_v0 }
 0x6fb   : > { %v2008_v11 = vpop.xlane.xlu1 %2007  ;;  %v6365_v9 = vpop.xlane.xlu0 %2401 }
 0x6fc   : > { %v2092_v19 = vsub.f32 %v6112_v12, %v2008_v11  ;;  %v4485_v1 = vpop.eup %4484  ;;  %v2516_v7 = vmul.f32 1.442695, %v2478_v50  ;;  %v2480_v17 = vsub.f32 %v6152_v23, %v6365_v9 }
 0x6fe   : > { %v4487_v4 = vpop.eup %4486  ;;  %v2129_v6 = vmul.f32 1.442695, %v2092_v19  ;;  %2620 = vmax.xlane.f32.xlu2 %v2619_v8  ;;  %v6398_v19 = vpop.f32.mrf.mxu3  ;;  %v2238_v8 = vsel %vm2183_vm14, %v6336_v18, -inf }
 0x6ff   : > { %v4489_v41 = vpop.eup %4488  ;;  %v2764_v3 = vsel %vm1054_vm1, %v4483_v16, %v4487_v4  ;;  %v6403_v50 = vpop.f32.mrf.mxu0 }
 0x700   : > { %4492 = vpow2.f32 %v2129_v6  ;;  %2233 = vmax.xlane.f32.xlu1 %v2232_v21  ;;  %2626 = vmax.xlane.f32.xlu0 %v2625_v38  ;;  %v2797_v12 = vsel %vm1054_vm1, %v4489_v41, %v4485_v1  ;;  %v4491_v14 = vpop.eup %4490  ;;  %v2622_v38 = vsel %vm2183_vm14, %v6322_v54, -inf }
 0x701   : > { %3012 = vmatmul.f32.gmra.mxu1 %v2764_v3  ;;  %3128 = vmatmul.f32.gmra.mxu2 %v2797_v12  ;;  %v2204_v13 = vpop.xlane.xlu2 %2203  ;;  %4494 = vpow2.f32 %v2516_v7  ;;  %v2244_v3 = vsel %vm2183_vm14, %v6379_v63, -inf }
 0x702   : > { %v2286_v49 = vsub.f32 %v6126_v56, %v2204_v13  ;;  %v2042_v56 = vsel %vm1054_vm1, %v6317_v57, -inf }
 0x703   : > { %v2588_v61 = vpop.xlane.xlu1 %2587  ;;  %v6382_v53 = vpop.xlane.xlu0 %2209 }
 0x704   : > { %v2324_v52 = vmul.f32 1.442695, %v2286_v49  ;;  %v2670_v30 = vsub.f32 %v6116_v15, %v2588_v61  ;;  %v2288_v0 = vsub.f32 %v6164_v51, %v6382_v53 }
 0x706   : > { %v4493_v44 = vpop.eup %4492  ;;  %v2708_v59 = vmul.f32 1.442695, %v2670_v30  ;;  %2431 = vmax.xlane.f32.xlu2 %v2430_v10  ;;  %4496 = vpow2.f32 %v2324_v52  ;;  %v2520_v10 = vmul.f32 1.442695, %v2480_v17 }
 0x707   : > { %v2765_v15 = vsel %vm1054_vm1, %v4493_v44, %v4491_v14  ;;  %v4495_v16 = vpop.eup %4494  ;;  %v2048_v44 = vsel %vm1054_vm1, %v6361_v35, -inf }
 0x708   : > { %4498 = vpow2.f32 %v2708_v59  ;;  %2043 = vmax.xlane.f32.xlu1 %v2042_v56  ;;  %2437 = vmax.xlane.f32.xlu0 %v2436_v47  ;;  %v6420_v56 = vpop.f32.mrf.mxu3 }
 0x709   : > { %4500 = vpow2.f32 %v2131_v40  ;;  %3015 = vmatmul.f32.gmra.mxu1 %v2765_v15  ;;  %v2014_v26 = vpop.xlane.xlu2 %2013  ;;  %v6429_v15 = vpop.f32.mrf.mxu0 }
 0x70a   : > { %v2094_v6 = vsub.f32 %v6146_v36, %v2014_v26  ;;  %4502 = vpow2.f32 %v2710_v32  ;;  %v2328_v32 = vmul.f32 1.442695, %v2288_v0  ;;  %v2051_v0 = vsel %vm1054_vm1, %v6379_v63, -inf }
 0x70b   : > { %v2399_v45 = vpop.xlane.xlu1 %2398  ;;  %v6396_v11 = vpop.xlane.xlu0 %2019 }
 0x70c   : > { %v2479_v31 = vsub.f32 %v6134_v39, %v2399_v45  ;;  %v4497_v1 = vpop.eup %4496  ;;  %v2133_v7 = vmul.f32 1.442695, %v2094_v6  ;;  %v2096_v17 = vsub.f32 %v6178_v48, %v6396_v11 }
 0x70e   : > { %v4499_v4 = vpop.eup %4498  ;;  %v2518_v41 = vmul.f32 1.442695, %v2479_v31  ;;  %2239 = vmax.xlane.f32.xlu2 %v2238_v8  ;;  %v2628_v8 = vsel %vm2183_vm14, %v6363_v22, -inf }
 0x70f   : > { %v4501_v21 = vpop.eup %4500  ;;  %v2798_v39 = vsel %vm1054_vm1, %v4495_v16, %v4499_v4 }
 0x710   : > { %4504 = vpow2.f32 %v2518_v41  ;;  %2623 = vmax.xlane.f32.xlu1 %v2622_v38  ;;  %2245 = vmax.xlane.f32.xlu0 %v2244_v3  ;;  %v2766_v12 = vsel %vm1054_vm1, %v4501_v21, %v4497_v1  ;;  %v4503_v40 = vpop.eup %4502  ;;  %v2241_v38 = vsel %vm2183_vm14, %v6361_v35, -inf  ;;  %v2634_v3 = vsel %vm2183_vm14, %v6403_v50, -inf }
 0x711   : > { %3018 = vmatmul.f32.gmra.mxu1 %v2766_v12  ;;  %3131 = vmatmul.f32.gmra.mxu2 %v2798_v39  ;;  %v2594_v13 = vpop.xlane.xlu2 %2593  ;;  %4506 = vpow2.f32 %v2133_v7  ;;  %v6447_v7 = vpop.f32.mrf.mxu0 }
 0x712   : > { %v2672_v49 = vsub.f32 %v6152_v23, %v2594_v13  ;;  %v2433_v23 = vsel %vm1054_vm1, %v6344_v24, -inf }
 0x713   : > { %v2207_v61 = vpop.xlane.xlu1 %2206  ;;  %v6415_v52 = vpop.xlane.xlu0 %2599 }
 0x714   : > { %v2712_v30 = vmul.f32 1.442695, %v2672_v49  ;;  %v2287_v14 = vsub.f32 %v6146_v36, %v2207_v61  ;;  %v2054_v36 = vsel %vm1054_vm1, %v6398_v19, -inf }
 0x716   : > { %v4505_v59 = vpop.eup %4504  ;;  %v2326_v9 = vmul.f32 1.442695, %v2287_v14  ;;  %2049 = vmax.xlane.f32.xlu2 %v2048_v44  ;;  %4508 = vpow2.f32 %v2712_v30 }
 0x717   : > { %v2799_v47 = vsel %vm1054_vm1, %v4505_v59, %v4503_v40  ;;  %v4507_v31 = vpop.eup %4506  ;;  %v2137_v59 = vmul.f32 1.442695, %v2096_v17 }
 0x718   : > { %4510 = vpow2.f32 %v2326_v9  ;;  %2434 = vmax.xlane.f32.xlu1 %v2433_v23  ;;  %2055 = vmax.xlane.f32.xlu0 %v2054_v36  ;;  %v2439_v9 = vsel %vm1054_vm1, %v6384_v62, -inf  ;;  %v2445_v36 = vsel %vm1054_vm1, %v6429_v15, -inf }
 0x719   : > { %4512 = vpow2.f32 %v2520_v10  ;;  %3134 = vmatmul.f32.gmra.mxu2 %v2799_v47  ;;  %v2405_v26 = vpop.xlane.xlu2 %2404 }
 0x71a   : > { %v2481_v6 = vsub.f32 %v6166_v37, %v2405_v26  ;;  %4514 = vpow2.f32 %v2328_v32 }
 0x71b   : > { %v2017_v45 = vpop.xlane.xlu1 %2016  ;;  %v6431_v16 = vpop.xlane.xlu0 %2410 }
 0x71c   : > { %v2095_v53 = vsub.f32 %v6164_v51, %v2017_v45  ;;  %v4509_v1 = vpop.eup %4508  ;;  %v6442_v51 = vpop.f32.mrf.mxu3  ;;  %v2522_v49 = vmul.f32 1.442695, %v2481_v6  ;;  %v2483_v17 = vsub.f32 %v6200_v5, %v6431_v16 }
 0x71e   : > { %v4511_v4 = vpop.eup %4510  ;;  %v2135_v41 = vmul.f32 1.442695, %v2095_v53  ;;  %2629 = vmax.xlane.f32.xlu2 %v2628_v8 }
 0x71f   : > { %v4513_v21 = vpop.eup %4512  ;;  %v2767_v39 = vsel %vm1054_vm1, %v4507_v31, %v4511_v4  ;;  %v2247_v4 = vsel %vm2183_vm14, %v6398_v19, -inf }
 0x720   : > { %4516 = vpow2.f32 %v2135_v41  ;;  %2242 = vmax.xlane.f32.xlu1 %v2241_v38  ;;  %2635 = vmax.xlane.f32.xlu0 %v2634_v3  ;;  %v2800_v12 = vsel %vm1054_vm1, %v4513_v21, %v4509_v1  ;;  %v4515_v44 = vpop.eup %4514  ;;  %v2631_v3 = vsel %vm2183_vm14, %v6384_v62, -inf }
 0x721   : > { %3021 = vmatmul.f32.gmra.mxu1 %v2767_v39  ;;  %3137 = vmatmul.f32.gmra.mxu2 %v2800_v12  ;;  %v2213_v13 = vpop.xlane.xlu2 %2212  ;;  %4518 = vpow2.f32 %v2522_v49  ;;  %v2060_v39 = vsel %vm1054_vm1, %v6442_v51, -inf }
 0x722   : > { %v2289_v61 = vsub.f32 %v6178_v48, %v2213_v13  ;;  %v2674_v48 = vsub.f32 %v6182_v55, %v6415_v52  ;;  %v6466_v52 = vpop.f32.mrf.mxu0 }
 0x723   : > { %v2597_v30 = vpop.xlane.xlu1 %2596  ;;  %v6450_v14 = vpop.xlane.xlu0 %2218 }
 0x724   : > { %v2330_v40 = vmul.f32 1.442695, %v2289_v61  ;;  %v2673_v10 = vsub.f32 %v6166_v37, %v2597_v30  ;;  %v6462_v26 = vpop.f32.mrf.mxu3  ;;  %v2716_v32 = vmul.f32 1.442695, %v2674_v48 }
 0x726   : > { %v4517_v11 = vpop.eup %4516  ;;  %v2714_v23 = vmul.f32 1.442695, %v2673_v10  ;;  %2440 = vmax.xlane.f32.xlu2 %v2439_v9  ;;  %4520 = vpow2.f32 %v2330_v40 }
 0x727   : > { %v2768_v37 = vsel %vm1054_vm1, %v4517_v11, %v4515_v44  ;;  %v4519_v53 = vpop.eup %4518  ;;  %v2526_v11 = vmul.f32 1.442695, %v2483_v17 }
 0x728   : > { %4522 = vpow2.f32 %v2714_v23  ;;  %2052 = vmax.xlane.f32.xlu1 %v2051_v0  ;;  %2446 = vmax.xlane.f32.xlu0 %v2445_v36  ;;  %v2057_v23 = vsel %vm1054_vm1, %v6420_v56, -inf  ;;  %v2291_v36 = vsub.f32 %v6212_v29, %v6450_v14 }
 0x729   : > { %4524 = vpow2.f32 %v2137_v59  ;;  %3024 = vmatmul.f32.gmra.mxu1 %v2768_v37  ;;  %v2023_v47 = vpop.xlane.xlu2 %2022 }
 0x72a   : > { %v2097_v41 = vsub.f32 %v6194_v20, %v2023_v47  ;;  %4526 = vpow2.f32 %v2716_v32  ;;  %v6488_v0 = vpop.f32.mrf.mxu0  ;;  %v2334_v32 = vmul.f32 1.442695, %v2291_v36  ;;  %v2256_v36 = vsel %vm2183_vm14, %v6462_v26, -inf }
 0x72b   : > { %v2408_v45 = vpop.xlane.xlu1 %2407  ;;  %v6464_v31 = vpop.xlane.xlu0 %2028 }
 0x72c   : > { %v2482_v1 = vsub.f32 %v6182_v55, %v2408_v45  ;;  %v4521_v8 = vpop.eup %4520  ;;  %v2139_v49 = vmul.f32 1.442695, %v2097_v41  ;;  %v6483_v10 = vpop.f32.mrf.mxu3 }
 0x72e   : > { %v4523_v6 = vpop.eup %4522  ;;  %v2524_v21 = vmul.f32 1.442695, %v2482_v1  ;;  %2248 = vmax.xlane.f32.xlu2 %v2247_v4  ;;  %v2637_v4 = vsel %vm2183_vm14, %v6429_v15, -inf }
 0x72f   : > { %v4525_v38 = vpop.eup %4524  ;;  %v2801_v12 = vsel %vm1054_vm1, %v4519_v53, %v4523_v6 }
 0x730   : > { %4528 = vpow2.f32 %v2524_v21  ;;  %2632 = vmax.xlane.f32.xlu1 %v2631_v3  ;;  %2061 = vmax.xlane.f32.xlu0 %v2060_v39  ;;  %v2769_v55 = vsel %vm1054_vm1, %v4525_v38, %v4521_v8  ;;  %v4527_v9 = vpop.eup %4526  ;;  %v2250_v39 = vsel %vm2183_vm14, %v6420_v56, -inf }
 0x731   : > { %3027 = vmatmul.f32.gmra.mxu1 %v2769_v55  ;;  %3140 = vmatmul.f32.gmra.mxu2 %v2801_v12  ;;  %v2603_v13 = vpop.xlane.xlu2 %2602  ;;  %4530 = vpow2.f32 %v2139_v49  ;;  %v2259_v12 = vsel %vm2183_vm14, %v6483_v10, -inf }
 0x732   : > { %v2675_v61 = vsub.f32 %v6200_v5, %v2603_v13  ;;  %v2442_v5 = vsel %vm1054_vm1, %v6403_v50, -inf  ;;  %v6510_v55 = vpop.f32.mrf.mxu0  ;;  %v2099_v13 = vsub.f32 %v6230_v27, %v6464_v31 }
 0x733   : > { %v2216_v30 = vpop.xlane.xlu1 %2215  ;;  %v6481_v40 = vpop.xlane.xlu0 %2608 }
 0x734   : > { %v2718_v44 = vmul.f32 1.442695, %v2675_v61  ;;  %v2290_v59 = vsub.f32 %v6194_v20, %v2216_v30  ;;  %v2448_v20 = vsel %vm1054_vm1, %v6447_v7, -inf  ;;  %v6502_v41 = vpop.f32.mrf.mxu3 }
 0x736   : > { %v4529_v16 = vpop.eup %4528  ;;  %v2332_v48 = vmul.f32 1.442695, %v2290_v59  ;;  %2058 = vmax.xlane.f32.xlu2 %v2057_v23  ;;  %4532 = vpow2.f32 %v2718_v44 }
 0x737   : > { %v2802_v37 = vsel %vm1054_vm1, %v4529_v16, %v4527_v9  ;;  %v4531_v1 = vpop.eup %4530  ;;  %v2143_v16 = vmul.f32 1.442695, %v2099_v13 }
 0x738   : > { %4534 = vpow2.f32 %v2332_v48  ;;  %2443 = vmax.xlane.f32.xlu1 %v2442_v5  ;;  %2449 = vmax.xlane.f32.xlu0 %v2448_v20  ;;  %v2253_v48 = vsel %vm2183_vm14, %v6442_v51, -inf  ;;  %v2649_v20 = vsel %vm2183_vm14, %v6510_v55, -inf }
 0x739   : > { %4536 = vpow2.f32 %v2526_v11  ;;  %3143 = vmatmul.f32.gmra.mxu2 %v2802_v37  ;;  %v2414_v47 = vpop.xlane.xlu2 %2413 }
 0x73a   : > { %v2484_v21 = vsub.f32 %v6218_v46, %v2414_v47  ;;  %4538 = vpow2.f32 %v2334_v32  ;;  %v6530_v32 = vpop.f32.mrf.mxu0 }
 0x73b   : > { %v2026_v45 = vpop.xlane.xlu1 %2025  ;;  %v6497_v53 = vpop.xlane.xlu0 %2419 }
 0x73c   : > { %v2098_v8 = vsub.f32 %v6212_v29, %v2026_v45  ;;  %v4533_v14 = vpop.eup %4532  ;;  %v2528_v61 = vmul.f32 1.442695, %v2484_v21  ;;  %v6528_v37 = vpop.f32.mrf.mxu3  ;;  %v2486_v13 = vsub.f32 %v6252_v34, %v6497_v53  ;;  %v2063_v53 = vsel %vm1054_vm1, %v6462_v26, -inf }
 0x73e   : > { %v4535_v6 = vpop.eup %4534  ;;  %v2141_v38 = vmul.f32 1.442695, %v2098_v8  ;;  %2638 = vmax.xlane.f32.xlu2 %v2637_v4 }
 0x73f   : > { %v4537_v3 = vpop.eup %4536  ;;  %v2770_v29 = vsel %vm1054_vm1, %v4531_v1, %v4535_v6  ;;  %v2640_v6 = vsel %vm2183_vm14, %v6447_v7, -inf }
 0x740   : > { %4540 = vpow2.f32 %v2141_v38  ;;  %2251 = vmax.xlane.f32.xlu1 %v2250_v39  ;;  %2260 = vmax.xlane.f32.xlu0 %v2259_v12  ;;  %v2803_v17 = vsel %vm1054_vm1, %v4537_v3, %v4533_v14  ;;  %v4539_v23 = vpop.eup %4538  ;;  %v2265_v12 = vsel %vm2183_vm14, %v6528_v37, -inf }
 0x741   : > { %3030 = vmatmul.f32.gmra.mxu1 %v2770_v29  ;;  %3146 = vmatmul.f32.gmra.mxu2 %v2803_v17  ;;  %v2222_v49 = vpop.xlane.xlu2 %2221  ;;  %4542 = vpow2.f32 %v2528_v61  ;;  %v2072_v29 = vsel %vm1054_vm1, %v6528_v37, -inf }
 0x742   : > { %v2292_v30 = vsub.f32 %v6230_v27, %v2222_v49  ;;  %v2677_v27 = vsub.f32 %v6232_v60, %v6481_v40 }
 0x743   : > { %v2606_v44 = vpop.xlane.xlu1 %2605  ;;  %v6516_v59 = vpop.xlane.xlu0 %2227 }
 0x744   : > { %v2336_v9 = vmul.f32 1.442695, %v2292_v30  ;;  %v2676_v11 = vsub.f32 %v6218_v46, %v2606_v44  ;;  %v2722_v45 = vmul.f32 1.442695, %v2677_v27  ;;  %v6546_v61 = vpop.f32.mrf.mxu3 }
 0x746   : > { %v4541_v5 = vpop.eup %4540  ;;  %v2720_v31 = vmul.f32 1.442695, %v2676_v11  ;;  %2254 = vmax.xlane.f32.xlu2 %v2253_v48  ;;  %4544 = vpow2.f32 %v2336_v9 }
 0x747   : > { %v2771_v46 = vsel %vm1054_vm1, %v4541_v5, %v4539_v23  ;;  %v4543_v40 = vpop.eup %4542  ;;  %v6551_v23 = vpop.f32.mrf.mxu0 }
 0x748   : > { %4546 = vpow2.f32 %v2720_v31  ;;  %2257 = vmax.xlane.f32.xlu1 %v2256_v36  ;;  %2650 = vmax.xlane.f32.xlu0 %v2649_v20  ;;  %v2532_v31 = vmul.f32 1.442695, %v2486_v13  ;;  %v2294_v20 = vsub.f32 %v6263_v2, %v6516_v59 }
 0x749   : > { %4548 = vpow2.f32 %v2143_v16  ;;  %3033 = vmatmul.f32.gmra.mxu1 %v2771_v46  ;;  %v2032_v47 = vpop.xlane.xlu2 %2031  ;;  %v2655_v46 = vsel %vm2183_vm14, %v6551_v23, -inf }
 0x74a   : > { %v2100_v38 = vsub.f32 %v6247_v58, %v2032_v47  ;;  %4550 = vpow2.f32 %v2722_v45  ;;  %v2340_v45 = vmul.f32 1.442695, %v2294_v20 }
 0x74b   : > { %v2417_v1 = vpop.xlane.xlu1 %2416  ;;  %v6532_v8 = vpop.xlane.xlu0 %2037 }
 0x74c   : > { %v2485_v14 = vsub.f32 %v6232_v60, %v2417_v1  ;;  %v4545_v4 = vpop.eup %4544  ;;  %v2145_v30 = vmul.f32 1.442695, %v2100_v38 }
 0x74e   : > { %v4547_v21 = vpop.eup %4546  ;;  %v2530_v3 = vmul.f32 1.442695, %v2485_v14  ;;  %2641 = vmax.xlane.f32.xlu2 %v2640_v6 }
 0x74f   : > { %v4549_v39 = vpop.eup %4548  ;;  %v2804_v17 = vsel %vm1054_vm1, %v4543_v40, %v4547_v21  ;;  %v2451_v21 = vsel %vm1054_vm1, %v6466_v52, -inf }
 0x750   : > { %4552 = vpow2.f32 %v2530_v3  ;;  %2266 = vmax.xlane.f32.xlu0 %v2265_v12  ;;  %2073 = vmax.xlane.f32.xlu1 %v2072_v29  ;;  %v2772_v60 = vsel %vm1054_vm1, %v4549_v39, %v4545_v4  ;;  %v4551_v5 = vpop.eup %4550  ;;  %v6565_v4 = vpop.f32.mrf.mxu3  ;;  %v2652_v29 = vsel %vm2183_vm14, %v6530_v32, -inf }
 0x751   : > { %3036 = vmatmul.f32.gmra.mxu1 %v2772_v60  ;;  %3149 = vmatmul.f32.gmra.mxu2 %v2804_v17  ;;  %v2612_v49 = vpop.xlane.xlu2 %2611  ;;  %4554 = vpow2.f32 %v2145_v30  ;;  %v2078_v17 = vsel %vm1054_vm1, %v6565_v4, -inf }
 0x752   : > { %v2678_v44 = vsub.f32 %v6252_v34, %v2612_v49  ;;  %v2460_v34 = vsel %vm1054_vm1, %v6530_v32, -inf  ;;  %v2102_v49 = vsub.f32 %v6282_v33, %v6532_v8 }
 0x753   : > { %v2225_v9 = vpop.xlane.xlu1 %2224  ;;  %v6549_v11 = vpop.xlane.xlu0 %2617 }
 0x754   : > { %v2724_v16 = vmul.f32 1.442695, %v2678_v44  ;;  %v2293_v48 = vsub.f32 %v6247_v58, %v2225_v9  ;;  %v6581_v44 = vpop.f32.mrf.mxu1 }
 0x756   : > { %v4553_v36 = vpop.eup %4552  ;;  %v2338_v27 = vmul.f32 1.442695, %v2293_v48  ;;  %2064 = vmax.xlane.f32.xlu2 %v2063_v53  ;;  %4556 = vpow2.f32 %v2724_v16 }
 0x757   : > { %v2805_v58 = vsel %vm1054_vm1, %v4553_v36, %v4551_v5  ;;  %v4555_v14 = vpop.eup %4554 }
 0x758   : > { %4558 = vpow2.f32 %v2338_v27  ;;  %2461 = vmax.xlane.f32.xlu0 %v2460_v34  ;;  %2656 = vmax.xlane.f32.xlu1 %v2655_v46  ;;  %v2149_v27 = vmul.f32 1.442695, %v2102_v49  ;;  %v2643_v34 = vsel %vm2183_vm14, %v6466_v52, -inf  ;;  %v2075_v46 = vsel %vm1054_vm1, %v6546_v61, -inf }
 0x759   : > { %4560 = vpow2.f32 %v2532_v31  ;;  %3152 = vmatmul.f32.gmra.mxu2 %v2805_v58  ;;  %v2423_v47 = vpop.xlane.xlu2 %2422  ;;  %v2271_v58 = vsel %vm2183_vm14, %v6565_v4, -inf }
 0x75a   : > { %v2487_v3 = vsub.f32 %v6271_v25, %v2423_v47  ;;  %4562 = vpow2.f32 %v2340_v45 }
 0x75b   : > { %v2035_v1 = vpop.xlane.xlu1 %2034  ;;  %v6563_v40 = vpop.xlane.xlu0 %2428 }
 0x75c   : > { %v2101_v59 = vsub.f32 %v6263_v2, %v2035_v1  ;;  %v4557_v6 = vpop.eup %4556  ;;  %v6576_v2 = vpop.f32.mrf.mxu2  ;;  %v2534_v9 = vmul.f32 1.442695, %v2487_v3 }
 0x75d   : > { %v6603_v3 = vpop.f32.mrf.mxu1 }
 0x75e   : > { %v4559_v38 = vpop.eup %4558  ;;  %v2147_v39 = vmul.f32 1.442695, %v2101_v59  ;;  %2452 = vmax.xlane.f32.xlu2 %v2451_v21 }
 0x75f   : > { %v4561_v12 = vpop.eup %4560  ;;  %v2773_v60 = vsel %vm1054_vm1, %v4555_v14, %v4559_v38 }
 0x760   : > { %4564 = vpow2.f32 %v2147_v39  ;;  %2653 = vmax.xlane.f32.xlu0 %v2652_v29  ;;  %2079 = vmax.xlane.f32.xlu1 %v2078_v17  ;;  %v2806_v13 = vsel %vm1054_vm1, %v4561_v12, %v4557_v6  ;;  %v4563_v36 = vpop.eup %4562  ;;  %v2066_v39 = vsel %vm1054_vm1, %v6483_v10, -inf }
 0x761   : > { %3039 = vmatmul.f32.gmra.mxu1 %v2773_v60  ;;  %3155 = vmatmul.f32.gmra.mxu2 %v2806_v13  ;;  %v2231_v30 = vpop.xlane.xlu2 %2230  ;;  %4566 = vpow2.f32 %v2534_v9  ;;  %v2463_v13 = vsel %vm1054_vm1, %v6551_v23, -inf  ;;  %v2489_v9 = vsub.f32 %v6303_v43, %v6563_v40  ;;  %v2454_v40 = vsel %vm1054_vm1, %v6488_v0, -inf }
 0x762   : > { %v2295_v16 = vsub.f32 %v6282_v33, %v2231_v30  ;;  %v2680_v33 = vsub.f32 %v6285_v42, %v6549_v11  ;;  %v6600_v11 = vpop.f32.mrf.mxu0 }
 0x763   : > { %v2615_v48 = vpop.xlane.xlu1 %2614  ;;  %v6584_v5 = vpop.xlane.xlu0 %2236  ;;  %v2658_v49 = vsel %vm2183_vm14, %v6600_v11, -inf }
 0x764   : > { %v2342_v31 = vmul.f32 1.442695, %v2295_v16  ;;  %v2679_v53 = vsub.f32 %v6271_v25, %v2615_v48  ;;  %v6596_v47 = vpop.f32.mrf.mxu2  ;;  %v2728_v1 = vmul.f32 1.442695, %v2680_v33  ;;  %v2538_v33 = vmul.f32 1.442695, %v2489_v9 }
 0x766   : > { %v4565_v8 = vpop.eup %4564  ;;  %v2726_v20 = vmul.f32 1.442695, %v2679_v53  ;;  %2644 = vmax.xlane.f32.xlu2 %v2643_v34  ;;  %4568 = vpow2.f32 %v2342_v31  ;;  %v6621_v34 = vpop.f32.mrf.mxu3 }
 0x767   : > { %v2774_v25 = vsel %vm1054_vm1, %v4565_v8, %v4563_v36  ;;  %v4567_v6 = vpop.eup %4566 }
 0x768   : > { %4570 = vpow2.f32 %v2726_v20  ;;  %2076 = vmax.xlane.f32.xlu0 %v2075_v46  ;;  %2272 = vmax.xlane.f32.xlu1 %v2271_v58  ;;  %v6624_v58 = vpop.f32.mrf.mxu1 }
 0x769   : > { %4572 = vpow2.f32 %v2149_v27  ;;  %3042 = vmatmul.f32.gmra.mxu1 %v2774_v25  ;;  %v2041_v45 = vpop.xlane.xlu2 %2040 }
 0x76a   : > { %v2103_v29 = vsub.f32 %v6298_v28, %v2041_v45  ;;  %4574 = vpow2.f32 %v2728_v1  ;;  %v2297_v1 = vsub.f32 %v6317_v57, %v6584_v5 }
 0x76b   : > { %v2426_v14 = vpop.xlane.xlu1 %2425  ;;  %v6598_v59 = vpop.xlane.xlu0 %2046 }
 0x76c   : > { %v2488_v21 = vsub.f32 %v6285_v42, %v2426_v14  ;;  %v4569_v38 = vpop.eup %4568  ;;  %v6616_v48 = vpop.f32.mrf.mxu2  ;;  %v2151_v31 = vmul.f32 1.442695, %v2103_v29 }
 0x76e   : > { %v4571_v12 = vpop.eup %4570  ;;  %v2536_v17 = vmul.f32 1.442695, %v2488_v21  ;;  %2067 = vmax.xlane.f32.xlu2 %v2066_v39  ;;  %v2346_v21 = vmul.f32 1.442695, %v2297_v1 }
 0x76f   : > { %v4573_v60 = vpop.eup %4572  ;;  %v2807_v42 = vsel %vm1054_vm1, %v4567_v6, %v4571_v12 }
 0x770   : > { %4576 = vpow2.f32 %v2536_v17  ;;  %2464 = vmax.xlane.f32.xlu0 %v2463_v13  ;;  %2659 = vmax.xlane.f32.xlu1 %v2658_v49  ;;  %v2775_v30 = vsel %vm1054_vm1, %v4573_v60, %v4569_v38  ;;  %v4575_v46 = vpop.eup %4574  ;;  %v2105_v17 = vsub.f32 %v6336_v18, %v6598_v59  ;;  %v6642_v13 = vpop.f32.mrf.mxu1  ;;  %v2646_v49 = vsel %vm2183_vm14, %v6488_v0, -inf }
 0x771   : > { %3045 = vmatmul.f32.gmra.mxu1 %v2775_v30  ;;  %3158 = vmatmul.f32.gmra.mxu2 %v2807_v42  ;;  %v2621_v16 = vpop.xlane.xlu2 %2620  ;;  %4578 = vpow2.f32 %v2151_v31 }
 0x772   : > { %v2681_v53 = vsub.f32 %v6303_v43, %v2621_v16  ;;  %v2466_v43 = vsel %vm1054_vm1, %v6600_v11, -inf }
 0x773   : > { %v2234_v36 = vpop.xlane.xlu1 %2233  ;;  %v6619_v27 = vpop.xlane.xlu0 %2626 }
 0x774   : > { %v2730_v8 = vmul.f32 1.442695, %v2681_v53  ;;  %v2296_v20 = vsub.f32 %v6298_v28, %v2234_v36  ;;  %v2081_v28 = vsel %vm1054_vm1, %v6621_v34, -inf  ;;  %v6640_v60 = vpop.f32.mrf.mxu2  ;;  %v2155_v53 = vmul.f32 1.442695, %v2105_v17 }
 0x776   : > { %v4577_v25 = vpop.eup %4576  ;;  %v2344_v45 = vmul.f32 1.442695, %v2296_v20  ;;  %2455 = vmax.xlane.f32.xlu2 %v2454_v40  ;;  %4580 = vpow2.f32 %v2730_v8 }
 0x777   : > { %v2808_v14 = vsel %vm1054_vm1, %v4577_v25, %v4575_v46  ;;  %v4579_v12 = vpop.eup %4578 }
 0x778   : > { %4582 = vpow2.f32 %v2344_v45  ;;  %2467 = vmax.xlane.f32.xlu0 %v2466_v43  ;;  %2082 = vmax.xlane.f32.xlu1 %v2081_v28  ;;  %v2069_v28 = vsel %vm1054_vm1, %v6502_v41, -inf }
 0x779   : > { %4584 = vpow2.f32 %v2538_v33  ;;  %3161 = vmatmul.f32.gmra.mxu2 %v2808_v14  ;;  %v2432_v6 = vpop.xlane.xlu2 %2431 }
 0x77a   : > { %4586 = vpow2.f32 %v2346_v21  ;;  %v2490_v16 = vsub.f32 %v6322_v54, %v2432_v6 }
 0x77b   : > { %v2044_v38 = vpop.xlane.xlu1 %2043  ;;  %v6635_v39 = vpop.xlane.xlu0 %2437 }
 0x77c   : > { %v2104_v29 = vsub.f32 %v6317_v57, %v2044_v38  ;;  %v4581_v5 = vpop.eup %4580  ;;  %v2274_v57 = vsel %vm2183_vm14, %v6621_v34, -inf  ;;  %v2540_v20 = vmul.f32 1.442695, %v2490_v16  ;;  %v6655_v43 = vpop.f32.mrf.mxu2  ;;  %v3821_v38 = vld [vmem:[%s7465_s10 + $0x18] sm:$0xff] }
 0x77d   : > { %3934 = vmatpush.msra.mxu3 %v3821_v38 }
 0x77e   : > { %v4583_v42 = vpop.eup %4582  ;;  %v2153_v30 = vmul.f32 1.442695, %v2104_v29  ;;  %2647 = vmax.xlane.f32.xlu2 %v2646_v49  ;;  %v6657_v1 = vpop.f32.mrf.mxu1 }
 0x77f   : > { %v4585_v9 = vpop.eup %4584  ;;  %v2776_v31 = vsel %vm1054_vm1, %v4579_v12, %v4583_v42  ;;  %v6669_v12 = vadd.f32 %v6596_v47, %v6603_v3  ;;  %v2262_v47 = vsel %vm2183_vm14, %v6502_v41, -inf }
 0x780   : > { %4588 = vpow2.f32 %v2153_v30  ;;  %2275 = vmax.xlane.f32.xlu1 %v2274_v57  ;;  %3048 = vmatmul.f32.gmra.mxu1 %v2776_v31  ;;  %v2809_v59 = vsel %vm1054_vm1, %v4585_v9, %v4581_v5  ;;  %v4587_v45 = vpop.eup %4586  ;;  %v2492_v9 = vsub.f32 %v6363_v22, %v6635_v39 }
 0x781   : > { %3164 = vmatmul.f32.gmra.mxu2 %v2809_v59  ;;  %v2240_v36 = vpop.xlane.xlu2 %2239  ;;  %4590 = vpow2.f32 %v2155_v53 }
 0x782   : > { %v2298_v8 = vsub.f32 %v6336_v18, %v2240_v36  ;;  %v2683_v18 = vsub.f32 %v6344_v24, %v6619_v27  ;;  %v2544_v39 = vmul.f32 1.442695, %v2492_v9  ;;  %v2268_v9 = vsel %vm2183_vm14, %v6546_v61, -inf }
 0x783   : > { %v2624_v46 = vpop.xlane.xlu1 %2623  ;;  %v6652_v33 = vpop.xlane.xlu0 %2245 }
 0x784   : > { %v2348_v40 = vmul.f32 1.442695, %v2298_v8  ;;  %v2682_v25 = vsub.f32 %v6322_v54, %v2624_v46  ;;  %v2734_v5 = vmul.f32 1.442695, %v2683_v18  ;;  %v6680_v57 = vpop.f32.mrf.mxu2  ;;  %v6689_v8 = vadd.f32 %v6616_v48, %v6624_v58 }
 0x785   : > { %v2300_v58 = vsub.f32 %v6379_v63, %v6652_v33 }
 0x786   : > { %v4589_v14 = vpop.eup %4588  ;;  %4592 = vpow2.f32 %v2348_v40  ;;  %v2732_v6 = vmul.f32 1.442695, %v2682_v25  ;;  %2070 = vmax.xlane.f32.xlu2 %v2069_v28  ;;  %v6682_v31 = vpop.f32.mrf.mxu1 }
 0x787   : > { %4594 = vpow2.f32 %v2540_v20  ;;  %v2777_v21 = vsel %vm1054_vm1, %v4589_v14, %v4587_v45  ;;  %v4591_v29 = vpop.eup %4590 }
 0x788   : > { %4596 = vpow2.f32 %v2732_v6  ;;  %3051 = vmatmul.f32.gmra.mxu1 %v2777_v21  ;;  %v2457_v6 = vsel %vm1054_vm1, %v6510_v55, -inf }
 0x789   : > { %v2050_v54 = vpop.xlane.xlu2 %2049  ;;  %4598 = vpow2.f32 %v2734_v5 }
 0x78b   : > { %v2435_v17 = vpop.xlane.xlu1 %2434  ;;  %v6671_v49 = vpop.xlane.xlu0 %2055 }
 0x78c   : > { %v4593_v27 = vpop.eup %4592  ;;  %v2491_v42 = vsub.f32 %v6344_v24, %v2435_v17  ;;  %3244 = vrot.lane.b32.xlu0 %v6669_v12, %s4776_s15  ;;  %v2106_v24 = vsub.f32 %v6361_v35, %v2050_v54  ;;  %v2352_v17 = vmul.f32 1.442695, %v2300_v58 }
 0x78d   : > { %v4595_v30 = vpop.eup %4594  ;;  %v2778_v59 = vsel %vm1054_vm1, %v4591_v29, %v4593_v27 }
 0x78e   : > { %v4597_v3 = vpop.eup %4596  ;;  %v2542_v16 = vmul.f32 1.442695, %v2491_v42  ;;  %2263 = vmax.xlane.f32.xlu2 %v2262_v47  ;;  %v2157_v46 = vmul.f32 1.442695, %v2106_v24  ;;  %v3019_v54 = vpop.f32.mrf.mxu1 }
 0x78f   : > { %v2810_v53 = vsel %vm1054_vm1, %v4595_v30, %v4597_v3  ;;  %v4599_v14 = vpop.eup %4598  ;;  %v2108_v30 = vsub.f32 %v6398_v19, %v6671_v49  ;;  %v6719_v3 = vadd.f32 %v6640_v60, %v6642_v13 }
 0x790   : > { %4600 = vpow2.f32 %v2542_v16  ;;  %3054 = vmatmul.f32.gmra.mxu1 %v2778_v59  ;;  %3167 = vmatmul.f32.gmra.mxu2 %v2810_v53 }
 0x791   : > { %v2630_v36 = vpop.xlane.xlu2 %2629  ;;  %4602 = vpow2.f32 %v2544_v39  ;;  %v2161_v49 = vmul.f32 1.442695, %v2108_v30 }
 0x792   : > { %v2684_v20 = vsub.f32 %v6363_v22, %v2630_v36  ;;  %v6701_v22 = vadd.f32 %v6576_v2, %v6581_v44 }
 0x793   : > { %v2243_v40 = vpop.xlane.xlu1 %2242  ;;  %v6692_v25 = vpop.xlane.xlu0 %2635 }
 0x794   : > { %v2736_v45 = vmul.f32 1.442695, %v2684_v20  ;;  %v2299_v28 = vsub.f32 %v6361_v35, %v2243_v40  ;;  %3246 = vrot.lane.b32.xlu0 %v6689_v8, %s4776_s15  ;;  %v3132_v35 = vpop.f32.mrf.mxu2 }
 0x795   : > { %v6708_v29 = vadd.f32 %v3132_v35, %v3019_v54 }
 0x796   : > { %v4601_v18 = vpop.eup %4600  ;;  %4604 = vpow2.f32 %v2736_v45  ;;  %v2350_v48 = vmul.f32 1.442695, %v2299_v28  ;;  %2458 = vmax.xlane.f32.xlu2 %v2457_v6 }
 0x797   : > { %4606 = vpow2.f32 %v2157_v46  ;;  %v2811_v21 = vsel %vm1054_vm1, %v4601_v18, %v4599_v14  ;;  %v4603_v5 = vpop.eup %4602  ;;  %v2686_v18 = vsub.f32 %v6403_v50, %v6692_v25 }
 0x798   : > { %4608 = vpow2.f32 %v2350_v48  ;;  %3170 = vmatmul.f32.gmra.mxu2 %v2811_v21 }
 0x799   : > { %v2441_v38 = vpop.xlane.xlu2 %2440  ;;  %3242 = vrot.lane.b32.xlu1 %v6701_v22, %s4776_s15  ;;  %4610 = vpow2.f32 %v2352_v17 }
 0x79b   : > { %v2053_v2 = vpop.xlane.xlu1 %2052  ;;  %v2447_v44 = vpop.xlane.xlu0 %2446 }
 0x79c   : > { %v4605_v27 = vpop.eup %4604  ;;  %v2107_v33 = vsub.f32 %v6379_v63, %v2053_v2  ;;  %3254 = vrot.lane.b32.xlu0 %v6708_v29, %s4776_s15  ;;  %v2493_v63 = vsub.f32 %v6384_v62, %v2441_v38  ;;  %v6728_v28 = vpop.f32.mrf.mxu2  ;;  %v2495_v17 = vsub.f32 %v6429_v15, %v2447_v44 }
 0x79d   : > { %v4607_v42 = vpop.eup %4606  ;;  %v2812_v59 = vsel %vm1054_vm1, %v4603_v5, %v4605_v27 }
 0x79e   : > { %v4609_v47 = vpop.eup %4608  ;;  %v2159_v16 = vmul.f32 1.442695, %v2107_v33  ;;  %2269 = vmax.xlane.f32.xlu2 %v2268_v9  ;;  %v2546_v13 = vmul.f32 1.442695, %v2493_v63  ;;  %v6730_v14 = vpop.f32.mrf.mxu1 }
 0x79f   : > { %v2779_v24 = vsel %vm1054_vm1, %v4607_v42, %v4609_v47  ;;  %v4611_v40 = vpop.eup %4610 }
 0x7a0   : > { %4612 = vpow2.f32 %v2159_v16  ;;  %3057 = vmatmul.f32.gmra.mxu1 %v2779_v24  ;;  %3173 = vmatmul.f32.gmra.mxu2 %v2812_v59  ;;  %v6749_v59 = vadd.f32 %v6655_v43, %v6657_v1 }
 0x7a1   : > { %v2249_v53 = vpop.xlane.xlu2 %2248  ;;  %3248 = vrot.lane.b32.xlu1 %v6719_v3, %s4776_s15  ;;  %4614 = vpow2.f32 %v2161_v49 }
 0x7a2   : > { %v2301_v60 = vsub.f32 %v6398_v19, %v2249_v53 }
 0x7a3   : > { %v2633_v39 = vpop.xlane.xlu1 %2632  ;;  %v2062_v36 = vpop.xlane.xlu0 %2061 }
 0x7a4   : > { %v2354_v20 = vmul.f32 1.442695, %v2301_v60  ;;  %v2685_v46 = vsub.f32 %v6384_v62, %v2633_v39  ;;  %v2740_v62 = vmul.f32 1.442695, %v2686_v18  ;;  %v6740_v30 = vpop.f32.mrf.mxu2 }
 0x7a6   : > { %v4613_v45 = vpop.eup %4612  ;;  %4616 = vpow2.f32 %v2354_v20  ;;  %v2738_v6 = vmul.f32 1.442695, %v2685_v46  ;;  %v6742_v9 = vpop.f32.mrf.mxu1  ;;  %v2110_v20 = vsub.f32 %v6442_v51, %v2062_v36 }
 0x7a7   : > { %4618 = vpow2.f32 %v2546_v13  ;;  %v2780_v19 = vsel %vm1054_vm1, %v4613_v45, %v4611_v40  ;;  %v4615_v58 = vpop.eup %4614 }
 0x7a8   : > { %4620 = vpow2.f32 %v2738_v6  ;;  %3060 = vmatmul.f32.gmra.mxu1 %v2780_v19  ;;  %v6763_v6 = vadd.f32 %v6680_v57, %v6682_v31  ;;  %v2165_v18 = vmul.f32 1.442695, %v2110_v20  ;;  %v6772_v57 = vpop.f32.mrf.mxu3 }
 0x7a9   : > { %v2059_v48 = vpop.xlane.xlu2 %2058  ;;  %4622 = vpow2.f32 %v2740_v62 }
 0x7aa   : > { %v2109_v25 = vsub.f32 %v6420_v56, %v2059_v48 }
 0x7ab   : > { %v2444_v35 = vpop.xlane.xlu1 %2443  ;;  %v2450_v21 = vpop.xlane.xlu0 %2449 }
 0x7ac   : > { %v4617_v54 = vpop.eup %4616  ;;  %v2494_v38 = vsub.f32 %v6403_v50, %v2444_v35  ;;  %v2550_v50 = vmul.f32 1.442695, %v2495_v17  ;;  %v2163_v16 = vmul.f32 1.442695, %v2109_v25 }
 0x7ad   : > { %v4619_v5 = vpop.eup %4618  ;;  %v2781_v33 = vsel %vm1054_vm1, %v4615_v58, %v4617_v54  ;;  %v2496_v58 = vsub.f32 %v6447_v7, %v2450_v21 }
 0x7ae   : > { %v4621_v2 = vpop.eup %4620  ;;  %v2548_v27 = vmul.f32 1.442695, %v2494_v38  ;;  %v6758_v1 = vpop.f32.mrf.mxu1 }
 0x7af   : > { %v2813_v42 = vsel %vm1054_vm1, %v4619_v5, %v4621_v2  ;;  %v4623_v60 = vpop.eup %4622  ;;  %v2552_v31 = vmul.f32 1.442695, %v2496_v58 }
 0x7b0   : > { %4624 = vpow2.f32 %v2548_v27  ;;  %3063 = vmatmul.f32.gmra.mxu1 %v2781_v33  ;;  %3176 = vmatmul.f32.gmra.mxu2 %v2813_v42  ;;  %v6781_v27 = vadd.f32 %v6728_v28, %v6730_v14  ;;  %v2084_v42 = vsel %vm1054_vm1, %v6772_v57, -inf }
 0x7b1   : > { %v2639_v47 = vpop.xlane.xlu2 %2638  ;;  %4626 = vpow2.f32 %v2550_v50 }
 0x7b2   : > { %v2687_v44 = vsub.f32 %v6429_v15, %v2639_v47 }
 0x7b3   : > { %v2252_v63 = vpop.xlane.xlu1 %2251  ;;  %v6745_v24 = vpop.xlane.xlu0 %2260 }
 0x7b4   : > { %v2742_v49 = vmul.f32 1.442695, %v2687_v44  ;;  %v2302_v53 = vsub.f32 %v6420_v56, %v2252_v63  ;;  %v6756_v46 = vpop.f32.mrf.mxu2  ;;  %v3820_v63 = vld [vmem:[%s7465_s10 + $0x10] sm:$0xff] }
 0x7b5   : > { %3935 = vmatpush.msra.mxu3 %v3820_v63 }
 0x7b6   : > { %v4625_v13 = vpop.eup %4624  ;;  %4628 = vpow2.f32 %v2742_v49  ;;  %v2356_v39 = vmul.f32 1.442695, %v2302_v53  ;;  %3250 = vrot.lane.b32.xlu2 %v6749_v59, %s4776_s15 }
 0x7b7   : > { %4630 = vpow2.f32 %v2163_v16  ;;  %v2814_v15 = vsel %vm1054_vm1, %v4625_v13, %v4623_v60  ;;  %v4627_v40 = vpop.eup %4626 }
 0x7b8   : > { %4632 = vpow2.f32 %v2356_v39  ;;  %3179 = vmatmul.f32.gmra.mxu2 %v2814_v15 }
 0x7b9   : > { %v2255_v43 = vpop.xlane.xlu2 %2254 }
 0x7ba   : > { %v2303_v56 = vsub.f32 %v6442_v51, %v2255_v43 }
 0x7bb   : > { %v6765_v48 = vpop.xlane.xlu0 %2650  ;;  %v2258_v62 = vpop.xlane.xlu1 %2257 }
 0x7bc   : > { %v4629_v45 = vpop.eup %4628  ;;  %v2358_v19 = vmul.f32 1.442695, %v2303_v56  ;;  %v6774_v5 = vpop.f32.mrf.mxu2  ;;  %v2304_v33 = vsub.f32 %v6462_v26, %v2258_v62  ;;  %v2277_v56 = vsel %vm2183_vm14, %v6772_v57, -inf }
 0x7bd   : > { %v4631_v36 = vpop.eup %4630  ;;  %v2815_v54 = vsel %vm1054_vm1, %v4627_v40, %v4629_v45 }
 0x7be   : > { %v4633_v35 = vpop.eup %4632  ;;  %4634 = vpow2.f32 %v2358_v19  ;;  %3252 = vrot.lane.b32.xlu2 %v6763_v6, %s4776_s15  ;;  %v6776_v21 = vpop.f32.mrf.mxu1  ;;  %v2360_v14 = vmul.f32 1.442695, %v2304_v33 }
 0x7bf   : > { %v2782_v51 = vsel %vm1054_vm1, %v4631_v36, %v4633_v35  ;;  %4636 = vpow2.f32 %v2165_v18 }
 0x7c0   : > { %3066 = vmatmul.f32.gmra.mxu1 %v2782_v51  ;;  %3182 = vmatmul.f32.gmra.mxu2 %v2815_v54  ;;  %4638 = vpow2.f32 %v2552_v31 }
 0x7c1   : > { %v2642_v38 = vpop.xlane.xlu2 %2641 }
 0x7c2   : > { %v2688_v17 = vsub.f32 %v6447_v7, %v2642_v38  ;;  %v6790_v7 = vpop.f32.mrf.mxu0 }
 0x7c3   : > { %v6786_v47 = vpop.xlane.xlu0 %2266  ;;  %v6792_v44 = vpop.xlane.xlu1 %2073  ;;  %v2469_v53 = vsel %vm1054_vm1, %v6790_v7, -inf }
 0x7c4   : > { %v4635_v2 = vpop.eup %4634  ;;  %v2744_v25 = vmul.f32 1.442695, %v2688_v17  ;;  %v6801_v39 = vpop.f32.mrf.mxu2 }
 0x7c5   : > { %v4637_v50 = vpop.eup %4636 }
 0x7c6   : > { %4640 = vpow2.f32 %v2744_v25  ;;  %2085 = vmax.xlane.f32.xlu0 %v2084_v42  ;;  %3256 = vrot.lane.b32.xlu2 %v6781_v27, %s4776_s15  ;;  %v2783_v28 = vsel %vm1054_vm1, %v4637_v50, %v4635_v2  ;;  %v4639_v60 = vpop.eup %4638  ;;  %v6803_v15 = vpop.f32.mrf.mxu1  ;;  %v2305_v25 = vsub.f32 %v6483_v10, %v6745_v24  ;;  %v6827_v50 = vadd.f32 %v6756_v46, %v6758_v1 }
 0x7c7   : > { %4642 = vpow2.f32 %v2360_v14 }
 0x7c8   : > { %3069 = vmatmul.f32.gmra.mxu1 %v2783_v28  ;;  %v2362_v28 = vmul.f32 1.442695, %v2305_v25 }
 0x7c9   : > { %v2065_v16 = vpop.xlane.xlu2 %2064 }
 0x7ca   : > { %v2111_v49 = vsub.f32 %v6462_v26, %v2065_v16  ;;  %v6831_v16 = vadd.f32 %v6740_v30, %v6742_v9 }
 0x7cb   : > { %2470 = vmax.xlane.f32.xlu1 %v2469_v53  ;;  %v6808_v26 = vpop.xlane.xlu0 %2461  ;;  %v6810_v40 = vpop.xlane.xlu1 %2656 }
 0x7cc   : > { %v4641_v13 = vpop.eup %4640  ;;  %v2167_v20 = vmul.f32 1.442695, %v2111_v49 }
 0x7cd   : > { %v2816_v43 = vsel %vm1054_vm1, %v4639_v60, %v4641_v13  ;;  %v4643_v18 = vpop.eup %4642  ;;  %v6847_v13 = vadd.f32 %v6774_v5, %v6776_v21 }
 0x7ce   : > { %4644 = vpow2.f32 %v2167_v20  ;;  %3185 = vmatmul.f32.gmra.mxu2 %v2816_v43  ;;  %2278 = vmax.xlane.f32.xlu0 %v2277_v56  ;;  %v6816_v35 = vpop.f32.mrf.mxu1 }
 0x7d1   : > { %v2453_v45 = vpop.xlane.xlu2 %2452 }
 0x7d2   : > { %v2497_v58 = vsub.f32 %v6466_v52, %v2453_v45 }
 0x7d3   : > { %v6818_v31 = vpop.xlane.xlu0 %2653  ;;  %v6821_v17 = vpop.xlane.xlu1 %2079 }
 0x7d4   : > { %v4645_v19 = vpop.eup %4644  ;;  %v6812_v36 = vpop.f32.mrf.mxu2  ;;  %v2554_v51 = vmul.f32 1.442695, %v2497_v58 }
 0x7d5   : > { %v2784_v62 = vsel %vm1054_vm1, %v4645_v19, %v4643_v18  ;;  %v2661_v19 = vsel %vm2183_vm14, %v6790_v7, -inf }
 0x7d6   : > { %3072 = vmatmul.f32.gmra.mxu1 %v2784_v62  ;;  %4646 = vpow2.f32 %v2554_v51  ;;  %v6863_v62 = vadd.f32 %v6801_v39, %v6803_v15 }
 0x7d9   : > { %v2645_v54 = vpop.xlane.xlu2 %2644 }
 0x7da   : > { %v2689_v38 = vsub.f32 %v6466_v52, %v2645_v54 }
 0x7db   : > { %v6836_v49 = vpop.xlane.xlu0 %2076  ;;  %v6840_v46 = vpop.xlane.xlu1 %2272 }
 0x7dc   : > { %v2746_v2 = vmul.f32 1.442695, %v2689_v38  ;;  %v3153_v33 = vpop.f32.mrf.mxu2  ;;  %v4647_v24 = vpop.eup %4646 }
 0x7de   : > { %4648 = vpow2.f32 %v2746_v2  ;;  %v3040_v42 = vpop.f32.mrf.mxu1 }
 0x7df   : > { %4650 = vpow2.f32 %v2362_v28 }
 0x7e1   : > { %v2068_v14 = vpop.xlane.xlu2 %2067 }
 0x7e2   : > { %v2112_v52 = vsub.f32 %v6483_v10, %v2068_v14  ;;  %3260 = vrot.lane.b32.xlu0 %v6827_v50, %s4776_s15 }
 0x7e3   : > { %v6855_v18 = vpop.xlane.xlu0 %2464  ;;  %v6859_v5 = vpop.xlane.xlu1 %2659 }
 0x7e4   : > { %v4649_v63 = vpop.eup %4648  ;;  %v2169_v53 = vmul.f32 1.442695, %v2112_v52  ;;  %3258 = vrot.lane.b32.xlu1 %v6831_v16, %s4776_s15  ;;  %v3156_v10 = vpop.f32.mrf.mxu2  ;;  %v6872_v52 = vadd.f32 %v3153_v33, %v3040_v42  ;;  %v3818_v33 = vld [vmem:[%s7465_s10] sm:$0xff] }
 0x7e5   : > { %v2817_v1 = vsel %vm1054_vm1, %v4647_v24, %v4649_v63  ;;  %v4651_v20 = vpop.eup %4650 }
 0x7e6   : > { %4652 = vpow2.f32 %v2169_v53  ;;  %v3043_v30 = vpop.f32.mrf.mxu1  ;;  %3188 = vmatmul.f32.gmra.mxu2 %v2817_v1 }
 0x7e7   : > { %v6843_v9 = vadd.f32 %v3156_v10, %v3043_v30 }
 0x7e9   : > { %v2456_v60 = vpop.xlane.xlu2 %2455 }
 0x7ea   : > { %3270 = vrot.lane.b32.xlu0 %v6843_v9, %s4776_s15  ;;  %v2498_v56 = vsub.f32 %v6488_v0, %v2456_v60  ;;  %v2114_v60 = vsub.f32 %v6528_v37, %v6792_v44 }
 0x7eb   : > { %v6868_v25 = vpop.xlane.xlu0 %2467  ;;  %v6870_v28 = vpop.xlane.xlu1 %2082 }
 0x7ec   : > { %v4653_v43 = vpop.eup %4652  ;;  %3262 = vrot.lane.b32.xlu1 %v6847_v13, %s4776_s15  ;;  %v2556_v21 = vmul.f32 1.442695, %v2498_v56 }
 0x7ed   : > { %v2785_v45 = vsel %vm1054_vm1, %v4653_v43, %v4651_v20  ;;  %v2307_v43 = vsub.f32 %v6528_v37, %v6786_v47  ;;  %v2691_v37 = vsub.f32 %v6510_v55, %v6765_v48  ;;  %v2693_v47 = vsub.f32 %v6551_v23, %v6810_v40 }
 0x7ee   : > { %3075 = vmatmul.f32.gmra.mxu1 %v2785_v45  ;;  %4654 = vpow2.f32 %v2556_v21  ;;  %v3046_v2 = vpop.f32.mrf.mxu1 }
 0x7ef   : > { %2662 = vmax.xlane.f32.xlu2 %v2661_v19  ;;  %v2366_v44 = vmul.f32 1.442695, %v2307_v43  ;;  %v2501_v43 = vsub.f32 %v6551_v23, %v6855_v18 }
 0x7f1   : > { %v2648_v58 = vpop.xlane.xlu2 %2647 }
 0x7f2   : > { %v2690_v51 = vsub.f32 %v6488_v0, %v2648_v58  ;;  %v3819_v0 = vld [vmem:[%s7465_s10 + $0x8] sm:$0xff]  ;;  %v2173_v58 = vmul.f32 1.442695, %v2114_v60 }
 0x7f3   : > { %3936 = vmatpush.msra.mxu3 %v3819_v0  ;;  %v6897_v19 = vpop.xlane.xlu1 %2275 }
 0x7f4   : > { %v2748_v54 = vmul.f32 1.442695, %v2690_v51  ;;  %v3159_v38 = vpop.f32.mrf.mxu2  ;;  %3264 = vrot.lane.b32.xlu1 %v6863_v62, %s4776_s15  ;;  %v4655_v24 = vpop.eup %4654  ;;  %v6903_v51 = vadd.f32 %v6812_v36, %v6816_v35  ;;  %v2500_v36 = vsub.f32 %v6530_v32, %v6808_v26  ;;  %v2754_v26 = vmul.f32 1.442695, %v2693_v47 }
 0x7f5   : > { %3937 = vmatpush.msra.mxu3 %v3818_v33  ;;  %v6894_v56 = vadd.f32 %v3159_v38, %v3046_v2 }
 0x7f6   : > { %4656 = vpow2.f32 %v2748_v54 }
 0x7f9   : > { %v2071_v14 = vpop.xlane.xlu2 %2070 }
 0x7fa   : > { %v2113_v15 = vsub.f32 %v6502_v41, %v2071_v14 }
 0x7fc   : > { %v4657_v39 = vpop.eup %4656  ;;  %3268 = vrot.lane.b32.xlu1 %v6872_v52, %s4776_s15  ;;  %v3162_v63 = vpop.f32.mrf.mxu2  ;;  %v2171_v42 = vmul.f32 1.442695, %v2113_v15  ;;  %v2692_v15 = vsub.f32 %v6530_v32, %v6818_v31 }
 0x7fd   : > { %v3049_v53 = vpop.f32.mrf.mxu1  ;;  %v2818_v1 = vsel %vm1054_vm1, %v4655_v24, %v4657_v39  ;;  %v2750_v39 = vmul.f32 1.442695, %v2691_v37 }
 0x7fe   : > { %v6881_v30 = vadd.f32 %v3162_v63, %v3049_v53  ;;  %3191 = vmatmul.f32.gmra.mxu2 %v2818_v1  ;;  %v6886_v10 = vpop.permute.xlu0 %3244  ;;  %4658 = vpow2.f32 %v2171_v42  ;;  %v2115_v63 = vsub.f32 %v6546_v61, %v6836_v49  ;;  %v2560_v1 = vmul.f32 1.442695, %v2500_v36 }
 0x7ff   : > { %4660 = vrcp.f32 %v6886_v10  ;;  %v2752_v49 = vmul.f32 1.442695, %v2692_v15  ;;  %v2116_v42 = vsub.f32 %v6565_v4, %v6821_v17  ;;  %vm3358_vm6 = vweird.f32 %v6886_v10 }
 0x800   : > { %3274 = vrot.lane.b32.xlu0 %v6881_v30, %s4776_s15  ;;  %v2175_v60 = vmul.f32 1.442695, %v2115_v63 }
 0x801   : > { %v2264_v20 = vpop.xlane.xlu2 %2263 }
 0x802   : > { %v2306_v45 = vsub.f32 %v6502_v41, %v2264_v20  ;;  %v2309_v20 = vsub.f32 %v6565_v4, %v6840_v46 }
 0x804   : > { %v2364_v21 = vmul.f32 1.442695, %v2306_v45  ;;  %3272 = vrot.lane.b32.xlu1 %v6894_v56, %s4776_s15  ;;  %v3165_v54 = vpop.f32.mrf.mxu2  ;;  %v4659_v2 = vpop.eup %4658  ;;  %v2370_v36 = vmul.f32 1.442695, %v2309_v20 }
 0x805   : > { %v3052_v41 = vpop.f32.mrf.mxu1  ;;  %v6919_v24 = vpop.eup %4660 }
 0x806   : > { %4662 = vpow2.f32 %v2364_v21  ;;  %v6914_v35 = vadd.f32 %v3165_v54, %v3052_v41  ;;  %v6916_v14 = vpop.permute.xlu0 %3246  ;;  %v3354_v32 = vmul.f32 %v6919_v24, %v6886_v10  ;;  %vm3359_vm3 = vweird.f32 %v6919_v24 }
 0x807   : > { %3266 = vrot.lane.b32.xlu2 %v6903_v51, %s4776_s15  ;;  %4664 = vpow2.f32 %v2173_v58  ;;  %vm6982_vm7 = vmor %vm3358_vm6, %vm3359_vm3  ;;  %vm3373_vm10 = vweird.f32 %v6916_v14 }
 0x808   : > { %4666 = vpow2.f32 %v2366_v44  ;;  %v3355_v58 = vsub.f32 1.0, %v3354_v32 }
 0x809   : > { %v2459_v38 = vpop.xlane.xlu2 %2458 }
 0x80a   : > { %v2499_v48 = vsub.f32 %v6510_v55, %v2459_v38  ;;  %v2177_v38 = vmul.f32 1.442695, %v2116_v42  ;;  %v2117_v42 = vsub.f32 %v6621_v34, %v6870_v28  ;;  %v3364_v28 = vand.u32 2147483648, %v6886_v10 }
 0x80b   : > { %v6923_v40 = vpop.permute.xlu1 %3242 }
 0x80c   : > { %v4663_v0 = vpop.eup %4662  ;;  %v2558_v53 = vmul.f32 1.442695, %v2499_v48  ;;  %4668 = vrcp.f32 %v6923_v40  ;;  %3276 = vrot.lane.b32.xlu1 %v6914_v35, %s4776_s15  ;;  %v2562_v48 = vmul.f32 1.442695, %v2501_v43  ;;  %v3349_v15 = vand.u32 2147483648, %v6923_v40 }
 0x80d   : > { %4670 = vrcp.f32 %v6916_v14  ;;  %v2786_v55 = vsel %vm1054_vm1, %v4659_v2, %v4663_v0  ;;  %v4665_v31 = vpop.eup %4664  ;;  %v3055_v44 = vpop.f32.mrf.mxu1  ;;  %vm3343_vm2 = vweird.f32 %v6923_v40 }
 0x80e   : > { %4672 = vpow2.f32 %v2558_v53  ;;  %3078 = vmatmul.f32.gmra.mxu1 %v2786_v55  ;;  %v4667_v33 = vpop.eup %4666  ;;  %v3347_v55 = vand.u32 2147483647, %v6923_v40 }
 0x80f   : > { %4674 = vpow2.f32 %v2750_v39  ;;  %v2787_v4 = vsel %vm1054_vm1, %v4665_v31, %v4667_v33  ;;  %v3356_v39 = vmul.f32 %v6919_v24, %v3355_v58 }
 0x810   : > { %4676 = vpow2.f32 %v2754_v26  ;;  %vm3348_vm5 = vcmp.eq.f32.partialorder %v3347_v55, 8.507059e+37 }
 0x811   : > { %v2270_v45 = vpop.xlane.xlu2 %2269  ;;  %4678 = vpow2.f32 %v2560_v1  ;;  %v3357_v43 = vadd.f32 %v6919_v24, %v3356_v39  ;;  %v3365_v39 = vor.u32 1.1754944e-38, %v3364_v28 }
 0x812   : > { %v4669_v21 = vpop.eup %4668  ;;  %v2308_v37 = vsub.f32 %v6546_v61, %v2270_v45  ;;  %4680 = vpow2.f32 %v2752_v49 }
 0x813   : > { %v6941_v41 = vpop.eup %4670  ;;  %v3339_v17 = vmul.f32 %v4669_v21, %v6923_v40  ;;  %v3168_v47 = vpop.f32.mrf.mxu2  ;;  %4682 = vpow2.f32 %v2175_v60  ;;  %vm3344_vm15 = vweird.f32 %v4669_v21  ;;  %v3350_v60 = vor.u32 1.1754944e-38, %v3349_v15 }
 0x814   : > { %v6944_v54 = vpop.permute.xlu1 %3248  ;;  %v4673_v46 = vpop.eup %4672  ;;  %v2368_v23 = vmul.f32 1.442695, %v2308_v37  ;;  %v6947_v18 = vadd.f32 %v3168_v47, %v3055_v44  ;;  %v3369_v53 = vmul.f32 %v6941_v41, %v6916_v14  ;;  %vm3345_vm4 = vmor %vm3343_vm2, %vm3344_vm15  ;;  %v2502_v37 = vsub.f32 %v6600_v11, %v6868_v25 }
 0x815   : > { %v4675_v2 = vpop.eup %4674  ;;  %v3340_v61 = vsub.f32 1.0, %v3339_v17  ;;  %4684 = vrcp.f32 %v6944_v54  ;;  %v2310_v17 = vsub.f32 %v6621_v34, %v6897_v19  ;;  %v2179_v19 = vmul.f32 1.442695, %v2117_v42 }
 0x816   : > { %4686 = vpow2.f32 %v2368_v23  ;;  %3081 = vmatmul.f32.gmra.mxu1 %v2787_v4  ;;  %v2819_v0 = vsel %vm1054_vm1, %v4673_v46, %v4675_v2  ;;  %3278 = vrot.lane.b32.xlu0 %v6947_v18, %s4776_s15  ;;  %v6955_v63 = vpop.eup %4676  ;;  %v3370_v45 = vsub.f32 1.0, %v3369_v53  ;;  %v3362_v4 = vand.u32 2147483647, %v6886_v10 }
 0x817   : > { %v3341_v26 = vmul.f32 %v4669_v21, %v3340_v61  ;;  %3194 = vmatmul.f32.gmra.mxu2 %v2819_v0  ;;  %v4679_v1 = vpop.eup %4678  ;;  %4688 = vpow2.f32 %v2177_v38  ;;  %v2694_v2 = vsub.f32 %v6600_v11, %v6859_v5  ;;  %v3361_v5 = vsel %vm6982_vm7, %v6919_v24, %v3357_v43 }
 0x818   : > { %v4681_v32 = vpop.eup %4680  ;;  %4690 = vpow2.f32 %v2370_v36  ;;  %v3371_v36 = vmul.f32 %v6941_v41, %v3370_v45  ;;  %v2372_v61 = vmul.f32 1.442695, %v2310_v17  ;;  %v2564_v15 = vmul.f32 1.442695, %v2502_v37 }
 0x819   : > { %v3342_v31 = vadd.f32 %v4669_v21, %v3341_v26  ;;  %v6961_v49 = vpop.permute.xlu2 %3250  ;;  %v4683_v33 = vpop.eup %4682  ;;  %4692 = vpow2.f32 %v2562_v48  ;;  %vm3363_vm8 = vcmp.eq.f32.partialorder %v3362_v4, 8.507059e+37  ;;  %v2756_v0 = vmul.f32 1.442695, %v2694_v2 }
 0x81a   : > { %4694 = vrcp.f32 %v6961_v49  ;;  %v3366_v53 = vsel %vm3363_vm8, %v3365_v39, %v3361_v5  ;;  %v3372_v26 = vadd.f32 %v6941_v41, %v3371_v36  ;;  %vm3374_vm9 = vweird.f32 %v6941_v41  ;;  %v7028_v4 = vpop.permute.xlu0 %3254 }
 0x81b   : > { %v6966_v20 = vpop.eup %4684  ;;  %v3346_v58 = vsel %vm3345_vm4, %v4669_v21, %v3342_v31  ;;  %v3171_v44 = vpop.f32.mrf.mxu2  ;;  %4696 = vpow2.f32 %v2179_v19  ;;  %v3379_v24 = vand.u32 2147483648, %v6916_v14  ;;  %v3367_v43 = vmul.f32 %v3366_v53, %v6669_v12  ;;  %vm7010_vm11 = vmor %vm3373_vm10, %vm3374_vm9 }
 0x81c   : > { %v4687_v40 = vpop.eup %4686  ;;  %v3351_v47 = vsel %vm3348_vm5, %v3350_v60, %v3346_v58  ;;  %v3384_v11 = vmul.f32 %v6966_v20, %v6944_v54  ;;  %4698 = vpow2.f32 %v2372_v61  ;;  %v3376_v12 = vsel %vm7010_vm11, %v6941_v41, %v3372_v26 }
 0x81d   : > { %v3352_v46 = vmul.f32 %v3351_v47, %v6701_v22  ;;  %v3058_v38 = vpop.f32.mrf.mxu1  ;;  %v2788_v21 = vsel %vm1054_vm1, %v4683_v33, %v4687_v40  ;;  %v4689_v23 = vpop.eup %4688  ;;  %v2820_v22 = vsel %vm1054_vm1, %v4679_v1, %v4681_v32  ;;  %4700 = vpow2.f32 %v2564_v15 }
 0x81e   : > { %v6987_v25 = vadd.f32 %v3171_v44, %v3058_v38  ;;  %3084 = vmatmul.f32.gmra.mxu1 %v2788_v21  ;;  %v4691_v10 = vpop.eup %4690  ;;  %v3385_v55 = vsub.f32 1.0, %v3384_v11  ;;  %v3377_v33 = vand.u32 2147483647, %v6916_v14  ;;  %v3380_v37 = vor.u32 1.1754944e-38, %v3379_v24 }
 0x81f   : > { %3197 = vmatmul.f32.gmra.mxu2 %v2820_v22  ;;  %4235 = vmatmul.msk.f32.vlgmr.msra.gmra.mxu3 %vm450_vm0, %v3352_v46  ;;  %v4693_v48 = vpop.eup %4692  ;;  %v2789_v31 = vsel %vm1054_vm1, %v4689_v23, %v4691_v10  ;;  %vm3389_vm13 = vweird.f32 %v6966_v20  ;;  %v3394_v41 = vand.u32 2147483648, %v6944_v54  ;;  %vm3388_vm14 = vweird.f32 %v6944_v54 }
 0x820   : > { %3280 = vrot.lane.b32.xlu2 %v6987_v25, %s4776_s15  ;;  %v7003_v32 = vpop.eup %4694  ;;  %v2821_v44 = vsel %vm1054_vm1, %v4693_v48, %v6955_v63  ;;  %v3386_v40 = vmul.f32 %v6966_v20, %v3385_v55  ;;  %vm3378_vm12 = vcmp.eq.f32.partialorder %v3377_v33, 8.507059e+37  ;;  %v3392_v2 = vand.u32 2147483647, %v6944_v54  ;;  %vm3390_vm15 = vmor %vm3388_vm14, %vm3389_vm13 }
 0x821   : > { %v7001_v1 = vpop.permute.xlu2 %3252  ;;  %v3399_v14 = vmul.f32 %v7003_v32, %v6961_v49  ;;  %v4697_v17 = vpop.eup %4696  ;;  %v3381_v28 = vsel %vm3378_vm12, %v3380_v37, %v3376_v12  ;;  %v3395_v11 = vor.u32 1.1754944e-38, %v3394_v41  ;;  %vm3404_vm3 = vweird.f32 %v7003_v32 }
 0x822   : > { %4702 = vrcp.f32 %v7001_v1  ;;  %v4699_v63 = vpop.eup %4698  ;;  %v3387_v46 = vadd.f32 %v6966_v20, %v3386_v40  ;;  %v3382_v22 = vmul.f32 %v3381_v28, %v6689_v8  ;;  %vm3393_vm2 = vcmp.eq.f32.partialorder %v3392_v2, 8.507059e+37 }
 0x823   : > { %v3174_v42 = vpop.f32.mrf.mxu2  ;;  %4704 = vpow2.f32 %v2756_v0  ;;  %v4701_v47 = vpop.eup %4700  ;;  %v3400_v38 = vsub.f32 1.0, %v3399_v14  ;;  %v2790_v34 = vsel %vm1054_vm1, %v4697_v17, %v4699_v63  ;;  %v3409_v53 = vand.u32 2147483648, %v6961_v49 }
 0x824   : > { %4706 = vrcp.f32 %v7028_v4  ;;  %v3391_v54 = vsel %vm3390_vm15, %v6966_v20, %v3387_v46  ;;  %vm3403_vm4 = vweird.f32 %v6961_v49  ;;  %v3407_v20 = vand.u32 2147483647, %v6961_v49 }
 0x825   : > { %v3061_v60 = vpop.f32.mrf.mxu1  ;;  %v3401_v19 = vmul.f32 %v7003_v32, %v3400_v38  ;;  %v3396_v8 = vsel %vm3393_vm2, %v3395_v11, %v3391_v54  ;;  %vm3405_vm5 = vmor %vm3403_vm4, %vm3404_vm3  ;;  %v3424_v40 = vand.u32 2147483648, %v7001_v1  ;;  %vm3418_vm8 = vweird.f32 %v7001_v1 }
 0x826   : > { %v7015_v58 = vadd.f32 %v3174_v42, %v3061_v60  ;;  %3087 = vmatmul.f32.gmra.mxu1 %v2789_v31  ;;  %v3397_v55 = vmul.f32 %v3396_v8, %v6719_v3  ;;  %v3410_v42 = vor.u32 1.1754944e-38, %v3409_v53  ;;  %vm3408_vm6 = vcmp.eq.f32.partialorder %v3407_v20, 8.507059e+37 }
 0x827   : > { %3200 = vmatmul.f32.gmra.mxu2 %v2821_v44  ;;  %4236 = vmatmul.msk.f32.gmra.mxu3 %vm450_vm0, %v3367_v43  ;;  %v3402_v48 = vadd.f32 %v7003_v32, %v3401_v19  ;;  %v3422_v14 = vand.u32 2147483647, %v7001_v1  ;;  %v3425_v46 = vor.u32 1.1754944e-38, %v3424_v40  ;;  %vm3433_vm12 = vweird.f32 %v7028_v4 }
 0x828   : > { %3282 = vrot.lane.b32.xlu1 %v7015_v58, %s4776_s15  ;;  %v7032_v21 = vpop.eup %4702 }
 0x829   : > { %v4705_v23 = vpop.eup %4704  ;;  %v3414_v36 = vmul.f32 %v7032_v21, %v7001_v1  ;;  %v7046_v5 = vpop.permute.xlu2 %3256  ;;  %v3406_v33 = vsel %vm3405_vm5, %v7003_v32, %v3402_v48  ;;  %vm3419_vm7 = vweird.f32 %v7032_v21  ;;  %vm3423_vm10 = vcmp.eq.f32.partialorder %v3422_v14, 8.507059e+37 }
 0x82a   : > { %v2822_v10 = vsel %vm1054_vm1, %v4701_v47, %v4705_v23  ;;  %v7050_v0 = vpop.eup %4706  ;;  %4708 = vrcp.f32 %v7046_v5  ;;  %v3411_v60 = vsel %vm3408_vm6, %v3410_v42, %v3406_v33  ;;  %vm3420_vm9 = vmor %vm3418_vm8, %vm3419_vm7  ;;  %vm3448_vm2 = vweird.f32 %v7046_v5 }
 0x82b   : > { %v3415_v61 = vsub.f32 1.0, %v3414_v36  ;;  %v3429_v24 = vmul.f32 %v7050_v0, %v7028_v4  ;;  %v3412_v37 = vmul.f32 %v3411_v60, %v6749_v59  ;;  %vm3434_vm11 = vweird.f32 %v7050_v0 }
 0x82c   : > { %vm3435_vm13 = vmor %vm3433_vm12, %vm3434_vm11 }
 0x82d   : > { %v3064_v39 = vpop.f32.mrf.mxu1  ;;  %v3416_v31 = vmul.f32 %v7032_v21, %v3415_v61  ;;  %v3430_v3 = vsub.f32 1.0, %v3429_v24 }
 0x82e   : > { %3090 = vmatmul.f32.gmra.mxu1 %v2790_v34  ;;  %v3439_v34 = vand.u32 2147483648, %v7028_v4 }
 0x82f   : > { %3203 = vmatmul.f32.gmra.mxu2 %v2822_v10  ;;  %4237 = vmatmul.msk.f32.gmra.mxu3 %vm450_vm0, %v3382_v22  ;;  %v3417_v43 = vadd.f32 %v7032_v21, %v3416_v31  ;;  %v3431_v63 = vmul.f32 %v7050_v0, %v3430_v3 }
 0x830   : > { %v4709_v44 = vpop.eup %4708  ;;  %v3440_v8 = vor.u32 1.1754944e-38, %v3439_v34 }
 0x831   : > { %v3444_v28 = vmul.f32 %v4709_v44, %v7046_v5  ;;  %v3421_v47 = vsel %vm3420_vm9, %v7032_v21, %v3417_v43  ;;  %v3432_v23 = vadd.f32 %v7050_v0, %v3431_v63  ;;  %v3437_v21 = vand.u32 2147483647, %v7028_v4 }
 0x832   : > { %v3426_v41 = vsel %vm3423_vm10, %v3425_v46, %v3421_v47  ;;  %vm3449_vm15 = vweird.f32 %v4709_v44 }
 0x833   : > { %v3177_v15 = vpop.f32.mrf.mxu2  ;;  %v3445_v2 = vsub.f32 1.0, %v3444_v28  ;;  %v3427_v36 = vmul.f32 %v3426_v41, %v6763_v6  ;;  %v3436_v11 = vsel %vm3435_vm13, %v7050_v0, %v3432_v23  ;;  %vm3438_vm14 = vcmp.eq.f32.partialorder %v3437_v21, 8.507059e+37  ;;  %vm3450_vm3 = vmor %vm3448_vm2, %vm3449_vm15 }
 0x834   : > { %v7053_v26 = vadd.f32 %v3177_v15, %v3064_v39  ;;  %v3441_v4 = vsel %vm3438_vm14, %v3440_v8, %v3436_v11  ;;  %v3454_v6 = vand.u32 2147483648, %v7046_v5  ;;  %v3452_v15 = vand.u32 2147483647, %v7046_v5 }
 0x835   : > { %v3446_v54 = vmul.f32 %v4709_v44, %v3445_v2  ;;  %v3442_v0 = vmul.f32 %v3441_v4, %v6708_v29 }
 0x836   : > { %3284 = vrot.lane.b32.xlu0 %v7053_v26, %s4776_s15  ;;  %v3455_v24 = vor.u32 1.1754944e-38, %v3454_v6  ;;  %vm3453_vm4 = vcmp.eq.f32.partialorder %v3452_v15, 8.507059e+37 }
 0x837   : > { %4238 = vmatmul.msk.f32.gmra.mxu3 %vm450_vm0, %v3397_v55  ;;  %v3447_v61 = vadd.f32 %v4709_v44, %v3446_v54 }
 0x839   : > { %v2086_v49 = vpop.xlane.xlu0 %2085  ;;  %v3451_v55 = vsel %vm3450_vm3, %v4709_v44, %v3447_v61 }
 0x83a   : > { %v2118_v12 = vsub.f32 %v6772_v57, %v2086_v49  ;;  %v3456_v31 = vsel %vm3453_vm4, %v3455_v24, %v3451_v55 }
 0x83b   : > { %v3180_v45 = vpop.f32.mrf.mxu2  ;;  %v3457_v5 = vmul.f32 %v3456_v31, %v6781_v27 }
 0x83c   : > { %v2181_v1 = vmul.f32 1.442695, %v2118_v12 }
 0x83d   : > { %v3067_v32 = vpop.f32.mrf.mxu1 }
 0x83e   : > { %v7073_v17 = vadd.f32 %v3180_v45, %v3067_v32  ;;  %4710 = vpow2.f32 %v2181_v1  ;;  %v2471_v20 = vpop.xlane.xlu1 %2470 }
 0x83f   : > { %4239 = vmatmul.msk.f32.gmra.mxu3 %vm450_vm0, %v3412_v37  ;;  %v2503_v44 = vsub.f32 %v6790_v7, %v2471_v20 }
 0x840   : > { %3286 = vrot.lane.b32.xlu2 %v7073_v17, %s4776_s15 }
 0x841   : > { %v2279_v38 = vpop.xlane.xlu0 %2278  ;;  %v2566_v27 = vmul.f32 1.442695, %v2503_v44 }
 0x842   : > { %v2311_v59 = vsub.f32 %v6772_v57, %v2279_v38 }
 0x843   : > { %v3183_v10 = vpop.f32.mrf.mxu2 }
 0x844   : > { %v2374_v22 = vmul.f32 1.442695, %v2311_v59  ;;  %v4711_v48 = vpop.eup %4710 }
 0x845   : > { %v3070_v19 = vpop.f32.mrf.mxu1 }
 0x846   : > { %4712 = vpow2.f32 %v2374_v22  ;;  %v7088_v57 = vadd.f32 %v3183_v10, %v3070_v19 }
 0x847   : > { %4240 = vmatmul.msk.f32.gmra.mxu3 %vm450_vm0, %v3427_v36 }
 0x848   : > { %3288 = vrot.lane.b32.xlu1 %v7088_v57, %s4776_s15 }
 0x84c   : > { %v4713_v39 = vpop.eup %4712 }
 0x84d   : > { %v2791_v53 = vsel %vm1054_vm1, %v4711_v48, %v4713_v39 }
 0x84e   : > { %3093 = vmatmul.f32.gmra.mxu1 %v2791_v53 }
 0x84f   : > { %4241 = vmatmul.msk.f32.gmra.mxu3 %vm450_vm0, %v3442_v0 }
 0x851   : > { %v3186_v33 = vpop.f32.mrf.mxu2 }
 0x853   : > { %v3073_v42 = vpop.f32.mrf.mxu1 }
 0x854   : > { %v7100_v49 = vadd.f32 %v3186_v33, %v3073_v42  ;;  %v3261_v60 = vpop.permute.xlu0 %3260 }
 0x855   : > { %4714 = vrcp.f32 %v3261_v60  ;;  %v3484_v10 = vand.u32 2147483648, %v3261_v60  ;;  %vm3478_vm10 = vweird.f32 %v3261_v60  ;;  %v3482_v36 = vand.u32 2147483647, %v3261_v60 }
 0x856   : > { %v3259_v3 = vpop.permute.xlu1 %3258  ;;  %3290 = vrot.lane.b32.xlu0 %v7100_v49, %s4776_s15 }
 0x857   : > { %4716 = vrcp.f32 %v3259_v3  ;;  %4242 = vmatmul.msk.f32.gmra.mxu3 %vm450_vm0, %v3457_v5  ;;  %v3469_v63 = vand.u32 2147483648, %v3259_v3  ;;  %v3467_v46 = vand.u32 2147483647, %v3259_v3  ;;  %vm3463_vm6 = vweird.f32 %v3259_v3 }
 0x858   : > { %v3485_v15 = vor.u32 1.1754944e-38, %v3484_v10  ;;  %vm3483_vm12 = vcmp.eq.f32.partialorder %v3482_v36, 8.507059e+37 }
 0x859   : > { %v3470_v23 = vor.u32 1.1754944e-38, %v3469_v63  ;;  %vm3468_vm9 = vcmp.eq.f32.partialorder %v3467_v46, 8.507059e+37 }
 0x85b   : > { %v4715_v29 = vpop.eup %4714 }
 0x85c   : > { %v3474_v43 = vmul.f32 %v4715_v29, %v3261_v60  ;;  %vm3479_vm8 = vweird.f32 %v4715_v29 }
 0x85d   : > { %v4717_v45 = vpop.eup %4716  ;;  %vm7116_vm11 = vmor %vm3478_vm10, %vm3479_vm8 }
 0x85e   : > { %v3459_v40 = vmul.f32 %v4717_v45, %v3259_v3  ;;  %v7107_v14 = vpop.permute.xlu1 %3262  ;;  %v3475_v12 = vsub.f32 1.0, %v3474_v43  ;;  %vm3464_vm5 = vweird.f32 %v4717_v45 }
 0x85f   : > { %4718 = vrcp.f32 %v7107_v14  ;;  %vm3465_vm7 = vmor %vm3463_vm6, %vm3464_vm5  ;;  %v3499_v42 = vand.u32 2147483648, %v7107_v14  ;;  %vm3493_vm14 = vweird.f32 %v7107_v14  ;;  %v3497_v5 = vand.u32 2147483647, %v7107_v14 }
 0x860   : > { %v3460_v32 = vsub.f32 1.0, %v3459_v40  ;;  %v3476_v47 = vmul.f32 %v4715_v29, %v3475_v12  ;;  %4720 = vpow2.f32 %v2566_v27 }
 0x861   : > { %v3500_v40 = vor.u32 1.1754944e-38, %v3499_v42 }
 0x862   : > { %v3461_v37 = vmul.f32 %v4717_v45, %v3460_v32  ;;  %v2663_v28 = vpop.xlane.xlu2 %2662  ;;  %v3477_v21 = vadd.f32 %v4715_v29, %v3476_v47  ;;  %v7141_v32 = vpop.permute.xlu0 %3270 }
 0x863   : > { %v2695_v1 = vsub.f32 %v6790_v7, %v2663_v28 }
 0x864   : > { %v3462_v38 = vadd.f32 %v4717_v45, %v3461_v37  ;;  %v3481_v39 = vsel %vm7116_vm11, %v4715_v29, %v3477_v21 }
 0x865   : > { %v4719_v59 = vpop.eup %4718  ;;  %v2758_v41 = vmul.f32 1.442695, %v2695_v1  ;;  %v3486_v55 = vsel %vm3483_vm12, %v3485_v15, %v3481_v39 }
 0x866   : > { %v3489_v2 = vmul.f32 %v4719_v59, %v7107_v14  ;;  %v7112_v34 = vpop.permute.xlu1 %3264  ;;  %v3466_v22 = vsel %vm3465_vm7, %v4717_v45, %v3462_v38  ;;  %v4721_v6 = vpop.eup %4720  ;;  %vm3494_vm13 = vweird.f32 %v4719_v59  ;;  %v3487_v29 = vmul.f32 %v3486_v55, %v6827_v50 }
 0x867   : > { %4722 = vpow2.f32 %v2758_v41  ;;  %v3471_v7 = vsel %vm3468_vm9, %v3470_v23, %v3466_v22  ;;  %vm3495_vm15 = vmor %vm3493_vm14, %vm3494_vm13  ;;  %v3514_v50 = vand.u32 2147483648, %v7112_v34  ;;  %vm3508_vm3 = vweird.f32 %v7112_v34 }
 0x868   : > { %v3490_v19 = vsub.f32 1.0, %v3489_v2  ;;  %4724 = vrcp.f32 %v7112_v34  ;;  %v3472_v54 = vmul.f32 %v3471_v7, %v6831_v16  ;;  %v3512_v63 = vand.u32 2147483647, %v7112_v34 }
 0x869   : > { %v3189_v48 = vpop.f32.mrf.mxu2  ;;  %v3515_v38 = vor.u32 1.1754944e-38, %v3514_v50 }
 0x86a   : > { %v7120_v8 = vpop.permute.xlu2 %3266  ;;  %v3491_v4 = vmul.f32 %v4719_v59, %v3490_v19  ;;  %4243 = vmatmul.msk.f32.gmra.mxu3 %vm450_vm0, %v3472_v54  ;;  %vm3513_vm5 = vcmp.eq.f32.partialorder %v3512_v63, 8.507059e+37 }
 0x86b   : > { %4726 = vrcp.f32 %v7120_v8  ;;  %v3076_v61 = vpop.f32.mrf.mxu1  ;;  %vm3523_vm7 = vweird.f32 %v7120_v8  ;;  %v3527_v22 = vand.u32 2147483647, %v7120_v8 }
 0x86c   : > { %v7126_v53 = vadd.f32 %v3189_v48, %v3076_v61  ;;  %v3492_v24 = vadd.f32 %v4719_v59, %v3491_v4 }
 0x86d   : > { %v4723_v16 = vpop.eup %4722  ;;  %vm3528_vm9 = vcmp.eq.f32.partialorder %v3527_v22, 8.507059e+37  ;;  %v7215_v22 = vld [vmem:[%s7466_s11] ss:$0 sm:$0xff] }
 0x86e   : > { %v4725_v0 = vpop.eup %4724  ;;  %3292 = vrot.lane.b32.xlu2 %v7126_v53, %s4776_s15  ;;  %v2823_v20 = vsel %vm1054_vm1, %v4721_v6, %v4723_v16  ;;  %v7132_v33 = vpop.permute.xlu1 %3268  ;;  %v3496_v44 = vsel %vm3495_vm15, %v4719_v59, %v3492_v24  ;;  %vm3498_vm1 = vcmp.eq.f32.partialorder %v3497_v5, 8.507059e+37  ;;  %v3559_v5 = vand.u32 2147483648, %v7141_v32 }
 0x86f   : > { %v3504_v31 = vmul.f32 %v4725_v0, %v7112_v34  ;;  %3206 = vmatmul.f32.gmra.mxu2 %v2823_v20  ;;  %4728 = vrcp.f32 %v7132_v33  ;;  %v3501_v12 = vsel %vm3498_vm1, %v3500_v40, %v3496_v44  ;;  %vm3509_vm2 = vweird.f32 %v4725_v0 }
 0x870   : > { %v3502_v28 = vmul.f32 %v3501_v12, %v6847_v13  ;;  %4730 = vrcp.f32 %v7141_v32  ;;  %vm3510_vm4 = vmor %vm3508_vm3, %vm3509_vm2  ;;  %v3529_v13 = vand.u32 2147483648, %v7120_v8  ;;  %vm3538_vm11 = vweird.f32 %v7132_v33 }
 0x871   : > { %v4727_v60 = vpop.eup %4726  ;;  %v3505_v3 = vsub.f32 1.0, %v3504_v31  ;;  %v3542_v61 = vand.u32 2147483647, %v7132_v33  ;;  %vm3553_vm15 = vweird.f32 %v7141_v32  ;;  %v3560_v12 = vor.u32 1.1754944e-38, %v3559_v5 }
 0x872   : > { %v3519_v45 = vmul.f32 %v4727_v60, %v7120_v8  ;;  %4244 = vmatmul.msk.f32.gmra.mxu3 %vm450_vm0, %v3487_v29  ;;  %vm3524_vm6 = vweird.f32 %v4727_v60  ;;  %v3530_v36 = vor.u32 1.1754944e-38, %v3529_v13  ;;  %v7159_v54 = vpop.permute.xlu0 %3274 }
 0x873   : > { %v3506_v43 = vmul.f32 %v4725_v0, %v3505_v3  ;;  %vm3525_vm8 = vmor %vm3523_vm7, %vm3524_vm6  ;;  %vm3543_vm13 = vcmp.eq.f32.partialorder %v3542_v61, 8.507059e+37  ;;  %v3557_v3 = vand.u32 2147483647, %v7141_v32 }
 0x874   : > { %v3520_v14 = vsub.f32 1.0, %v3519_v45 }
 0x875   : > { %v3507_v27 = vadd.f32 %v4725_v0, %v3506_v43  ;;  %v4729_v37 = vpop.eup %4728  ;;  %vm3558_vm2 = vcmp.eq.f32.partialorder %v3557_v3, 8.507059e+37 }
 0x876   : > { %v3521_v47 = vmul.f32 %v4727_v60, %v3520_v14  ;;  %v3534_v46 = vmul.f32 %v4729_v37, %v7132_v33  ;;  %v7150_v2 = vpop.permute.xlu1 %3272  ;;  %v4731_v34 = vpop.eup %4730  ;;  %vm3539_vm10 = vweird.f32 %v4729_v37 }
 0x877   : > { %v3511_v1 = vsel %vm3510_vm4, %v4725_v0, %v3507_v27  ;;  %4732 = vrcp.f32 %v7150_v2  ;;  %v3549_v10 = vmul.f32 %v4731_v34, %v7141_v32  ;;  %vm3540_vm12 = vmor %vm3538_vm11, %vm3539_vm10  ;;  %vm3554_vm14 = vweird.f32 %v4731_v34 }
 0x878   : > { %v3516_v59 = vsel %vm3513_vm5, %v3515_v38, %v3511_v1  ;;  %v3522_v41 = vadd.f32 %v4727_v60, %v3521_v47  ;;  %v3535_v23 = vsub.f32 1.0, %v3534_v46  ;;  %4734 = vrcp.f32 %v7159_v54  ;;  %vm3555_vm1 = vmor %vm3553_vm15, %vm3554_vm14 }
 0x879   : > { %v3517_v21 = vmul.f32 %v3516_v59, %v6863_v62  ;;  %v3550_v4 = vsub.f32 1.0, %v3549_v10  ;;  %v3544_v62 = vand.u32 2147483648, %v7132_v33  ;;  %v3574_v50 = vand.u32 2147483648, %v7150_v2 }
 0x87a   : > { %4245 = vmatmul.msk.f32.gmra.mxu3 %vm450_vm0, %v3502_v28  ;;  %v3536_v19 = vmul.f32 %v4729_v37, %v3535_v23  ;;  %v3526_v7 = vsel %vm3525_vm8, %v4727_v60, %v3522_v41  ;;  %vm3568_vm4 = vweird.f32 %v7150_v2  ;;  %v3572_v63 = vand.u32 2147483647, %v7150_v2 }
 0x87b   : > { %v3531_v11 = vsel %vm3528_vm9, %v3530_v36, %v3526_v7  ;;  %v3551_v6 = vmul.f32 %v4731_v34, %v3550_v4  ;;  %v3545_v55 = vor.u32 1.1754944e-38, %v3544_v62  ;;  %v3575_v41 = vor.u32 1.1754944e-38, %v3574_v50 }
 0x87c   : > { %v3537_v48 = vadd.f32 %v4729_v37, %v3536_v19  ;;  %v3532_v39 = vmul.f32 %v3531_v11, %v6903_v51  ;;  %vm3573_vm6 = vcmp.eq.f32.partialorder %v3572_v63, 8.507059e+37  ;;  %vm3583_vm8 = vweird.f32 %v7159_v54 }
 0x87d   : > { %v7161_v8 = vpop.eup %4732  ;;  %v3552_v51 = vadd.f32 %v4731_v34, %v3551_v6  ;;  %v3589_v10 = vand.u32 2147483648, %v7159_v54  ;;  %v3587_v7 = vand.u32 2147483647, %v7159_v54 }
 0x87e   : > { %v3564_v15 = vmul.f32 %v7161_v8, %v7150_v2  ;;  %v3541_v20 = vsel %vm3540_vm12, %v4729_v37, %v3537_v48  ;;  %v7175_v33 = vpop.eup %4734  ;;  %v7177_v60 = vpop.permute.xlu1 %3276  ;;  %vm3569_vm3 = vweird.f32 %v7161_v8 }
 0x87f   : > { %v3546_v31 = vsel %vm3543_vm13, %v3545_v55, %v3541_v20  ;;  %v3579_v43 = vmul.f32 %v7175_v33, %v7159_v54  ;;  %4736 = vrcp.f32 %v7177_v60  ;;  %v3556_v40 = vsel %vm3555_vm1, %v4731_v34, %v3552_v51  ;;  %vm3570_vm5 = vmor %vm3568_vm4, %vm3569_vm3  ;;  %v7210_v2 = vpop.permute.xlu2 %3280 }
 0x880   : > { %v3565_v42 = vsub.f32 1.0, %v3564_v15  ;;  %v3547_v29 = vmul.f32 %v3546_v31, %v6872_v52  ;;  %v3561_v14 = vsel %vm3558_vm2, %v3560_v12, %v3556_v40  ;;  %vm3584_vm7 = vweird.f32 %v7175_v33 }
 0x881   : > { %v3192_v16 = vpop.f32.mrf.mxu2  ;;  %v3580_v27 = vsub.f32 1.0, %v3579_v43  ;;  %v3562_v28 = vmul.f32 %v3561_v14, %v6843_v9  ;;  %vm7221_vm9 = vmor %vm3583_vm8, %vm3584_vm7  ;;  %v3590_v61 = vor.u32 1.1754944e-38, %v3589_v10  ;;  %vm3588_vm10 = vcmp.eq.f32.partialorder %v3587_v7, 8.507059e+37 }
 0x882   : > { %4246 = vmatmul.msk.f32.gmra.mxu3 %vm450_vm0, %v3517_v21  ;;  %v3566_v45 = vmul.f32 %v7161_v8, %v3565_v42  ;;  %v3604_v55 = vand.u32 2147483648, %v7177_v60  ;;  %vm3598_vm12 = vweird.f32 %v7177_v60  ;;  %v3602_v31 = vand.u32 2147483647, %v7177_v60 }
 0x883   : > { %v3581_v47 = vmul.f32 %v7175_v33, %v3580_v27  ;;  %v3634_v10 = vand.u32 2147483648, %v7210_v2 }
 0x884   : > { %v3567_v32 = vadd.f32 %v7161_v8, %v3566_v45  ;;  %v3605_v45 = vor.u32 1.1754944e-38, %v3604_v55  ;;  %vm3603_vm14 = vcmp.eq.f32.partialorder %v3602_v31, 8.507059e+37 }
 0x885   : > { %v7192_v37 = vpop.eup %4736  ;;  %v3582_v9 = vadd.f32 %v7175_v33, %v3581_v47 }
 0x886   : > { %v3594_v1 = vmul.f32 %v7192_v37, %v7177_v60  ;;  %v3571_v59 = vsel %vm3570_vm5, %v7161_v8, %v3567_v32  ;;  %vm3599_vm11 = vweird.f32 %v7192_v37  ;;  %vm3628_vm5 = vweird.f32 %v7210_v2 }
 0x887   : > { %v3576_v34 = vsel %vm3573_vm6, %v3575_v41, %v3571_v59  ;;  %v3586_v48 = vsel %vm7221_vm9, %v7175_v33, %v3582_v9  ;;  %vm3600_vm13 = vmor %vm3598_vm12, %vm3599_vm11 }
 0x888   : > { %v7190_v52 = vpop.permute.xlu0 %3278  ;;  %v3595_v13 = vsub.f32 1.0, %v3594_v1  ;;  %v3577_v36 = vmul.f32 %v3576_v34, %v6894_v56 }
 0x889   : > { %4738 = vrcp.f32 %v7190_v52  ;;  %v3619_v14 = vand.u32 2147483648, %v7190_v52  ;;  %vm3613_vm1 = vweird.f32 %v7190_v52  ;;  %v3617_v32 = vand.u32 2147483647, %v7190_v52 }
 0x88a   : > { %4247 = vmatmul.msk.f32.gmra.mxu3 %vm450_vm0, %v3532_v39  ;;  %4740 = vrcp.f32 %v7210_v2  ;;  %v3596_v8 = vmul.f32 %v7192_v37, %v3595_v13  ;;  %v3591_v39 = vsel %vm3588_vm10, %v3590_v61, %v3586_v48 }
 0x88b   : > { %v3079_v0 = vpop.f32.mrf.mxu1  ;;  %v3592_v33 = vmul.f32 %v3591_v39, %v6881_v30  ;;  %v3620_v41 = vor.u32 1.1754944e-38, %v3619_v14  ;;  %vm3618_vm3 = vcmp.eq.f32.partialorder %v3617_v32, 8.507059e+37 }
 0x88c   : > { %v7171_v24 = vadd.f32 %v3192_v16, %v3079_v0  ;;  %v3597_v15 = vadd.f32 %v7192_v37, %v3596_v8  ;;  %v3635_v8 = vor.u32 1.1754944e-38, %v3634_v10 }
 0x88e   : > { %3294 = vrot.lane.b32.xlu1 %v7171_v24, %s4776_s15  ;;  %v3601_v60 = vsel %vm3600_vm13, %v7192_v37, %v3597_v15 }
 0x88f   : > { %v7217_v21 = vpop.eup %4738 }
 0x890   : > { %v3609_v54 = vmul.f32 %v7217_v21, %v7190_v52  ;;  %v7249_v6 = vpop.eup %4740  ;;  %vm3614_vm15 = vweird.f32 %v7217_v21 }
 0x891   : > { %v3624_v51 = vmul.f32 %v7249_v6, %v7210_v2  ;;  %vm3615_vm2 = vmor %vm3613_vm1, %vm3614_vm15  ;;  %vm3629_vm4 = vweird.f32 %v7249_v6 }
 0x892   : > { %4248 = vmatmul.msk.f32.gmra.mxu3 %vm450_vm0, %v3547_v29  ;;  %v3610_v16 = vsub.f32 1.0, %v3609_v54  ;;  %vm3630_vm6 = vmor %vm3628_vm5, %vm3629_vm4 }
 0x893   : > { %v3082_v44 = vpop.f32.mrf.mxu1  ;;  %v3625_v30 = vsub.f32 1.0, %v3624_v51 }
 0x894   : > { %v3611_v3 = vmul.f32 %v7217_v21, %v3610_v16 }
 0x895   : > { %v3626_v63 = vmul.f32 %v7249_v6, %v3625_v30 }
 0x896   : > { %v3612_v40 = vadd.f32 %v7217_v21, %v3611_v3 }
 0x898   : > { %v3616_v52 = vsel %vm3615_vm2, %v7217_v21, %v3612_v40  ;;  %v3632_v21 = vand.u32 2147483647, %v7210_v2 }
 0x89a   : > { %v3195_v46 = vpop.f32.mrf.mxu2  ;;  %4249 = vmatmul.msk.f32.gmra.mxu3 %vm450_vm0, %v3562_v28  ;;  %v7253_v0 = vpop.permute.xlu1 %3282  ;;  %vm3633_vm7 = vcmp.eq.f32.partialorder %v3632_v21, 8.507059e+37 }
 0x89b   : > { %v7202_v38 = vadd.f32 %v3195_v46, %v3082_v44  ;;  %v3085_v23 = vpop.f32.mrf.mxu1  ;;  %4742 = vrcp.f32 %v7253_v0  ;;  %v3606_v44 = vsel %vm3603_vm14, %v3605_v45, %v3601_v60  ;;  %v7297_v34 = vpop.permute.xlu2 %3286  ;;  %v3649_v39 = vand.u32 2147483648, %v7253_v0 }
 0x89c   : > { %v3607_v50 = vmul.f32 %v3606_v44, %v6914_v35  ;;  %v3621_v35 = vsel %vm3618_vm3, %v3620_v41, %v3616_v52  ;;  %vm3643_vm9 = vweird.f32 %v7253_v0  ;;  %vm3673_vm2 = vweird.f32 %v7297_v34 }
 0x89d   : > { %3296 = vrot.lane.b32.xlu0 %v7202_v38, %s4776_s15  ;;  %v3622_v19 = vmul.f32 %v3621_v35, %v6947_v18  ;;  %v3650_v51 = vor.u32 1.1754944e-38, %v3649_v39 }
 0x8a1   : > { %v7276_v27 = vpop.eup %4742 }
 0x8a2   : > { %v3198_v11 = vpop.f32.mrf.mxu2  ;;  %v3939_v4 = vpop.f32.mrf.mxu3  ;;  %4250 = vmatmul.msk.f32.gmra.mxu3 %vm450_vm0, %v3577_v36  ;;  %v3639_v46 = vmul.f32 %v7276_v27, %v7253_v0  ;;  %vm3644_vm8 = vweird.f32 %v7276_v27 }
 0x8a3   : > { %v7241_v62 = vadd.f32 %v3198_v11, %v3085_v23  ;;  %v3940_v56 = vadd.f32 %v7215_v22, %v3939_v4  ;;  %v3088_v20 = vpop.f32.mrf.mxu1  ;;  %v3627_v23 = vadd.f32 %v7249_v6, %v3626_v63  ;;  %vm3645_vm10 = vmor %vm3643_vm9, %vm3644_vm8 }
 0x8a4   : > { %v3640_v9 = vsub.f32 1.0, %v3639_v46 }
 0x8a5   : > { %4035 = vst.msk [vmem:[%s7233_s20] sm:$0xff] %vm450_vm0, %v3940_v56  ;;  %3298 = vrot.lane.b32.xlu2 %v7241_v62, %s4776_s15  ;;  %v3631_v48 = vsel %vm3630_vm6, %v7249_v6, %v3627_v23  ;;  %v3647_v6 = vand.u32 2147483647, %v7253_v0 }
 0x8a6   : > { %v3641_v36 = vmul.f32 %v7276_v27, %v3640_v9  ;;  %v3636_v2 = vsel %vm3633_vm7, %v3635_v8, %v3631_v48 }
 0x8a7   : > { %v3637_v15 = vmul.f32 %v3636_v2, %v6987_v25  ;;  %vm3648_vm11 = vcmp.eq.f32.partialorder %v3647_v6, 8.507059e+37 }
 0x8a8   : > { %v7274_v12 = vpop.permute.xlu0 %3284  ;;  %v3642_v18 = vadd.f32 %v7276_v27, %v3641_v36 }
 0x8a9   : > { %4744 = vrcp.f32 %v7274_v12  ;;  %v3664_v3 = vand.u32 2147483648, %v7274_v12  ;;  %vm3658_vm13 = vweird.f32 %v7274_v12  ;;  %v3662_v60 = vand.u32 2147483647, %v7274_v12 }
 0x8aa   : > { %v3201_v42 = vpop.f32.mrf.mxu2  ;;  %v3942_v5 = vpop.f32.mrf.mxu3  ;;  %4251 = vmatmul.msk.f32.gmra.mxu3 %vm450_vm0, %v3592_v33  ;;  %4746 = vrcp.f32 %v7297_v34  ;;  %v3646_v33 = vsel %vm3645_vm10, %v7276_v27, %v3642_v18 }
 0x8ab   : > { %v7263_v29 = vadd.f32 %v3201_v42, %v3088_v20  ;;  %v3943_v43 = vadd.f32 %v7215_v22, %v3942_v5  ;;  %v3091_v37 = vpop.f32.mrf.mxu1  ;;  %v3651_v0 = vsel %vm3648_vm11, %v3650_v51, %v3646_v33  ;;  %v3665_v32 = vor.u32 1.1754944e-38, %v3664_v3 }
 0x8ac   : > { %v3652_v45 = vmul.f32 %v3651_v0, %v7015_v58  ;;  %vm3663_vm15 = vcmp.eq.f32.partialorder %v3662_v60, 8.507059e+37 }
 0x8ad   : > { %4036 = vst.msk [vmem:[%s7233_s20 + $0x8] sm:$0xff] %vm450_vm0, %v3943_v43  ;;  %3300 = vrot.lane.b32.xlu1 %v7263_v29, %s4776_s15 }
 0x8af   : > { %v4745_v13 = vpop.eup %4744 }
 0x8b0   : > { %v3654_v11 = vmul.f32 %v4745_v13, %v7274_v12  ;;  %v4747_v61 = vpop.eup %4746  ;;  %vm3659_vm12 = vweird.f32 %v4745_v13 }
 0x8b1   : > { %v3669_v20 = vmul.f32 %v4747_v61, %v7297_v34  ;;  %vm3660_vm14 = vmor %vm3658_vm13, %vm3659_vm12  ;;  %vm3674_vm1 = vweird.f32 %v4747_v61 }
 0x8b2   : > { %v3204_v28 = vpop.f32.mrf.mxu2  ;;  %v3945_v47 = vpop.f32.mrf.mxu3  ;;  %4252 = vmatmul.msk.f32.gmra.mxu3 %vm450_vm0, %v3607_v50  ;;  %v3655_v54 = vsub.f32 1.0, %v3654_v11  ;;  %vm3675_vm3 = vmor %vm3673_vm2, %vm3674_vm1 }
 0x8b3   : > { %v7286_v1 = vadd.f32 %v3204_v28, %v3091_v37  ;;  %v3946_v59 = vadd.f32 %v7215_v22, %v3945_v47  ;;  %v3670_v42 = vsub.f32 1.0, %v3669_v20  ;;  %v3679_v28 = vand.u32 2147483648, %v7297_v34 }
 0x8b4   : > { %v3656_v55 = vmul.f32 %v4745_v13, %v3655_v54  ;;  %v3677_v47 = vand.u32 2147483647, %v7297_v34 }
 0x8b5   : > { %4037 = vst.msk [vmem:[%s7233_s20 + $0x10] sm:$0xff] %vm450_vm0, %v3946_v59  ;;  %3302 = vrot.lane.b32.xlu0 %v7286_v1, %s4776_s15  ;;  %v3671_v44 = vmul.f32 %v4747_v61, %v3670_v42  ;;  %v3680_v9 = vor.u32 1.1754944e-38, %v3679_v28 }
 0x8b6   : > { %v3657_v25 = vadd.f32 %v4745_v13, %v3656_v55  ;;  %vm3678_vm4 = vcmp.eq.f32.partialorder %v3677_v47, 8.507059e+37 }
 0x8b7   : > { %v3672_v12 = vadd.f32 %v4747_v61, %v3671_v44 }
 0x8b8   : > { %v3661_v14 = vsel %vm3660_vm14, %v4745_v13, %v3657_v25 }
 0x8b9   : > { %v3666_v37 = vsel %vm3663_vm15, %v3665_v32, %v3661_v14  ;;  %v3676_v23 = vsel %vm3675_vm3, %v4747_v61, %v3672_v12 }
 0x8ba   : > { %v3948_v7 = vpop.f32.mrf.mxu3  ;;  %4253 = vmatmul.msk.f32.gmra.mxu3 %vm450_vm0, %v3622_v19  ;;  %v7313_v56 = vpop.permute.xlu1 %3288  ;;  %v3667_v46 = vmul.f32 %v3666_v37, %v7053_v26  ;;  %v3681_v13 = vsel %vm3678_vm4, %v3680_v9, %v3676_v23 }
 0x8bb   : > { %v3949_v4 = vadd.f32 %v7215_v22, %v3948_v7  ;;  %4748 = vrcp.f32 %v7313_v56  ;;  %v3694_v21 = vand.u32 2147483648, %v7313_v56  ;;  %vm3688_vm6 = vweird.f32 %v7313_v56 }
 0x8bc   : > { %v3692_v19 = vand.u32 2147483647, %v7313_v56  ;;  %v3682_v7 = vmul.f32 %v3681_v13, %v7073_v17 }
 0x8bd   : > { %4038 = vst.msk [vmem:[%s7233_s20 + $0x18] sm:$0xff] %vm450_vm0, %v3949_v4  ;;  %v3695_v2 = vor.u32 1.1754944e-38, %v3694_v21 }
 0x8be   : > { %vm3693_vm8 = vcmp.eq.f32.partialorder %v3692_v19, 8.507059e+37 }
 0x8c1   : > { %v4749_v5 = vpop.eup %4748 }
 0x8c2   : > { %v3951_v16 = vpop.f32.mrf.mxu3  ;;  %4254 = vmatmul.msk.f32.gmra.mxu3 %vm450_vm0, %v3637_v15  ;;  %v3684_v40 = vmul.f32 %v4749_v5, %v7313_v56  ;;  %vm3689_vm5 = vweird.f32 %v4749_v5 }
 0x8c3   : > { %v3952_v31 = vadd.f32 %v7215_v22, %v3951_v16  ;;  %vm3690_vm7 = vmor %vm3688_vm6, %vm3689_vm5 }
 0x8c4   : > { %v3685_v58 = vsub.f32 1.0, %v3684_v40 }
 0x8c5   : > { %4039 = vst.msk [vmem:[%s7233_s20 + $0x20] sm:$0xff] %vm450_vm0, %v3952_v31 }
 0x8c6   : > { %v3686_v52 = vmul.f32 %v4749_v5, %v3685_v58 }
 0x8c8   : > { %v7327_v43 = vpop.permute.xlu0 %3290  ;;  %v3293_v50 = vpop.permute.xlu2 %3292  ;;  %v3687_v10 = vadd.f32 %v4749_v5, %v3686_v52 }
 0x8c9   : > { %4750 = vrcp.f32 %v7327_v43  ;;  %v3709_v56 = vand.u32 2147483648, %v7327_v43  ;;  %vm3703_vm10 = vweird.f32 %v7327_v43  ;;  %v3707_v17 = vand.u32 2147483647, %v7327_v43 }
 0x8ca   : > { %v3954_v30 = vpop.f32.mrf.mxu3  ;;  %4255 = vmatmul.msk.f32.gmra.mxu3 %vm450_vm0, %v3652_v45  ;;  %4752 = vrcp.f32 %v3293_v50  ;;  %v3691_v8 = vsel %vm3690_vm7, %v4749_v5, %v3687_v10  ;;  %v3724_v31 = vand.u32 2147483648, %v3293_v50  ;;  %vm3718_vm14 = vweird.f32 %v3293_v50 }
 0x8cb   : > { %v3955_v27 = vadd.f32 %v7215_v22, %v3954_v30  ;;  %v3696_v18 = vsel %vm3693_vm8, %v3695_v2, %v3691_v8  ;;  %v3710_v16 = vor.u32 1.1754944e-38, %v3709_v56  ;;  %vm3708_vm12 = vcmp.eq.f32.partialorder %v3707_v17, 8.507059e+37 }
 0x8cc   : > { %v3697_v39 = vmul.f32 %v3696_v18, %v7088_v57  ;;  %v3722_v33 = vand.u32 2147483647, %v3293_v50  ;;  %v3725_v0 = vor.u32 1.1754944e-38, %v3724_v31 }
 0x8cd   : > { %4040 = vst.msk [vmem:[%s7233_s20 + $0x28] sm:$0xff] %vm450_vm0, %v3955_v27 }
 0x8ce   : > { %vm3723_vm1 = vcmp.eq.f32.partialorder %v3722_v33, 8.507059e+37 }
 0x8cf   : > { %v4751_v63 = vpop.eup %4750 }
 0x8d0   : > { %v3699_v41 = vmul.f32 %v4751_v63, %v7327_v43  ;;  %v4753_v34 = vpop.eup %4752  ;;  %vm3704_vm9 = vweird.f32 %v4751_v63  ;;  %v3094_v43 = vpop.f32.mrf.mxu1 }
 0x8d1   : > { %v3714_v4 = vmul.f32 %v4753_v34, %v3293_v50  ;;  %vm3705_vm11 = vmor %vm3703_vm10, %vm3704_vm9  ;;  %vm3719_vm13 = vweird.f32 %v4753_v34 }
 0x8d2   : > { %v3957_v59 = vpop.f32.mrf.mxu3  ;;  %4256 = vmatmul.msk.f32.gmra.mxu3 %vm450_vm0, %v3667_v46  ;;  %v3700_v26 = vsub.f32 1.0, %v3699_v41  ;;  %vm3720_vm15 = vmor %vm3718_vm14, %vm3719_vm13 }
 0x8d3   : > { %v3958_v35 = vadd.f32 %v7215_v22, %v3957_v59  ;;  %v3715_v61 = vsub.f32 1.0, %v3714_v4 }
 0x8d4   : > { %v3701_v11 = vmul.f32 %v4751_v63, %v3700_v26 }
 0x8d5   : > { %4041 = vst.msk [vmem:[%s7233_s20 + $0x30] sm:$0xff] %vm450_vm0, %v3958_v35  ;;  %v3716_v6 = vmul.f32 %v4753_v34, %v3715_v61 }
 0x8d6   : > { %v3702_v54 = vadd.f32 %v4751_v63, %v3701_v11 }
 0x8d7   : > { %v3717_v55 = vadd.f32 %v4753_v34, %v3716_v6 }
 0x8d8   : > { %v3706_v15 = vsel %vm3705_vm11, %v4751_v63, %v3702_v54 }
 0x8d9   : > { %v3711_v20 = vsel %vm3708_vm12, %v3710_v16, %v3706_v15  ;;  %v3721_v57 = vsel %vm3720_vm15, %v4753_v34, %v3717_v55 }
 0x8da   : > { %v3960_v36 = vpop.f32.mrf.mxu3  ;;  %4257 = vmatmul.msk.f32.gmra.mxu3 %vm450_vm0, %v3682_v7  ;;  %v3712_v51 = vmul.f32 %v3711_v20, %v7100_v49  ;;  %v3726_v25 = vsel %vm3723_vm1, %v3725_v0, %v3721_v57 }
 0x8db   : > { %v3961_v48 = vadd.f32 %v7215_v22, %v3960_v36  ;;  %v3727_v3 = vmul.f32 %v3726_v25, %v7126_v53 }
 0x8dd   : > { %4042 = vst.msk [vmem:[%s7233_s20 + $0x38] sm:$0xff] %vm450_vm0, %v3961_v48 }
 0x8e2   : > { %4258 = vmatmul.msk.f32.gmra.mxu3 %vm450_vm0, %v3697_v39 }
 0x8ea   : > { %4259 = vmatmul.msk.f32.gmra.mxu3 %vm450_vm0, %v3712_v51 }
 0x8ed   : > { %v3963_v42 = vpop.f32.mrf.mxu3 }
 0x8ee   : > { %v3964_v5 = vadd.f32 %v7215_v22, %v3963_v42 }
 0x8f0   : > { %4043 = vst.msk [vmem:[%s7233_s20 + $0x40] sm:$0xff] %vm450_vm0, %v3964_v5 }
 0x8f2   : > { %v3207_v60 = vpop.f32.mrf.mxu2  ;;  %4260 = vmatmul.msk.f32.gmra.mxu3 %vm450_vm0, %v3727_v3 }
 0x8f3   : > { %v7366_v45 = vadd.f32 %v3207_v60, %v3094_v43 }
 0x8f5   : > { %3304 = vrot.lane.b32.xlu2 %v7366_v45, %s4776_s15  ;;  %v3966_v49 = vpop.f32.mrf.mxu3 }
 0x8f6   : > { %v3967_v30 = vadd.f32 %v7215_v22, %v3966_v49 }
 0x8f8   : > { %4044 = vst.msk [vmem:[%s7233_s20 + $0x48] sm:$0xff] %vm450_vm0, %v3967_v30 }
 0x8fd   : > { %v3969_v44 = vpop.f32.mrf.mxu3 }
 0x8fe   : > { %v3970_v40 = vadd.f32 %v7215_v22, %v3969_v44 }
 0x8ff   : > { %v3299_v37 = vpop.permute.xlu2 %3298 }
 0x900   : > { %v3295_v27 = vpop.permute.xlu1 %3294  ;;  %4045 = vst.msk [vmem:[%s7233_s20 + $0x50] sm:$0xff] %vm450_vm0, %v3970_v40  ;;  %v3769_v39 = vand.u32 2147483648, %v3299_v37  ;;  %vm3763_vm11 = vweird.f32 %v3299_v37  ;;  %v3767_v15 = vand.u32 2147483647, %v3299_v37 }
 0x901   : > { %4754 = vrcp.f32 %v3295_v27  ;;  %v3739_v63 = vand.u32 2147483648, %v3295_v27  ;;  %v3737_v28 = vand.u32 2147483647, %v3295_v27  ;;  %vm3733_vm3 = vweird.f32 %v3295_v27 }
 0x902   : > { %4756 = vrcp.f32 %v3299_v37  ;;  %v3770_v55 = vor.u32 1.1754944e-38, %v3769_v39  ;;  %vm3768_vm13 = vcmp.eq.f32.partialorder %v3767_v15, 8.507059e+37 }
 0x903   : > { %v3740_v41 = vor.u32 1.1754944e-38, %v3739_v63  ;;  %vm3738_vm5 = vcmp.eq.f32.partialorder %v3737_v28, 8.507059e+37 }
 0x905   : > { %v3972_v53 = vpop.f32.mrf.mxu3 }
 0x906   : > { %v3973_v32 = vadd.f32 %v7215_v22, %v3972_v53 }
 0x907   : > { %v4755_v14 = vpop.eup %4754 }
 0x908   : > { %v3729_v12 = vmul.f32 %v4755_v14, %v3295_v27  ;;  %4046 = vst.msk [vmem:[%s7233_s20 + $0x58] sm:$0xff] %vm450_vm0, %v3973_v32  ;;  %vm3734_vm2 = vweird.f32 %v4755_v14  ;;  %v4757_v35 = vpop.eup %4756 }
 0x909   : > { %vm3735_vm4 = vmor %vm3733_vm3, %vm3734_vm2  ;;  %v3759_v10 = vmul.f32 %v4757_v35, %v3299_v37  ;;  %vm3764_vm9 = vweird.f32 %v4757_v35 }
 0x90a   : > { %v3730_v58 = vsub.f32 1.0, %v3729_v12  ;;  %vm3765_vm12 = vmor %vm3763_vm11, %vm3764_vm9 }
 0x90b   : > { %v3760_v7 = vsub.f32 1.0, %v3759_v10 }
 0x90c   : > { %v3731_v50 = vmul.f32 %v4755_v14, %v3730_v58 }
 0x90d   : > { %v3975_v46 = vpop.f32.mrf.mxu3  ;;  %v3761_v48 = vmul.f32 %v4757_v35, %v3760_v7 }
 0x90e   : > { %v3732_v47 = vadd.f32 %v4755_v14, %v3731_v50  ;;  %v3976_v59 = vadd.f32 %v7215_v22, %v3975_v46 }
 0x90f   : > { %v3297_v52 = vpop.permute.xlu0 %3296  ;;  %v3762_v17 = vadd.f32 %v4757_v35, %v3761_v48 }
 0x910   : > { %4758 = vrcp.f32 %v3297_v52  ;;  %4047 = vst.msk [vmem:[%s7233_s20 + $0x60] sm:$0xff] %vm450_vm0, %v3976_v59  ;;  %v3736_v23 = vsel %vm3735_vm4, %v4755_v14, %v3732_v47  ;;  %v3754_v4 = vand.u32 2147483648, %v3297_v52  ;;  %v3752_v8 = vand.u32 2147483647, %v3297_v52 }
 0x911   : > { %v3741_v9 = vsel %vm3738_vm5, %v3740_v41, %v3736_v23  ;;  %vm3748_vm7 = vweird.f32 %v3297_v52  ;;  %v3766_v20 = vsel %vm3765_vm12, %v4757_v35, %v3762_v17 }
 0x912   : > { %v3742_v13 = vmul.f32 %v3741_v9, %v7171_v24  ;;  %v3755_v18 = vor.u32 1.1754944e-38, %v3754_v4  ;;  %vm3753_vm10 = vcmp.eq.f32.partialorder %v3752_v8, 8.507059e+37  ;;  %v3771_v42 = vsel %vm3768_vm13, %v3770_v55, %v3766_v20 }
 0x914   : > { %4261 = vmatmul.msk.f32.gmra.mxu3 %vm450_vm0, %v3742_v13 }
 0x915   : > { %v3978_v34 = vpop.f32.mrf.mxu3 }
 0x916   : > { %v4759_v26 = vpop.eup %4758  ;;  %v3979_v19 = vadd.f32 %v7215_v22, %v3978_v34 }
 0x917   : > { %v3744_v21 = vmul.f32 %v4759_v26, %v3297_v52  ;;  %vm3749_vm6 = vweird.f32 %v4759_v26 }
 0x918   : > { %4048 = vst.msk [vmem:[%s7233_s20 + $0x68] sm:$0xff] %vm450_vm0, %v3979_v19  ;;  %vm3750_vm8 = vmor %vm3748_vm7, %vm3749_vm6 }
 0x919   : > { %v3745_v36 = vsub.f32 1.0, %v3744_v21 }
 0x91b   : > { %v3746_v11 = vmul.f32 %v4759_v26, %v3745_v36 }
 0x91d   : > { %v3747_v2 = vadd.f32 %v4759_v26, %v3746_v11  ;;  %v3981_v24 = vpop.f32.mrf.mxu3 }
 0x91e   : > { %v3982_v54 = vadd.f32 %v7215_v22, %v3981_v24 }
 0x91f   : > { %v3301_v61 = vpop.permute.xlu1 %3300  ;;  %v3751_v56 = vsel %vm3750_vm8, %v4759_v26, %v3747_v2 }
 0x920   : > { %4760 = vrcp.f32 %v3301_v61  ;;  %4049 = vst.msk [vmem:[%s7233_s20 + $0x70] sm:$0xff] %vm450_vm0, %v3982_v54  ;;  %v3756_v6 = vsel %vm3753_vm10, %v3755_v18, %v3751_v56  ;;  %v3784_v5 = vand.u32 2147483648, %v3301_v61  ;;  %v3782_v43 = vand.u32 2147483647, %v3301_v61 }
 0x921   : > { %v3757_v16 = vmul.f32 %v3756_v6, %v7202_v38  ;;  %v3772_v38 = vmul.f32 %v3771_v42, %v7241_v62  ;;  %vm3778_vm15 = vweird.f32 %v3301_v61 }
 0x922   : > { %v3785_v30 = vor.u32 1.1754944e-38, %v3784_v5  ;;  %vm3783_vm2 = vcmp.eq.f32.partialorder %v3782_v43, 8.507059e+37 }
 0x923   : > { %4262 = vmatmul.msk.f32.gmra.mxu3 %vm450_vm0, %v3757_v16 }
 0x925   : > { %v3984_v33 = vpop.f32.mrf.mxu3 }
 0x926   : > { %v4761_v31 = vpop.eup %4760  ;;  %v3985_v57 = vadd.f32 %v7215_v22, %v3984_v33 }
 0x927   : > { %v3774_v51 = vmul.f32 %v4761_v31, %v3301_v61  ;;  %v3303_v0 = vpop.permute.xlu0 %3302  ;;  %vm3779_vm14 = vweird.f32 %v4761_v31 }
 0x928   : > { %4762 = vrcp.f32 %v3303_v0  ;;  %4050 = vst.msk [vmem:[%s7233_s20 + $0x78] sm:$0xff] %vm450_vm0, %v3985_v57  ;;  %vm3780_vm1 = vmor %vm3778_vm15, %vm3779_vm14  ;;  %v3799_v37 = vand.u32 2147483648, %v3303_v0  ;;  %v3797_v58 = vand.u32 2147483647, %v3303_v0  ;;  %vm3793_vm4 = vweird.f32 %v3303_v0 }
 0x929   : > { %v3775_v25 = vsub.f32 1.0, %v3774_v51 }
 0x92a   : > { %v3800_v63 = vor.u32 1.1754944e-38, %v3799_v37  ;;  %vm3798_vm6 = vcmp.eq.f32.partialorder %v3797_v58, 8.507059e+37 }
 0x92b   : > { %v3776_v3 = vmul.f32 %v4761_v31, %v3775_v25  ;;  %4263 = vmatmul.msk.f32.gmra.mxu3 %vm450_vm0, %v3772_v38 }
 0x92d   : > { %v3777_v60 = vadd.f32 %v4761_v31, %v3776_v3  ;;  %v3987_v44 = vpop.f32.mrf.mxu3 }
 0x92e   : > { %v4763_v49 = vpop.eup %4762  ;;  %v3988_v53 = vadd.f32 %v7215_v22, %v3987_v44 }
 0x92f   : > { %v3781_v40 = vsel %vm3780_vm1, %v4761_v31, %v3777_v60  ;;  %v3789_v27 = vmul.f32 %v4763_v49, %v3303_v0  ;;  %vm3794_vm3 = vweird.f32 %v4763_v49 }
 0x930   : > { %v3786_v14 = vsel %vm3783_vm2, %v3785_v30, %v3781_v40  ;;  %4051 = vst.msk [vmem:[%s7233_s20 + $0x80] sm:$0xff] %vm450_vm0, %v3988_v53  ;;  %vm3795_vm5 = vmor %vm3793_vm4, %vm3794_vm3 }
 0x931   : > { %v3790_v32 = vsub.f32 1.0, %v3789_v27  ;;  %v3787_v62 = vmul.f32 %v3786_v14, %v7263_v29 }
 0x933   : > { %v3791_v12 = vmul.f32 %v4763_v49, %v3790_v32  ;;  %4264 = vmatmul.msk.f32.gmra.mxu3 %vm450_vm0, %v3787_v62 }
 0x935   : > { %v3792_v50 = vadd.f32 %v4763_v49, %v3791_v12  ;;  %v3990_v28 = vpop.f32.mrf.mxu3 }
 0x936   : > { %v3991_v46 = vadd.f32 %v7215_v22, %v3990_v28 }
 0x937   : > { %v3796_v47 = vsel %vm3795_vm5, %v4763_v49, %v3792_v50 }
 0x938   : > { %v3801_v59 = vsel %vm3798_vm6, %v3800_v63, %v3796_v47  ;;  %4052 = vst.msk [vmem:[%s7233_s20 + $0x88] sm:$0xff] %vm450_vm0, %v3991_v46 }
 0x939   : > { %v3802_v29 = vmul.f32 %v3801_v59, %v7286_v1 }
 0x93b   : > { %4265 = vmatmul.msk.f32.gmra.mxu3 %vm450_vm0, %v3802_v29 }
 0x93d   : > { %v3993_v52 = vpop.f32.mrf.mxu3 }
 0x93e   : > { %v3994_v41 = vadd.f32 %v7215_v22, %v3993_v52 }
 0x940   : > { %4053 = vst.msk [vmem:[%s7233_s20 + $0x90] sm:$0xff] %vm450_vm0, %v3994_v41 }
 0x945   : > { %v3996_v35 = vpop.f32.mrf.mxu3 }
 0x946   : > { %v3997_v23 = vadd.f32 %v7215_v22, %v3996_v35 }
 0x948   : > { %4054 = vst.msk [vmem:[%s7233_s20 + $0x98] sm:$0xff] %vm450_vm0, %v3997_v23 }
 0x94d   : > { %v3999_v9 = vpop.f32.mrf.mxu3 }
 0x94e   : > { %v4000_v13 = vadd.f32 %v7215_v22, %v3999_v9 }
 0x94f   : > { %v3305_v10 = vpop.permute.xlu2 %3304 }
 0x950   : > { %4764 = vrcp.f32 %v3305_v10  ;;  %4055 = vst.msk [vmem:[%s7233_s20 + $0xa0] sm:$0xff] %vm450_vm0, %v4000_v13  ;;  %v3814_v7 = vand.u32 2147483648, %v3305_v10  ;;  %v3812_v11 = vand.u32 2147483647, %v3305_v10  ;;  %vm3808_vm8 = vweird.f32 %v3305_v10 }
 0x952   : > { %v3815_v48 = vor.u32 1.1754944e-38, %v3814_v7  ;;  %vm3813_vm10 = vcmp.eq.f32.partialorder %v3812_v11, 8.507059e+37 }
 0x955   : > { %v4002_v26 = vpop.f32.mrf.mxu3 }
 0x956   : > { %v4765_v1 = vpop.eup %4764  ;;  %v4003_v21 = vadd.f32 %v7215_v22, %v4002_v26 }
 0x957   : > { %v3804_v34 = vmul.f32 %v4765_v1, %v3305_v10  ;;  %vm3809_vm7 = vweird.f32 %v4765_v1 }
 0x958   : > { %4056 = vst.msk [vmem:[%s7233_s20 + $0xa8] sm:$0xff] %vm450_vm0, %v4003_v21  ;;  %vm3810_vm9 = vmor %vm3808_vm8, %vm3809_vm7 }
 0x959   : > { %v3805_v19 = vsub.f32 1.0, %v3804_v34 }
 0x95b   : > { %v3806_v36 = vmul.f32 %v4765_v1, %v3805_v19 }
 0x95d   : > { %v3807_v4 = vadd.f32 %v4765_v1, %v3806_v36  ;;  %v4005_v8 = vpop.f32.mrf.mxu3 }
 0x95e   : > { %v4006_v24 = vadd.f32 %v7215_v22, %v4005_v8 }
 0x95f   : > { %v3811_v2 = vsel %vm3810_vm9, %v4765_v1, %v3807_v4 }
 0x960   : > { %v3816_v18 = vsel %vm3813_vm10, %v3815_v48, %v3811_v2  ;;  %4057 = vst.msk [vmem:[%s7233_s20 + $0xb0] sm:$0xff] %vm450_vm0, %v4006_v24 }
 0x961   : > { %v3817_v54 = vmul.f32 %v3816_v18, %v7366_v45 }
 0x963   : > { %4266 = vmatmul.msk.f32.gmra.mxu3 %vm450_vm0, %v3817_v54 }
 0x965   : > { %v4008_v61 = vpop.f32.mrf.mxu3 }
 0x966   : > { %v4009_v56 = vadd.f32 %v7215_v22, %v4008_v61 }
 0x968   : > { %4058 = vst.msk [vmem:[%s7233_s20 + $0xb8] sm:$0xff] %vm450_vm0, %v4009_v56 }
 0x96d   : > { %v4011_v17 = vpop.f32.mrf.mxu3 }
 0x96e   : > { %v4012_v39 = vadd.f32 %v7215_v22, %v4011_v17 }
 0x970   : > { %4059 = vst.msk [vmem:[%s7233_s20 + $0xc0] sm:$0xff] %vm450_vm0, %v4012_v39 }
 0x975   : > { %v4014_v6 = vpop.f32.mrf.mxu3 }
 0x976   : > { %v4015_v15 = vadd.f32 %v7215_v22, %v4014_v6 }
 0x978   : > { %4060 = vst.msk [vmem:[%s7233_s20 + $0xc8] sm:$0xff] %vm450_vm0, %v4015_v15 }
 0x997   : > { %v4017_v45 = vpop.f32.mrf.mxu3 }
 0x998   : > { %v4018_v16 = vadd.f32 %v7215_v22, %v4017_v45 }
 0x99a   : > { %4061 = vst.msk [vmem:[%s7233_s20 + $0xd0] sm:$0xff] %vm450_vm0, %v4018_v16 }
 0x9a6   : > { %v4020_v20 = vpop.f32.mrf.mxu3 }
 0x9a7   : > { %v4021_v55 = vadd.f32 %v7215_v22, %v4020_v20 }
 0x9a9   : > { %4062 = vst.msk [vmem:[%s7233_s20 + $0xd8] sm:$0xff] %vm450_vm0, %v4021_v55 }
 0x9ae   : > { %v4023_v31 = vpop.f32.mrf.mxu3 }
 0x9af   : > { %v4024_v33 = vadd.f32 %v7215_v22, %v4023_v31 }
 0x9b1   : > { %4063 = vst.msk [vmem:[%s7233_s20 + $0xe0] sm:$0xff] %vm450_vm0, %v4024_v33 }
 0x9b6   : > { %v4026_v51 = vpop.f32.mrf.mxu3 }
 0x9b7   : > { %v4027_v57 = vadd.f32 %v7215_v22, %v4026_v51 }
 0x9b9   : > { %4064 = vst.msk [vmem:[%s7233_s20 + $0xe8] sm:$0xff] %vm450_vm0, %v4027_v57 }
 0x9be   : > { %v4029_v0 = vpop.f32.mrf.mxu3 }
 0x9bf   : > { %v4030_v42 = vadd.f32 %v7215_v22, %v4029_v0 }
 0x9c1   : > { %4065 = vst.msk [vmem:[%s7233_s20 + $0xf0] sm:$0xff] %vm450_vm0, %v4030_v42 }
 0x9e6   : > { %v4032_v25 = vpop.f32.mrf.mxu3 }
 0x9e7   : > { %v4033_v5 = vadd.f32 %v7215_v22, %v4032_v25 }
 0x9e9   : > { %4066 = vst.msk [vmem:[%s7233_s20 + $0xf8] sm:$0xff] %vm450_vm0, %v4033_v5 }
 0x9ea PF: > { %s22_s21 = sadd.s32 1, %s4772_s21  }
 0x9eb   : > { %p19_p4 = scmp.ge.s32.totalorder %s22_s21, 4  }
 0x9ed   :  { %21 = sbr.rel (!%p19_p4) target bundleno = 1 (0x1), region = 98 }

</bundles_post_ra>
